<compile_context>
chip_gen: v6e
topology: v6e:2x2x1
jax: 0.10.0
libtpu: 0.0.40
codegen_flags: <defaults>
</compile_context>

<pallas_src>
import functools

import jax
import jax.numpy as jnp
from jax import lax
from jax.experimental import pallas as pl
from jax.experimental.pallas import tpu as pltpu

_EPS = 1e-5
_LANE = 128


# ----------------------------- Pallas kernel --------------------------------

def _bottleneck_kernel(x_ref, halo_ref, w1_ref, b1_ref, w2_ref, b2_ref,
                       w3_ref, b3_ref, o_ref):
    i = pl.program_id(1)
    n_tiles = pl.num_programs(1)

    _, th, w_out, cout = o_ref.shape          # (1, tile_h, W, Cout_p)
    _, _, wp2, cin = x_ref.shape              # (1, tile_h, Wpad, Cin_p)
    cw = w1_ref.shape[1]                      # padded bottleneck width
    n_out = th * wp2                          # rows in the interior tile
    big = (th + 2) * wp2                      # rows incl. the 2 halo rows

    # ---- conv1 (1x1, BN1 folded) + bias + ReLU on interior and halo rows ---
    xf = x_ref[...].reshape(n_out, cin)                       # bf16
    a1 = jnp.dot(xf, w1_ref[...], preferred_element_type=jnp.float32)
    a1 = jnp.maximum(a1 + b1_ref[...], 0.0).reshape(th, wp2, cw)

    hf = halo_ref[...].reshape(2 * wp2, cin)                  # bf16, 2 rows
    ah = jnp.dot(hf, w1_ref[...], preferred_element_type=jnp.float32)
    ah = jnp.maximum(ah + b1_ref[...], 0.0).reshape(2, wp2, cw)

    # Zero the spatial zero-padding ring so conv2 sees true zero padding:
    #   * columns >= W (right pad / alignment columns) on every row,
    #   * the halo rows when the tile touches the top/bottom image border.
    col_ok = (lax.broadcasted_iota(jnp.int32, (1, wp2, 1), 1)
              < w_out).astype(jnp.float32)
    a1 = a1 * col_ok
    ah = ah * col_ok
    top = ah[0] * jnp.where(i > 0, 1.0, 0.0)
    bot = ah[1] * jnp.where(i < n_tiles - 1, 1.0, 0.0)

    # Assemble the haloed conv1 output with 8-row zero aprons on both ends
    # (all concat offsets are sublane-aligned); cast to bf16 exactly once.
    h1 = jnp.concatenate(
        [jnp.zeros((8, cw), jnp.float32),
         top,
         a1.reshape(n_out, cw),
         bot,
         jnp.zeros((8, cw), jnp.float32)], axis=0).astype(jnp.bfloat16)

    # ---- conv2 (3x3, BN2 folded): pack the dx = -1/0/+1 shifts along K -----
    hcat = jnp.concatenate(
        [h1[7:7 + big], h1[8:8 + big], h1[9:9 + big]], axis=-1)   # (big, 3*cw)

    acc = jnp.dot(hcat[0:n_out], w2_ref[0],
                  preferred_element_type=jnp.float32)
    acc = acc + jnp.dot(hcat[wp2:wp2 + n_out], w2_ref[1],
                        preferred_element_type=jnp.float32)
    acc = acc + jnp.dot(hcat[2 * wp2:2 * wp2 + n_out], w2_ref[2],
                        preferred_element_type=jnp.float32)
    a2 = jnp.maximum(acc + b2_ref[...], 0.0).astype(jnp.bfloat16)

    # ---- conv3 (1x1, BN3 folded) + bias + residual + ReLU -------------------
    y = jnp.dot(a2, w3_ref[...], preferred_element_type=jnp.float32)
    y = y + b3_ref[...] + xf.astype(jnp.float32)      # residual from the
    y = jnp.maximum(y, 0.0).reshape(th, wp2, cout)    # already-loaded input
    o_ref[...] = y[:, :w_out, :].reshape(1, th, w_out, cout)


# ------------------------------- wrapper -------------------------------------

def _round_up(x, m):
    return (x + m - 1) // m * m


def _pad_to(a, shape):
    return jnp.pad(a, [(0, t - s) for s, t in zip(a.shape, shape)])


def _fold_bn(gamma, beta, mean, var, eps=_EPS):
    scale = gamma / jnp.sqrt(var + eps)
    return scale, beta - mean * scale


def _pick_tile_h(H, W, target_rows=1024):
    best = 1
    for t in range(1, H + 1):
        if H % t == 0 and (t == 1 or t * W <= target_rows):
            best = t
    return best


def bottleneck_forward(x_nchw, params, *, tile_h=None, eps=_EPS):
    """Bottleneck forward (stride=1, no downsample). x: NCHW float32."""
    N, cin, H, W = x_nchw.shape
    w1_t, w2_t, w3_t = params["w1_t"], params["w2_t"], params["w3_t"]
    width = w1_t.shape[0]
    cout = w3_t.shape[0]
    assert cin == cout, "identity path requires inplanes == planes * expansion"

    s1, b1 = _fold_bn(*params["bn1"], eps)
    s2, b2 = _fold_bn(*params["bn2"], eps)
    s3, b3 = _fold_bn(*params["bn3"], eps)

    # Fold BN scales into the conv weights; matmul weights are (K, Cout).
    w1 = jnp.transpose(w1_t[:, :, 0, 0]) * s1[None, :]            # (cin, width)
    w2 = jnp.transpose(w2_t, (2, 3, 1, 0)) * s2                   # (3,3,width,width)
    w3 = jnp.transpose(w3_t[:, :, 0, 0]) * s3[None, :]            # (width, cout)

    cin_p = _round_up(cin, _LANE)
    cw_p = _round_up(width, _LANE)
    cout_p = _round_up(cout, _LANE)
    wp2 = _round_up(W + 1, 8)            # >= 1 zero column on the right

    w1p = _pad_to(w1, (cin_p, cw_p)).astype(jnp.bfloat16)
    # w2cat[dy] = [w2[dy,dx=0]; w2[dy,dx=1]; w2[dy,dx=2]] stacked along K.
    w2p = _pad_to(w2, (3, 3, cw_p, cw_p)).reshape(3, 3 * cw_p, cw_p)
    w2p = w2p.astype(jnp.bfloat16)
    w3p = _pad_to(w3, (cw_p, cout_p)).astype(jnp.bfloat16)
    b1p = _pad_to(b1[None, :], (1, cw_p)).astype(jnp.float32)
    b2p = _pad_to(b2[None, :], (1, cw_p)).astype(jnp.float32)
    b3p = _pad_to(b3[None, :], (1, cout_p)).astype(jnp.float32)

    if tile_h is None:
        tile_h = _pick_tile_h(H, W)
    assert H % tile_h == 0, "tile_h must divide H"
    n_tiles = H // tile_h

    # Single bf16 activation stream (NHWC, right-padded columns, lane-padded
    # channels).  The residual is re-derived from this stream in-kernel.
    x_nhwc = jnp.transpose(x_nchw, (0, 2, 3, 1))
    x_int = jnp.pad(
        x_nhwc, ((0, 0), (0, 0), (0, wp2 - W), (0, cin_p - cin))
    ).astype(jnp.bfloat16)                                        # (N,H,wp2,cin_p)

    # Per-tile halo rows (row above / below each row tile; zeros at borders).
    zrow = jnp.zeros((N, 1, wp2, cin_p), jnp.bfloat16)
    tops = jnp.concatenate(
        [zrow, x_int[:, tile_h - 1::tile_h][:, :n_tiles - 1]], axis=1)
    bots = jnp.concatenate(
        [x_int[:, tile_h::tile_h][:, :n_tiles - 1], zrow], axis=1)
    halo = jnp.stack([tops, bots], axis=2).reshape(N, n_tiles, 2 * wp2, cin_p)

    flops = 2 * N * H * wp2 * (cin_p * cw_p + 9 * cw_p * cw_p + cw_p * cout_p)
    bytes_accessed = (int(x_int.size) * 2 + int(halo.size) * 2
                      + int(w1p.size + w2p.size + w3p.size) * 2
                      + int(b1p.size + b2p.size + b3p.size) * 4
                      + N * H * W * cout_p * 4)

    out = pl.pallas_call(
        _bottleneck_kernel,
        out_shape=jax.ShapeDtypeStruct((N, H, W, cout_p), jnp.float32),
        grid=(N, n_tiles),
        in_specs=[
            pl.BlockSpec((1, tile_h, wp2, cin_p), lambda n, i: (n, i, 0, 0)),     # x (bf16)
            pl.BlockSpec((1, 1, 2 * wp2, cin_p), lambda n, i: (n, i, 0, 0)),      # halo rows
            pl.BlockSpec((cin_p, cw_p), lambda n, i: (0, 0)),                     # w1
            pl.BlockSpec((1, cw_p), lambda n, i: (0, 0)),                         # b1
            pl.BlockSpec((3, 3 * cw_p, cw_p), lambda n, i: (0, 0, 0)),            # w2 (K-packed)
            pl.BlockSpec((1, cw_p), lambda n, i: (0, 0)),                         # b2
            pl.BlockSpec((cw_p, cout_p), lambda n, i: (0, 0)),                    # w3
            pl.BlockSpec((1, cout_p), lambda n, i: (0, 0)),                       # b3
        ],
        out_specs=pl.BlockSpec((1, tile_h, W, cout_p), lambda n, i: (n, i, 0, 0)),
        compiler_params=pltpu.CompilerParams(
            dimension_semantics=("parallel", "parallel"),
            vmem_limit_bytes=48 * 1024 * 1024),
        cost_estimate=pl.CostEstimate(flops=int(flops), transcendentals=0,
                                      bytes_accessed=int(bytes_accessed)),
    )(x_int, halo, w1p, b1p, w2p, b2p, w3p, b3p)

    if cout_p != cout:
        out = out[..., :cout]
    # TODO(synk): a full network would keep activations NHWC/bf16 between
    # blocks; the NCHW<->NHWC transposes exist only to match the PyTorch API.
    return jnp.transpose(out, (0, 3, 1, 2))


# ----------------------------- pure-JAX reference ----------------------------

def reference_forward(x, p, eps=_EPS):
    def bn(y, g, b, m, v):
        g = g[None, :, None, None]
        b = b[None, :, None, None]
        m = m[None, :, None, None]
        v = v[None, :, None, None]
        return (y - m) / jnp.sqrt(v + eps) * g + b

    dn = ("NCHW", "OIHW", "NCHW")
    out = jax.lax.conv_general_dilated(x, p["w1_t"], (1, 1), "VALID",
                                       dimension_numbers=dn)
    out = jax.nn.relu(bn(out, *p["bn1"]))
    out = jax.lax.conv_general_dilated(out, p["w2_t"], (1, 1),
                                       ((1, 1), (1, 1)), dimension_numbers=dn)
    out = jax.nn.relu(bn(out, *p["bn2"]))
    out = jax.lax.conv_general_dilated(out, p["w3_t"], (1, 1), "VALID",
                                       dimension_numbers=dn)
    out = bn(out, *p["bn3"]) + x
    return jax.nn.relu(out)


# ---------------------------------- main --------------------------------------

def _init_params(key, inplanes, planes, base_width=64, groups=1):
    width = int(planes * (base_width / 64.0)) * groups
    cout = planes * 4  # expansion = 4
    ks = jax.random.split(key, 6)

    def bn_params(k, c):
        kg, kb, km, kv = jax.random.split(k, 4)
        gamma = 1.0 + 0.1 * jax.random.normal(kg, (c,), jnp.float32)
        beta = 0.1 * jax.random.normal(kb, (c,), jnp.float32)
        mean = 0.05 * jax.random.normal(km, (c,), jnp.float32)
        var = jnp.abs(1.0 + 0.1 * jax.random.normal(kv, (c,), jnp.float32))
        return (gamma, beta, mean, var)

    return {
        "w1_t": 0.1 * jax.random.normal(ks[0], (width, inplanes, 1, 1), jnp.float32),
        "w2_t": 0.1 * jax.random.normal(ks[1], (width, width, 3, 3), jnp.float32),
        "w3_t": 0.1 * jax.random.normal(ks[2], (cout, width, 1, 1), jnp.float32),
        "bn1": bn_params(ks[3], width),
        "bn2": bn_params(ks[4], width),
        "bn3": bn_params(ks[5], cout),
    }


if __name__ == "__main__":
    # TODO(synk): BatchNorm is implemented in inference mode (folded running
    # stats); PyTorch training-mode batch statistics are not reproduced.
    key = jax.random.PRNGKey(0)
    k_x, k_p = jax.random.split(key)

    # inplanes == planes*4 -> identity add (no downsample), as in the module.
    N, inplanes, planes, H, W = 2, 128, 32, 16, 16
    x = jax.random.normal(k_x, (N, inplanes, H, W), jnp.float32)
    params = _init_params(k_p, inplanes, planes)

    ref = jax.block_until_ready(reference_forward(x, params))

    # Auto-chosen tile (whole image per grid step for this small input).
    fwd = jax.jit(bottleneck_forward)
    out = jax.block_until_ready(fwd(x, params))

    # Smaller row tiles to also exercise the inter-tile halo path.
    fwd_t8 = jax.jit(functools.partial(bottleneck_forward, tile_h=8))
    out8 = jax.block_until_ready(fwd_t8(x, params))

    assert out.shape == ref.shape == (N, planes * 4, H, W)
    # bf16 MXU inputs (f32 accumulation, bf16 residual) vs a pure-f32 reference.
    err = float(jnp.max(jnp.abs(out - ref)))
    err8 = float(jnp.max(jnp.abs(out8 - ref)))
    assert jnp.allclose(out, ref, atol=5e-2, rtol=5e-2), err
    assert jnp.allclose(out8, ref, atol=5e-2, rtol=5e-2), err8

    print("KERNEL_OK")
</pallas_src>

<mosaic_0001>
module attributes {stable_mosaic.version = 11 : i64} {
  func.func @_bottleneck_kernel(%arg0: i32, %arg1: i32, %arg2: memref<1x16x24x128xbf16, #tpu.memory_space<vmem>>, %arg3: memref<1x1x48x128xbf16, #tpu.memory_space<vmem>>, %arg4: memref<128x128xbf16, #tpu.memory_space<vmem>>, %arg5: memref<1x128xf32, #tpu.memory_space<vmem>>, %arg6: memref<3x384x128xbf16, #tpu.memory_space<vmem>>, %arg7: memref<1x128xf32, #tpu.memory_space<vmem>>, %arg8: memref<128x128xbf16, #tpu.memory_space<vmem>>, %arg9: memref<1x128xf32, #tpu.memory_space<vmem>>, %arg10: memref<1x16x16x128xf32, #tpu.memory_space<vmem>>) attributes {dimension_semantics = [#tpu.dimension_semantics<parallel>, #tpu.dimension_semantics<parallel>], iteration_bounds = array<i64: 2, 1>, scalar_prefetch = 0 : i64, scratch_operands = 0 : i64, tpu.core_type = #tpu.core_type<tc>, window_params = [{transform_indices = @transform_0, window_bounds = array<i64: 1, 16, 24, 128>}, {transform_indices = @transform_1, window_bounds = array<i64: 1, 1, 48, 128>}, {pipeline_mode = #tpu.pipeline_mode<synchronous>, transform_indices = @transform_2, window_bounds = array<i64: 128, 128>}, {pipeline_mode = #tpu.pipeline_mode<synchronous>, transform_indices = @transform_3, window_bounds = array<i64: 1, 128>}, {pipeline_mode = #tpu.pipeline_mode<synchronous>, transform_indices = @transform_4, window_bounds = array<i64: 3, 384, 128>}, {pipeline_mode = #tpu.pipeline_mode<synchronous>, transform_indices = @transform_5, window_bounds = array<i64: 1, 128>}, {pipeline_mode = #tpu.pipeline_mode<synchronous>, transform_indices = @transform_6, window_bounds = array<i64: 128, 128>}, {pipeline_mode = #tpu.pipeline_mode<synchronous>, transform_indices = @transform_7, window_bounds = array<i64: 1, 128>}, {transform_indices = @transform_8, window_bounds = array<i64: 1, 16, 16, 128>}]} {
    %c0 = arith.constant 0 : index
    %c0_0 = arith.constant 0 : index
    %c0_1 = arith.constant 0 : index
    %c0_2 = arith.constant 0 : index
    %0 = vector.load %arg2[%c0, %c0_0, %c0_1, %c0_2] : memref<1x16x24x128xbf16, #tpu.memory_space<vmem>>, vector<1x16x24x128xbf16>
    %1 = vector.shape_cast %0 : vector<1x16x24x128xbf16> to vector<384x128xbf16>
    %c0_3 = arith.constant 0 : index
    %c0_4 = arith.constant 0 : index
    %2 = vector.load %arg4[%c0_3, %c0_4] : memref<128x128xbf16, #tpu.memory_space<vmem>>, vector<128x128xbf16>
    %cst = arith.constant dense<0.000000e+00> : vector<384x128xf32>
    %3 = tpu.matmul %1, %2, %cst {dimension_numbers = #tpu.dot_dimension_numbers<[1], [0], [0], [1], [0, 0, 1, 1], [], []>} : vector<384x128xbf16>, vector<128x128xbf16>, vector<384x128xf32> -> vector<384x128xf32>
    %c0_5 = arith.constant 0 : index
    %c0_6 = arith.constant 0 : index
    %4 = vector.load %arg5[%c0_5, %c0_6] : memref<1x128xf32, #tpu.memory_space<vmem>>, vector<1x128xf32>
    %5 = vector.broadcast %4 : vector<1x128xf32> to vector<384x128xf32>
    %6 = arith.addf %3, %5 : vector<384x128xf32>
    %cst_7 = arith.constant 0.000000e+00 : f32
    %7 = vector.broadcast %cst_7 : f32 to vector<384x128xf32>
    %8 = arith.maximumf %6, %7 : vector<384x128xf32>
    %9 = vector.shape_cast %8 : vector<384x128xf32> to vector<16x24x128xf32>
    %c0_8 = arith.constant 0 : index
    %c0_9 = arith.constant 0 : index
    %c0_10 = arith.constant 0 : index
    %c0_11 = arith.constant 0 : index
    %10 = vector.load %arg3[%c0_8, %c0_9, %c0_10, %c0_11] : memref<1x1x48x128xbf16, #tpu.memory_space<vmem>>, vector<1x1x48x128xbf16>
    %11 = vector.shape_cast %10 : vector<1x1x48x128xbf16> to vector<48x128xbf16>
    %c0_12 = arith.constant 0 : index
    %c0_13 = arith.constant 0 : index
    %12 = vector.load %arg4[%c0_12, %c0_13] : memref<128x128xbf16, #tpu.memory_space<vmem>>, vector<128x128xbf16>
    %cst_14 = arith.constant dense<0.000000e+00> : vector<48x128xf32>
    %13 = tpu.matmul %11, %12, %cst_14 {dimension_numbers = #tpu.dot_dimension_numbers<[1], [0], [0], [1], [0, 0, 1, 1], [], []>} : vector<48x128xbf16>, vector<128x128xbf16>, vector<48x128xf32> -> vector<48x128xf32>
    %c0_15 = arith.constant 0 : index
    %c0_16 = arith.constant 0 : index
    %14 = vector.load %arg5[%c0_15, %c0_16] : memref<1x128xf32, #tpu.memory_space<vmem>>, vector<1x128xf32>
    %15 = vector.broadcast %14 : vector<1x128xf32> to vector<48x128xf32>
    %16 = arith.addf %13, %15 : vector<48x128xf32>
    %cst_17 = arith.constant 0.000000e+00 : f32
    %17 = vector.broadcast %cst_17 : f32 to vector<48x128xf32>
    %18 = arith.maximumf %16, %17 : vector<48x128xf32>
    %19 = vector.shape_cast %18 : vector<48x128xf32> to vector<2x24x128xf32>
    %20 = tpu.iota {dimensions = array<i32: 1>} : vector<1x24x1xi32>
    %c16_i32 = arith.constant 16 : i32
    %21 = vector.broadcast %c16_i32 : i32 to vector<1x24x1xi32>
    %22 = arith.cmpi slt, %20, %21 : vector<1x24x1xi32>
    %23 = arith.extui %22 : vector<1x24x1xi1> to vector<1x24x1xi32>
    %24 = arith.sitofp %23 : vector<1x24x1xi32> to vector<1x24x1xf32>
    %25 = vector.broadcast %24 : vector<1x24x1xf32> to vector<16x24x128xf32>
    %26 = arith.mulf %9, %25 : vector<16x24x128xf32>
    %27 = vector.broadcast %24 : vector<1x24x1xf32> to vector<2x24x128xf32>
    %28 = arith.mulf %19, %27 : vector<2x24x128xf32>
    %29 = vector.extract_strided_slice %28 {offsets = [0, 0, 0], sizes = [1, 24, 128], strides = [1, 1, 1]} : vector<2x24x128xf32> to vector<1x24x128xf32>
    %30 = vector.shape_cast %29 : vector<1x24x128xf32> to vector<24x128xf32>
    %c0_i32 = arith.constant 0 : i32
    %31 = arith.cmpi sgt, %arg1, %c0_i32 : i32
    %cst_18 = arith.constant 1.000000e+00 : f32
    %cst_19 = arith.constant 0.000000e+00 : f32
    %32 = arith.select %31, %cst_18, %cst_19 : f32
    %33 = vector.broadcast %32 : f32 to vector<24x128xf32>
    %34 = arith.mulf %30, %33 : vector<24x128xf32>
    %35 = vector.extract_strided_slice %28 {offsets = [1, 0, 0], sizes = [1, 24, 128], strides = [1, 1, 1]} : vector<2x24x128xf32> to vector<1x24x128xf32>
    %36 = vector.shape_cast %35 : vector<1x24x128xf32> to vector<24x128xf32>
    %c0_i32_20 = arith.constant 0 : i32
    %37 = arith.cmpi slt, %arg1, %c0_i32_20 : i32
    %cst_21 = arith.constant 1.000000e+00 : f32
    %cst_22 = arith.constant 0.000000e+00 : f32
    %38 = arith.select %37, %cst_21, %cst_22 : f32
    %39 = vector.broadcast %38 : f32 to vector<24x128xf32>
    %40 = arith.mulf %36, %39 : vector<24x128xf32>
    %cst_23 = arith.constant 0.000000e+00 : f32
    %41 = vector.broadcast %cst_23 : f32 to vector<8x128xf32>
    %42 = vector.shape_cast %26 : vector<16x24x128xf32> to vector<384x128xf32>
    %cst_24 = arith.constant 0.000000e+00 : f32
    %43 = vector.broadcast %cst_24 : f32 to vector<8x128xf32>
    %44 = tpu.concatenate %41, %34, %42, %40, %43 in 0 : vector<8x128xf32>, vector<24x128xf32>, vector<384x128xf32>, vector<24x128xf32>, vector<8x128xf32> -> vector<448x128xf32>
    %45 = arith.truncf %44 : vector<448x128xf32> to vector<448x128xbf16>
    %46 = vector.extract_strided_slice %45 {offsets = [7, 0], sizes = [432, 128], strides = [1, 1]} : vector<448x128xbf16> to vector<432x128xbf16>
    %47 = vector.extract_strided_slice %45 {offsets = [8, 0], sizes = [432, 128], strides = [1, 1]} : vector<448x128xbf16> to vector<432x128xbf16>
    %48 = vector.extract_strided_slice %45 {offsets = [9, 0], sizes = [432, 128], strides = [1, 1]} : vector<448x128xbf16> to vector<432x128xbf16>
    %49 = tpu.concatenate %46, %47, %48 in 1 : vector<432x128xbf16>, vector<432x128xbf16>, vector<432x128xbf16> -> vector<432x384xbf16>
    %50 = vector.extract_strided_slice %49 {offsets = [0, 0], sizes = [384, 384], strides = [1, 1]} : vector<432x384xbf16> to vector<384x384xbf16>
    %c0_25 = arith.constant 0 : index
    %c0_26 = arith.constant 0 : index
    %c0_27 = arith.constant 0 : index
    %51 = vector.load %arg6[%c0_25, %c0_26, %c0_27] : memref<3x384x128xbf16, #tpu.memory_space<vmem>>, vector<1x384x128xbf16>
    %52 = vector.shape_cast %51 : vector<1x384x128xbf16> to vector<384x128xbf16>
    %cst_28 = arith.constant dense<0.000000e+00> : vector<384x128xf32>
    %53 = tpu.matmul %50, %52, %cst_28 {dimension_numbers = #tpu.dot_dimension_numbers<[1], [0], [0], [1], [0, 0, 1, 1], [], []>} : vector<384x384xbf16>, vector<384x128xbf16>, vector<384x128xf32> -> vector<384x128xf32>
    %54 = vector.extract_strided_slice %49 {offsets = [24, 0], sizes = [384, 384], strides = [1, 1]} : vector<432x384xbf16> to vector<384x384xbf16>
    %c1 = arith.constant 1 : index
    %c0_29 = arith.constant 0 : index
    %c0_30 = arith.constant 0 : index
    %55 = vector.load %arg6[%c1, %c0_29, %c0_30] : memref<3x384x128xbf16, #tpu.memory_space<vmem>>, vector<1x384x128xbf16>
    %56 = vector.shape_cast %55 : vector<1x384x128xbf16> to vector<384x128xbf16>
    %cst_31 = arith.constant dense<0.000000e+00> : vector<384x128xf32>
    %57 = tpu.matmul %54, %56, %cst_31 {dimension_numbers = #tpu.dot_dimension_numbers<[1], [0], [0], [1], [0, 0, 1, 1], [], []>} : vector<384x384xbf16>, vector<384x128xbf16>, vector<384x128xf32> -> vector<384x128xf32>
    %58 = arith.addf %53, %57 : vector<384x128xf32>
    %59 = vector.extract_strided_slice %49 {offsets = [48, 0], sizes = [384, 384], strides = [1, 1]} : vector<432x384xbf16> to vector<384x384xbf16>
    %c2 = arith.constant 2 : index
    %c0_32 = arith.constant 0 : index
    %c0_33 = arith.constant 0 : index
    %60 = vector.load %arg6[%c2, %c0_32, %c0_33] : memref<3x384x128xbf16, #tpu.memory_space<vmem>>, vector<1x384x128xbf16>
    %61 = vector.shape_cast %60 : vector<1x384x128xbf16> to vector<384x128xbf16>
    %cst_34 = arith.constant dense<0.000000e+00> : vector<384x128xf32>
    %62 = tpu.matmul %59, %61, %cst_34 {dimension_numbers = #tpu.dot_dimension_numbers<[1], [0], [0], [1], [0, 0, 1, 1], [], []>} : vector<384x384xbf16>, vector<384x128xbf16>, vector<384x128xf32> -> vector<384x128xf32>
    %63 = arith.addf %58, %62 : vector<384x128xf32>
    %c0_35 = arith.constant 0 : index
    %c0_36 = arith.constant 0 : index
    %64 = vector.load %arg7[%c0_35, %c0_36] : memref<1x128xf32, #tpu.memory_space<vmem>>, vector<1x128xf32>
    %65 = vector.broadcast %64 : vector<1x128xf32> to vector<384x128xf32>
    %66 = arith.addf %63, %65 : vector<384x128xf32>
    %cst_37 = arith.constant 0.000000e+00 : f32
    %67 = vector.broadcast %cst_37 : f32 to vector<384x128xf32>
    %68 = arith.maximumf %66, %67 : vector<384x128xf32>
    %69 = arith.truncf %68 : vector<384x128xf32> to vector<384x128xbf16>
    %c0_38 = arith.constant 0 : index
    %c0_39 = arith.constant 0 : index
    %70 = vector.load %arg8[%c0_38, %c0_39] : memref<128x128xbf16, #tpu.memory_space<vmem>>, vector<128x128xbf16>
    %cst_40 = arith.constant dense<0.000000e+00> : vector<384x128xf32>
    %71 = tpu.matmul %69, %70, %cst_40 {dimension_numbers = #tpu.dot_dimension_numbers<[1], [0], [0], [1], [0, 0, 1, 1], [], []>} : vector<384x128xbf16>, vector<128x128xbf16>, vector<384x128xf32> -> vector<384x128xf32>
    %c0_41 = arith.constant 0 : index
    %c0_42 = arith.constant 0 : index
    %72 = vector.load %arg9[%c0_41, %c0_42] : memref<1x128xf32, #tpu.memory_space<vmem>>, vector<1x128xf32>
    %73 = vector.broadcast %72 : vector<1x128xf32> to vector<384x128xf32>
    %74 = arith.addf %71, %73 : vector<384x128xf32>
    %75 = arith.extf %1 : vector<384x128xbf16> to vector<384x128xf32>
    %76 = arith.addf %74, %75 : vector<384x128xf32>
    %cst_43 = arith.constant 0.000000e+00 : f32
    %77 = vector.broadcast %cst_43 : f32 to vector<384x128xf32>
    %78 = arith.maximumf %76, %77 : vector<384x128xf32>
    %79 = vector.shape_cast %78 : vector<384x128xf32> to vector<16x24x128xf32>
    %80 = vector.extract_strided_slice %79 {offsets = [0, 0, 0], sizes = [16, 16, 128], strides = [1, 1, 1]} : vector<16x24x128xf32> to vector<16x16x128xf32>
    %81 = vector.shape_cast %80 : vector<16x16x128xf32> to vector<1x16x16x128xf32>
    %c0_44 = arith.constant 0 : index
    %c0_45 = arith.constant 0 : index
    %c0_46 = arith.constant 0 : index
    %c0_47 = arith.constant 0 : index
    %82 = vector.load %arg10[%c0_44, %c0_45, %c0_46, %c0_47] : memref<1x16x16x128xf32, #tpu.memory_space<vmem>>, vector<1x16x16x128xf32>
    tpu.vector_store %arg10[%c0_44, %c0_45, %c0_46, %c0_47], %81 {strides = array<i32>} : memref<1x16x16x128xf32, #tpu.memory_space<vmem>>, vector<1x16x16x128xf32>,
    return
  }
  func.func @transform_0(%arg0: i32, %arg1: i32) -> (i32, i32, i32, i32) {
    %c0_i32 = arith.constant 0 : i32
    %c0_i32_0 = arith.constant 0 : i32
    %c0_i32_1 = arith.constant 0 : i32
    return %arg0, %arg1, %c0_i32, %c0_i32_0 : i32, i32, i32, i32
  }
  func.func @transform_1(%arg0: i32, %arg1: i32) -> (i32, i32, i32, i32) {
    %c0_i32 = arith.constant 0 : i32
    %c0_i32_0 = arith.constant 0 : i32
    %c0_i32_1 = arith.constant 0 : i32
    return %arg0, %arg1, %c0_i32, %c0_i32_0 : i32, i32, i32, i32
  }
  func.func @transform_2(%arg0: i32, %arg1: i32) -> (i32, i32) {
    %c0_i32 = arith.constant 0 : i32
    %c0_i32_0 = arith.constant 0 : i32
    %c0_i32_1 = arith.constant 0 : i32
    return %c0_i32, %c0_i32_0 : i32, i32
  }
  func.func @transform_3(%arg0: i32, %arg1: i32) -> (i32, i32) {
    %c0_i32 = arith.constant 0 : i32
    %c0_i32_0 = arith.constant 0 : i32
    %c0_i32_1 = arith.constant 0 : i32
    return %c0_i32, %c0_i32_0 : i32, i32
  }
  func.func @transform_4(%arg0: i32, %arg1: i32) -> (i32, i32, i32) {
    %c0_i32 = arith.constant 0 : i32
    %c0_i32_0 = arith.constant 0 : i32
    %c0_i32_1 = arith.constant 0 : i32
    %c0_i32_2 = arith.constant 0 : i32
    return %c0_i32, %c0_i32_0, %c0_i32_1 : i32, i32, i32
  }
  func.func @transform_5(%arg0: i32, %arg1: i32) -> (i32, i32) {
    %c0_i32 = arith.constant 0 : i32
    %c0_i32_0 = arith.constant 0 : i32
    %c0_i32_1 = arith.constant 0 : i32
    return %c0_i32, %c0_i32_0 : i32, i32
  }
  func.func @transform_6(%arg0: i32, %arg1: i32) -> (i32, i32) {
    %c0_i32 = arith.constant 0 : i32
    %c0_i32_0 = arith.constant 0 : i32
    %c0_i32_1 = arith.constant 0 : i32
    return %c0_i32, %c0_i32_0 : i32, i32
  }
  func.func @transform_7(%arg0: i32, %arg1: i32) -> (i32, i32) {
    %c0_i32 = arith.constant 0 : i32
    %c0_i32_0 = arith.constant 0 : i32
    %c0_i32_1 = arith.constant 0 : i32
    return %c0_i32, %c0_i32_0 : i32, i32
  }
  func.func @transform_8(%arg0: i32, %arg1: i32) -> (i32, i32, i32, i32) {
    %c0_i32 = arith.constant 0 : i32
    %c0_i32_0 = arith.constant 0 : i32
    %c0_i32_1 = arith.constant 0 : i32
    return %arg0, %arg1, %c0_i32, %c0_i32_0 : i32, i32, i32, i32
  }
}

</mosaic_0001>

<bundles_post_ra>
// kernel: bottleneck_forward.1
= control target key start
LH: loop header
LB: loop body
LE: loop exit
PB: predicated region body
PF: predicated region fallthrough
CT: control target
= control target key end

     0   :  { %13 = vsyncpa [#allocation3], 0  ;;  %s9237_s0 = inlined_call_operand.vmem [shape: bf16[2,16,24,128], index: 0, kind: input, shape index: {}]   ;;  %s9238_s1 = inlined_call_operand.vmem [shape: bf16[2,1,48,128], index: 1, kind: input, shape index: {}]   ;;  %s9239_s2 = inlined_call_operand.vmem [shape: bf16[128,128], index: 2, kind: input, shape index: {}]   ;;  %s9240_s3 = inlined_call_operand.vmem [shape: f32[1,128], index: 3, kind: input, shape index: {}]   ;;  %s9241_s4 = inlined_call_operand.vmem [shape: bf16[3,384,128], index: 4, kind: input, shape index: {}]   ;;  %s9242_s5 = inlined_call_operand.vmem [shape: f32[1,128], index: 5, kind: input, shape index: {}]   ;;  %s9243_s6 = inlined_call_operand.vmem [shape: bf16[128,128], index: 6, kind: input, shape index: {}]   ;;  %s9244_s7 = inlined_call_operand.vmem [shape: f32[1,128], index: 7, kind: input, shape index: {}]   ;;  %s9245_s8 = inlined_call_operand.hbm [shape: f32[2,16,16,128], index: 8, kind: output, shape index: {}]  }
   0x1   :  { %15 = vsyncpa [#allocation3 + $0x1], 0  ;;  %s6155_s27 = smov 0   ;;  %s6157_s28 = smov 0  }
   0x2   :  { %s6159_s29 = smov 0   ;;  %s6161_s30 = smov 0  }
   0x3   :  { %s6163_s9 = smov 0   ;;  %s6165_s10 = smov 0  }
   0x4 LB: > { %s5029_s11 = sadd.s32 4294967295, %s6102_s10   ;;  %s5030_s12 = sadd.s32 4294967294, %s6102_s10   ;;  %s6102_s10 = sphi %s6165_s10, %s21_s10   ;;  %s6098_s9 = sphi %s6163_s9, %s9951_s9   ;;  %s6094_s30 = sphi %s6161_s30, %s9950_s30   ;;  %s6090_s29 = sphi %s6159_s29, %s9949_s29   ;;  %s6086_s28 = sphi %s6157_s28, %s9948_s28   ;;  %s6082_s27 = sphi %s6155_s27, %s9947_s27  }
   0x5   : > { %s33_s13 = sadd.s32 1, %s6098_s9  ;;  %s224_s14 = sadd.s32 1, %s6090_s29 }
   0x6   : > { %p35_p0 = scmp.ge.s32.totalorder %s33_s13, 2  ;;  %p234_p1 = scmp.ne.s32.totalorder %s6090_s29, %s6086_s28 }
   0x7   : > { %p235_p2 = scmp.eq.s32.totalorder %s5029_s11, 1  ;;  %p240_p3 = scmp.ne.s32.totalorder %s6086_s28, %s6082_s27 }
   0x8   : > { %s9953_s13 = smov (%p35_p0, %s33_s13), 0  ;;  %p241_p5 = scmp.eq.s32.totalorder %s5030_s12, 1 }
   0x9   : > { %p6195_p4 = por %p235_p2, %p234_p1  ;;  %s219_s16 = ssub.s32 %s6098_s9, %s9953_s13 }
   0xa   : > { %p5033_p6 = scmp.ge.s32.totalorder %s6102_s10, 1  ;;  %p222_p7 = scmp.eq.s32.totalorder %s219_s16, 0 }
   0xb   : > { %p6202_p8 = por %p241_p5, %p240_p3  ;;  %p303_p9 = scmp.lt.s32.totalorder %s6102_s10, 3 }
   0xc   : > { %s6208_s18 = scalar_select %p222_p7, %s6090_s29, %s224_s14  }
   0xd   : > { %p304_p10 = pnand %p5033_p6, %p303_p9 }
   0xf   : > { %307 = sbr.rel (%p304_p10) target bundleno = 1224 (0x4c8), region = 52 }
  0x14   : > { %v5854_v0 = vld [vmem:[%s9239_s2 + $0x38] sm:$0xff]   ;;  %v9250_v1 = vmov 0.0   ;;  %v5855_v2 = vld [vmem:[%s9239_s2 + $0x30] sm:$0xff]   ;;  %p352_p11 = scmp.lt.s32.totalorder %s6094_s30, 1  ;;  %v5856_v3 = vld [vmem:[%s9239_s2 + $0x28] sm:$0xff]   ;;  %vm6105_vm0 = vmmov 0  }
  0x15   : > { %5492 = vmatprep.subr.bf16.mxu1 %v9250_v1  ;;  %5428 = vmatprep.subr.bf16.mxu0 %v5854_v0  ;;  %v5857_v4 = vld [vmem:[%s9239_s2 + $0x20] sm:$0xff]   ;;  %v5858_v6 = vld [vmem:[%s9239_s2 + $0x18] sm:$0xff]   ;;  %v5859_v7 = vld [vmem:[%s9239_s2 + $0x10] sm:$0xff]   ;;  %v9262_v14 = vmov 0   ;;  %vm1355_vm1 = vcmask 1046528   ;;  %s348_s12 = sand.u32 1, %s6086_s28  }
  0x16   : > { %5493 = vmatpush3.bf16.msra.mxu1 %v5854_v0  ;;  %5429 = vmatpush3.bf16.msra.mxu0 %v5854_v0  ;;  %s353_s25 = scalar_select %p352_p11, %s6094_s30, 1  ;;  %v5860_v8 = vld [vmem:[%s9239_s2 + $0x8] sm:$0xff]   ;;  %v5861_v9 = vld [vmem:[%s9239_s2] sm:$0xff]   ;;  %v5889_v13 = vld [vmem:[%s9241_s4 + $0xf8] sm:$0xff]   ;;  %vm1508_vm2 = vsmask.f32 256 }
  0x17   : > { %5494 = vmatprep.subr.bf16.mxu1 %v9250_v1  ;;  %5430 = vmatprep.subr.bf16.mxu0 %v5855_v2  ;;  %v5890_v16 = vld [vmem:[%s9241_s4 + $0xf0] sm:$0xff]   ;;  %v5891_v19 = vld [vmem:[%s9241_s4 + $0xe8] sm:$0xff]   ;;  %v5892_v21 = vld [vmem:[%s9241_s4 + $0xe0] sm:$0xff]   ;;  %vm1103_vm3 = vsmask.f32 7424  ;;  %s5034_s19 = sshll.u32 %s348_s12, 8 }
  0x18   : > { %5508 = vmatprep.mubr.msk.bf16.mxu1 %vm6105_vm0, %v9250_v1  ;;  %s5792_s26 = smul.u32 192, %s353_s25  ;;  %v5893_v24 = vld [vmem:[%s9241_s4 + $0xd8] sm:$0xff]   ;;  %v5894_v26 = vld [vmem:[%s9241_s4 + $0xd0] sm:$0xff]   ;;  %v5895_v28 = vld [vmem:[%s9241_s4 + $0xc8] sm:$0xff]   ;;  %vm2640_vm4 = vsmask.f32 4352 }
  0x19   : > { %s5793_s11 = smul.u32 24, %s353_s25  ;;  %v5896_v30 = vld [vmem:[%s9241_s4 + $0xc0] sm:$0xff]   ;;  %v5897_v40 = vld [vmem:[%s9241_s4 + $0x138] sm:$0xff]   ;;  %v5899_v44 = vld [vmem:[%s9241_s4 + $0x130] sm:$0xff]   ;;  %s9096_s21 = scalar_lea.vmem [#allocation2], %s5034_s19 }
  0x1a   : > { %5495 = vmatpush3.bf16.msra.mxu1 %v5855_v2  ;;  %5431 = vmatpush3.bf16.msra.mxu0 %v5855_v2  ;;  %s6232_s20 = scalar_lea.vmem %s9237_s0, %s5792_s26  ;;  %v5898_v41 = vld [vmem:[%s9241_s4 + $0x178] sm:$0xff]   ;;  %v5900_v45 = vld [vmem:[%s9241_s4 + $0x170] sm:$0xff]   ;;  %v5901_v46 = vld [vmem:[%s9241_s4 + $0x128] sm:$0xff]   ;;  %s5256_s22 = sshll.u32 %s6094_s30, 12 }
  0x1b   : > { %5496 = vmatprep.subr.bf16.mxu1 %v9250_v1  ;;  %5432 = vmatprep.subr.bf16.mxu0 %v5856_v3  ;;  %v373_v5 = vld [vmem:[%s6232_s20] sm:$0xff]   ;;  %s6238_s23 = scalar_lea.vmem %s9238_s1, %s5793_s11  ;;  %v375_v10 = vld [vmem:[%s6232_s20 + $0x8] sm:$0xff]   ;;  %v377_v11 = vld [vmem:[%s6232_s20 + $0x10] sm:$0xff]   ;;  %s9185_s26 = scalar_lea.hbm %s9245_s8, %s5256_s22 }
  0x1c   : > { %5444 = vmatprep.mubr.bf16.mxu0 %v373_v5  ;;  %v5863_v12 = vld [vmem:[%s6238_s23] sm:$0xff]   ;;  %v379_v15 = vld [vmem:[%s6232_s20 + $0x18] sm:$0xff]   ;;  %v5866_v18 = vld [vmem:[%s6238_s23 + $0x8] sm:$0xff]   ;;  %s6107_s30 = smov [#allocation2]  }
  0x1d   : > { %v381_v17 = vld [vmem:[%s6232_s20 + $0x20] sm:$0xff]   ;;  %v383_v20 = vld [vmem:[%s6232_s20 + $0x28] sm:$0xff]   ;;  %v385_v22 = vld [vmem:[%s6232_s20 + $0x30] sm:$0xff]   ;;  %s6030_s14 = sshll.u32 %s6107_s30, 4  ;;  %s6031_s14 = int_to_ptr.vmem [resolvable:$false] %s6030_s14 }
  0x1e   : > { %5497 = vmatpush3.bf16.msra.mxu1 %v5856_v3  ;;  %5433 = vmatpush3.bf16.msra.mxu0 %v5856_v3  ;;  %v5869_v23 = vld [vmem:[%s6238_s23 + $0x10] sm:$0xff]   ;;  %v387_v25 = vld [vmem:[%s6232_s20 + $0x38] sm:$0xff]   ;;  %v389_v27 = vld [vmem:[%s6232_s20 + $0x40] sm:$0xff]   ;;  %s4926_s23 = sshll.u32 %s9096_s21, 4  ;;  %s6032_s16 = scalar_lea.vmem %s6031_s14, 8192  ;;  %s9187_s23 = int_to_ptr.vmem [resolvable:$true] %s4926_s23 }
  0x1f   : > { %5498 = vmatprep.subr.bf16.mxu1 %v9250_v1  ;;  %5434 = vmatprep.subr.bf16.mxu0 %v5857_v4  ;;  %v391_v29 = vld [vmem:[%s6232_s20 + $0x48] sm:$0xff]   ;;  %v393_v31 = vld [vmem:[%s6232_s20 + $0x50] sm:$0xff]   ;;  %v395_v32 = vld [vmem:[%s6232_s20 + $0x58] sm:$0xff]   ;;  %s6026_s11 = scalar_lea.vmem %s9187_s23, 4096  ;;  %p6033_p1 = scmp.lt.s32.totalorder %s9187_s23, %s6031_s14 }
  0x20   : > { %v397_v33 = vld [vmem:[%s6232_s20 + $0x60] sm:$0xff]   ;;  %v399_v34 = vld [vmem:[%s6232_s20 + $0x68] sm:$0xff]   ;;  %v401_v35 = vld [vmem:[%s6232_s20 + $0x70] sm:$0xff]   ;;  %p6027_p12 = scmp.ne.s32.totalorder %s9187_s23, %s6026_s11  ;;  %p6034_p2 = scmp.lt.s32.totalorder %s6032_s16, %s6026_s11 }
  0x21   : > { %v403_v36 = vld [vmem:[%s6232_s20 + $0x78] sm:$0xff]   ;;  %v405_v37 = vld [vmem:[%s6232_s20 + $0x80] sm:$0xff]   ;;  %v407_v38 = vld [vmem:[%s6232_s20 + $0x88] sm:$0xff]  }
  0x22   : > { %5499 = vmatpush3.bf16.msra.mxu1 %v5857_v4  ;;  %5435 = vmatpush3.bf16.msra.mxu0 %v5857_v4  ;;  %v409_v39 = vld [vmem:[%s6232_s20 + $0x90] sm:$0xff]   ;;  %v411_v42 = vld [vmem:[%s6232_s20 + $0x98] sm:$0xff]   ;;  %v413_v43 = vld [vmem:[%s6232_s20 + $0xa0] sm:$0xff]   ;;  %p6028_p13 = pnand %p6027_p12, %p6195_p4  ;;  %p6035_p3 = por %p6034_p2, %p6033_p1 }
  0x23   : > { %5500 = vmatprep.subr.bf16.mxu1 %v9250_v1  ;;  %5436 = vmatprep.subr.bf16.mxu0 %v5858_v6  ;;  %v415_v47 = vld [vmem:[%s6232_s20 + $0xa8] sm:$0xff]   ;;  %v417_v49 = vld [vmem:[%s6232_s20 + $0xb0] sm:$0xff]   ;;  %v5903_v50 = vld [vmem:[%s9241_s4 + $0x120] sm:$0xff]  }
  0x24   : > { %v5902_v48 = vld [vmem:[%s9241_s4 + $0x168] sm:$0xff]   ;;  %v5904_v51 = vld [vmem:[%s9241_s4 + $0x160] sm:$0xff]   ;;  %v5905_v52 = vld [vmem:[%s9241_s4 + $0x118] sm:$0xff]   ;;  %p6029_p0 = pneg %p6028_p13 }
  0x25   : > { %v419_v53 = vld [vmem:[%s6232_s20 + $0xb8] sm:$0xff]   ;;  %v5907_v55 = vld [vmem:[%s9241_s4 + $0x110] sm:$0xff]   ;;  %v5909_v57 = vld [vmem:[%s9241_s4 + $0x108] sm:$0xff]  }
  0x26   : > { %5501 = vmatpush3.bf16.msra.mxu1 %v5858_v6  ;;  %5437 = vmatpush3.bf16.msra.mxu0 %v5858_v6  ;;  %v5906_v54 = vld [vmem:[%s9241_s4 + $0x158] sm:$0xff]   ;;  %v5908_v56 = vld [vmem:[%s9241_s4 + $0x150] sm:$0xff]   ;;  %v5910_v58 = vld [vmem:[%s9241_s4 + $0x148] sm:$0xff]   ;;  %p6036_p5 = pnand %p6035_p3, %p6029_p0 }
  0x27   : > { %5502 = vmatprep.subr.bf16.mxu1 %v9250_v1  ;;  %5438 = vmatprep.subr.bf16.mxu0 %v5859_v7  ;;  %v5911_v59 = vld [vmem:[%s9241_s4 + $0x100] sm:$0xff]   ;;  %v6379_v61 = vld [vmem:[%s9241_s4 + $0xb8] sm:$0xff]  }
  0x28   : > { %v5912_v60 = vld [vmem:[%s9241_s4 + $0x140] sm:$0xff]  }
  0x29   : > { %v6385_v0 = vld [vmem:[%s9240_s3] ss:$0 sm:$0xff] }
  0x2a   : > { %5503 = vmatpush3.bf16.msra.mxu1 %v5859_v7  ;;  %5439 = vmatpush3.bf16.msra.mxu0 %v5859_v7 }
  0x2b   : > { %5504 = vmatprep.subr.bf16.mxu1 %v9250_v1  ;;  %5440 = vmatprep.subr.bf16.mxu0 %v5860_v8 }
  0x2e   : > { %5505 = vmatpush3.bf16.msra.mxu1 %v5860_v8  ;;  %5441 = vmatpush3.bf16.msra.mxu0 %v5860_v8 }
  0x2f   : > { %5506 = vmatprep.subr.bf16.mxu1 %v9250_v1  ;;  %5442 = vmatprep.subr.bf16.mxu0 %v5861_v9 }
  0x32   : > { %5507 = vmatpush3.bf16.msra.mxu1 %v5861_v9  ;;  %5443 = vmatpush3.bf16.msra.mxu0 %v5861_v9 }
  0x33   : > { %2190 = vmatprep.subr.bf16.mxu1 %v9262_v14  ;;  %5520 = vmatprep.subr.bf16.mxu0 %v5898_v41 }
  0x35   : > { %5509 = vmatmul.mubr.bf16.vlgmr.msra.gmra.mxu1 %v5863_v12  ;;  %5445 = vmatmul.mubr.bf16.vlgmr.msra.gmra.mxu0 %v375_v10 }
  0x36   : > { %5512 = vmatprep.mubr.msk.bf16.mxu1 %vm6105_vm0, %v9250_v1  ;;  %5448 = vmatprep.mubr.bf16.mxu0 %v377_v11 }
  0x37   : > { %2191 = vmatpush1.bf16.msra.mxu1 %v5889_v13  ;;  %5521 = vmatpush3.bf16.msra.mxu0 %v5898_v41 }
  0x38   : > { %2192 = vmatprep.subr.bf16.mxu1 %v9262_v14  ;;  %5522 = vmatprep.subr.bf16.mxu0 %v5900_v45 }
  0x3b   : > { %2193 = vmatpush1.bf16.msra.mxu1 %v5890_v16  ;;  %5523 = vmatpush3.bf16.msra.mxu0 %v5900_v45 }
  0x3c   : > { %2194 = vmatprep.subr.bf16.mxu1 %v9262_v14  ;;  %5524 = vmatprep.subr.bf16.mxu0 %v5902_v48 }
  0x3d   : > { %5513 = vmatmul.mubr.bf16.gmra.mxu1 %v5866_v18  ;;  %5449 = vmatmul.mubr.bf16.gmra.mxu0 %v379_v15 }
  0x3e   : > { %5516 = vmatprep.mubr.msk.bf16.mxu1 %vm6105_vm0, %v9250_v1  ;;  %5452 = vmatprep.mubr.bf16.mxu0 %v381_v17 }
  0x3f   : > { %2195 = vmatpush1.bf16.msra.mxu1 %v5891_v19  ;;  %5525 = vmatpush3.bf16.msra.mxu0 %v5902_v48 }
  0x40   : > { %2196 = vmatprep.subr.bf16.mxu1 %v9262_v14  ;;  %5526 = vmatprep.subr.bf16.mxu0 %v5904_v51 }
  0x43   : > { %2197 = vmatpush1.bf16.msra.mxu1 %v5892_v21  ;;  %5527 = vmatpush3.bf16.msra.mxu0 %v5904_v51 }
  0x44   : > { %2198 = vmatprep.subr.bf16.mxu1 %v9262_v14  ;;  %5528 = vmatprep.subr.bf16.mxu0 %v5906_v54 }
  0x45   : > { %5517 = vmatmul.mubr.bf16.gmra.mxu1 %v5869_v23  ;;  %5453 = vmatmul.mubr.bf16.gmra.mxu0 %v383_v20 }
  0x46   : > { %5456 = vmatprep.mubr.bf16.mxu0 %v385_v22 }
  0x47   : > { %2199 = vmatpush1.bf16.msra.mxu1 %v5893_v24  ;;  %5529 = vmatpush3.bf16.msra.mxu0 %v5906_v54 }
  0x48   : > { %2200 = vmatprep.subr.bf16.mxu1 %v9262_v14  ;;  %5530 = vmatprep.subr.bf16.mxu0 %v5908_v56 }
  0x4b   : > { %2201 = vmatpush1.bf16.msra.mxu1 %v5894_v26  ;;  %5531 = vmatpush3.bf16.msra.mxu0 %v5908_v56 }
  0x4c   : > { %2202 = vmatprep.subr.bf16.mxu1 %v9262_v14  ;;  %5532 = vmatprep.subr.bf16.mxu0 %v5910_v58 }
  0x4d   : > { %5457 = vmatmul.mubr.bf16.gmra.mxu0 %v387_v25 }
  0x4e   : > { %5460 = vmatprep.mubr.bf16.mxu0 %v389_v27 }
  0x4f   : > { %2203 = vmatpush1.bf16.msra.mxu1 %v5895_v28  ;;  %5533 = vmatpush3.bf16.msra.mxu0 %v5910_v58 }
  0x50   : > { %2204 = vmatprep.subr.bf16.mxu1 %v9262_v14  ;;  %5534 = vmatprep.subr.bf16.mxu0 %v5912_v60 }
  0x53   : > { %2205 = vmatpush1.bf16.msra.mxu1 %v5896_v30  ;;  %5535 = vmatpush3.bf16.msra.mxu0 %v5912_v60 }
  0x54   : > { %2206 = vmatprep.subr.bf16.mxu1 %v9262_v14  ;;  %3168 = vmatprep.subr.bf16.mxu0 %v9262_v14 }
  0x55   : > { %5461 = vmatmul.mubr.bf16.gmra.mxu0 %v391_v29 }
  0x56   : > { %5464 = vmatprep.mubr.bf16.mxu0 %v393_v31 }
  0x57   : > { %2207 = vmatpush2.bf16.msra.mxu1 %v5897_v40 }
  0x58   : > { %2208 = vmatprep.subr.bf16.mxu1 %v9262_v14 }
  0x5b   : > { %2209 = vmatpush2.bf16.msra.mxu1 %v5899_v44 }
  0x5c   : > { %2210 = vmatprep.subr.bf16.mxu1 %v9262_v14 }
  0x5d   : > { %5465 = vmatmul.mubr.bf16.gmra.mxu0 %v395_v32 }
  0x5e   : > { %5468 = vmatprep.mubr.bf16.mxu0 %v397_v33 }
  0x5f   : > { %2211 = vmatpush2.bf16.msra.mxu1 %v5901_v46 }
  0x60   : > { %2212 = vmatprep.subr.bf16.mxu1 %v9262_v14 }
  0x63   : > { %2213 = vmatpush2.bf16.msra.mxu1 %v5903_v50 }
  0x64   : > { %2214 = vmatprep.subr.bf16.mxu1 %v9262_v14 }
  0x65   : > { %5469 = vmatmul.mubr.bf16.gmra.mxu0 %v399_v34 }
  0x66   : > { %5472 = vmatprep.mubr.bf16.mxu0 %v401_v35 }
  0x67   : > { %2215 = vmatpush2.bf16.msra.mxu1 %v5905_v52 }
  0x68   : > { %2216 = vmatprep.subr.bf16.mxu1 %v9262_v14 }
  0x6b   : > { %2217 = vmatpush2.bf16.msra.mxu1 %v5907_v55 }
  0x6c   : > { %2218 = vmatprep.subr.bf16.mxu1 %v9262_v14 }
  0x6d   : > { %5473 = vmatmul.mubr.bf16.gmra.mxu0 %v403_v36 }
  0x6e   : > { %5476 = vmatprep.mubr.bf16.mxu0 %v405_v37 }
  0x6f   : > { %2219 = vmatpush2.bf16.msra.mxu1 %v5909_v57 }
  0x70   : > { %2220 = vmatprep.subr.bf16.mxu1 %v9262_v14 }
  0x73   : > { %2221 = vmatpush2.bf16.msra.mxu1 %v5911_v59 }
  0x74   : > { %5584 = vmatprep.subr.bf16.mxu1 %v6379_v61 }
  0x75   : > { %5477 = vmatmul.mubr.bf16.gmra.mxu0 %v407_v38 }
  0x76   : > { %5480 = vmatprep.mubr.bf16.mxu0 %v409_v39 }
  0x7d   : > { %5481 = vmatmul.mubr.bf16.gmra.mxu0 %v411_v42 }
  0x7e   : > { %5484 = vmatprep.mubr.bf16.mxu0 %v413_v43 }
  0x85   : > { %5485 = vmatmul.mubr.bf16.gmra.mxu0 %v415_v47 }
  0x86   : > { %5488 = vmatprep.mubr.bf16.mxu0 %v417_v49 }
  0x8d   : > { %5489 = vmatmul.mubr.bf16.gmra.mxu0 %v419_v53 }
  0xf5   : > { %v967_v62 = vpop.f32.mrf.mxu1  ;;  %v5446_v63 = vpop.f32.mrf.mxu0 }
  0xf6   : > { %v679_v3 = vadd.f32 %v5446_v63, %v6385_v0  ;;  %v968_v24 = vadd.f32 %v6385_v0, %v967_v62 }
  0xf7   : > { %v5510_v2 = vpop.f32.mrf.mxu1  ;;  %v670_v4 = vpop.f32.mrf.mxu0 }
  0xf8   : > { %v863_v8 = vmax.f32 %v679_v3, 0.0  ;;  %v671_v9 = vadd.f32 %v6385_v0, %v670_v4  ;;  %v990_v35 = vmax.f32 %v968_v24, 0.0 }
  0xf9   : > { %v970_v5 = vpop.f32.mrf.mxu1  ;;  %v5447_v6 = vpop.f32.mrf.mxu0 }
  0xfa   : > { %v682_v10 = vadd.f32 %v5447_v6, %v6385_v0  ;;  %v971_v15 = vadd.f32 %v6385_v0, %v970_v5  ;;  %v1011_v20 = vmul.f32 0.0, %v863_v8  ;;  %v861_v21 = vmax.f32 %v671_v9, 0.0 }
  0xfb   : > { %v5511_v7 = vpop.f32.mrf.mxu1  ;;  %v673_v11 = vpop.f32.mrf.mxu0  ;;  %v1066_v49 = vmul.f32 0.0, %v990_v35 }
  0xfc   : > { %v674_v12 = vadd.f32 %v6385_v0, %v673_v11  ;;  %v864_v22 = vmax.f32 %v682_v10, 0.0  ;;  %v991_v26 = vmax.f32 %v971_v15, 0.0 }
  0xfd   : > { %v975_v13 = vpop.f32.mrf.mxu1  ;;  %v5450_v16 = vpop.f32.mrf.mxu0  ;;  %v6415_v62 = vpack.c.bf16 %v1066_v49, %v9250_v1 }
  0xfe   : > { %v862_v17 = vmax.f32 %v674_v12, 0.0  ;;  %v976_v18 = vadd.f32 %v6385_v0, %v975_v13  ;;  %v6394_v31 = vpack.c.bf16 %v864_v22, %v1011_v20  ;;  %v1067_v37 = vmul.f32 0.0, %v991_v26 }
  0xff   : > { %v5514_v19 = vpop.f32.mrf.mxu1  ;;  %v686_v23 = vpop.f32.mrf.mxu0  ;;  %9482 = vst [vmem:[#allocation8_spill] sm:$0xff] %v6415_v62  ;;  %v695_v2 = vadd.f32 %v5450_v16, %v6385_v0  ;;  %v1107_v12 = vshll.u32 %v6415_v62, 16  ;;  %v1105_v26 = vshrl.u32 %v6415_v62, 16 }
 0x100   : > { %v1077_v27 = vpack.c.bf16 %v862_v17, %v861_v21  ;;  %v992_v28 = vmax.f32 %v976_v18, 0.0  ;;  %v1361_v44 = vrot.slane %v6394_v31, 1  ;;  %v687_v9 = vadd.f32 %v6385_v0, %v686_v23 }
 0x101   : > { %v978_v25 = vpop.f32.mrf.mxu1  ;;  %v5451_v29 = vpop.f32.mrf.mxu0  ;;  %v867_v15 = vmax.f32 %v695_v2, 0.0  ;;  %v6449_v22 = vshll.u32 %v6394_v31, 16  ;;  %v6481_v49 = vrot.slane %v1107_v12, 4 }
 0x102   : > { %v1059_v32 = vmul.f32 0.0, %v992_v28  ;;  %v979_v33 = vadd.f32 %v6385_v0, %v978_v25  ;;  %v1359_v38 = vrot.slane %v1077_v27, 1  ;;  %v6417_v63 = vshll.u32 %v1077_v27, 16 }
 0x103   : > { %v5515_v30 = vpop.f32.mrf.mxu1  ;;  %v689_v34 = vpop.f32.mrf.mxu0  ;;  %v698_v3 = vadd.f32 %v5451_v29, %v6385_v0  ;;  %9485 = vst [vmem:[#allocation11_spill] sm:$0xff] %v6449_v22  ;;  %v6451_v23 = vshrl.u32 %v1077_v27, 16  ;;  %v865_v29 = vmax.f32 %v687_v9, 0.0 }
 0x104   : > { %v1068_v39 = vmul.f32 0.0, %v1059_v32  ;;  %v993_v42 = vmax.f32 %v979_v33, 0.0  ;;  %v6406_v51 = vsel %vm1355_vm1, %v1359_v38, %v1361_v44  ;;  %v690_v53 = vadd.f32 %v6385_v0, %v689_v34  ;;  %9483 = vst [vmem:[#allocation9_spill] sm:$0xff] %v6417_v63 }
 0x105   : > { %v983_v36 = vpop.f32.mrf.mxu1  ;;  %v5454_v41 = vpop.f32.mrf.mxu0  ;;  %9481 = vst [vmem:[#allocation7_spill] sm:$0xff] %v6406_v51  ;;  %v9246_v60 = vshrl.u32 %v6406_v51, 16  ;;  %v1122_v13 = vrot.slane %v6417_v63, 1  ;;  %v868_v16 = vmax.f32 %v698_v3, 0.0  ;;  %v9247_v21 = vshll.u32 %v6406_v51, 16  ;;  %9486 = vst [vmem:[#allocation12_spill] sm:$0xff] %v6451_v23 }
 0x106   : > { %v984_v40 = vadd.f32 %v6385_v0, %v983_v36  ;;  %v6399_v45 = vpack.c.bf16 %v1068_v39, %v1067_v37  ;;  %v1072_v52 = vmul.f32 0.0, %v993_v42  ;;  %v866_v5 = vmax.f32 %v690_v53, 0.0 }
 0x107   : > { %v5518_v43 = vpop.f32.mrf.mxu1  ;;  %v702_v47 = vpop.f32.mrf.mxu0  ;;  %v6436_v11 = vrot.slane %v9246_v60, 7  ;;  %v1126_v32 = vor.u32 %v6451_v23, %v1122_v13  ;;  %v1109_v33 = vrot.slane %v1107_v12, 1  ;;  %v6465_v34 = vpack.c.bf16 %v868_v16, %v867_v15 }
 0x108   : > { %9479 = vst [vmem:[#allocation5_spill] sm:$0xff] %v6399_v45  ;;  %v994_v46 = vmax.f32 %v984_v40, 0.0  ;;  %v9251_v56 = vrot.slane %v6399_v45, 1  ;;  %v1112_v58 = vshll.u32 %v6399_v45, 16  ;;  %v6443_v18 = vshrl.u32 %v6399_v45, 16 }
 0x109   : > { %v6401_v48 = vpop.f32.mrf.mxu1  ;;  %v5455_v50 = vpop.f32.mrf.mxu0  ;;  %v1014_v19 = vmul.f32 0.0, %v866_v5  ;;  %v703_v24 = vadd.f32 %v6385_v0, %v702_v47  ;;  %v1535_v30 = vor.u32 %v9247_v21, %v6436_v11  ;;  %v1130_v37 = vrot.slane %v6449_v22, 1 }
 0x10a   : > { %9480 = vst [vmem:[#allocation6_spill] sm:$0xff] %v6401_v48  ;;  %v1073_v54 = vmul.f32 0.0, %v994_v46  ;;  %v6428_v7 = vsel %vm1355_vm1, %v9251_v56, %v1359_v38  ;;  %v6430_v8 = vrot.slane %v1112_v58, 1  ;;  %v6470_v38 = vadd.f32 %v5454_v41, %v6385_v0 }
 0x10b   : > { %v5519_v55 = vpop.f32.mrf.mxu1  ;;  %v705_v57 = vpop.f32.mrf.mxu0  ;;  %9484 = vst [vmem:[#allocation10_spill] sm:$0xff] %v6428_v7  ;;  %v9249_v10 = vshrl.u32 %v6428_v7, 16  ;;  %v1079_v35 = vpack.c.bf16 %v1014_v19, %v865_v29  ;;  %v869_v39 = vmax.f32 %v703_v24, 0.0  ;;  %v6475_v43 = vrot.slane %v1105_v26, 3 }
 0x10c   : > { %v6411_v59 = vpack.c.bf16 %v1073_v54, %v1072_v52  ;;  %v1118_v28 = vor.u32 %v6443_v18, %v6430_v8  ;;  %v706_v40 = vadd.f32 %v6385_v0, %v705_v57  ;;  %v714_v46 = vadd.f32 %v5455_v50, %v6385_v0 }
 0x10d   : > { %v6421_v4 = vpop.f32.mrf.mxu0  ;;  %v1528_v20 = vrot.slane %v9249_v10, 7  ;;  %v6484_v52 = vshrl.u32 %v6394_v31, 16  ;;  %v6487_v41 = vsel %vm1103_vm3, %v1126_v32, %v1130_v37  ;;  %v6492_v55 = vor.u32 %v1109_v33, %v1105_v26 }
 0x10e   : > { %v6479_v47 = vsel %vm1103_vm3, %v1118_v28, %v1122_v13  ;;  %v6495_v57 = vshll.u32 %v6465_v34, 16  ;;  %v1363_v50 = vrot.slane %v1079_v35, 1  ;;  %v9254_v2 = vshrl.u32 %v6487_v41, 16 }
 0x10f   : > { %v6423_v6 = vpop.f32.mrf.mxu0  ;;  %v1536_v36 = vsel %vm1508_vm2, %v1528_v20, %v1535_v30  ;;  %9487 = vst [vmem:[#allocation13_spill] sm:$0xff] %v6484_v52  ;;  %v9255_v53 = vshrl.u32 %v6479_v47, 16  ;;  %v1134_v3 = vor.u32 %v6484_v52, %v1130_v37  ;;  %v871_v5 = vmax.f32 %v6470_v38, 0.0 }
 0x110   : > { %5536 = vmatprep.mubr.bf16.mxu0 %v1536_v36  ;;  %9488 = vst [vmem:[#allocation14_spill] sm:$0xff] %v6495_v57  ;;  %v1017_v9 = vmul.f32 0.0, %v869_v39  ;;  %v870_v12 = vmax.f32 %v706_v40, 0.0  ;;  %v6502_v15 = vrot.slane %v1112_v58, 4  ;;  %v6505_v16 = vshrl.u32 %v6465_v34, 16 }
 0x111   : > { %v6440_v17 = vpop.f32.mrf.mxu0  ;;  %v1365_v19 = vrot.slane %v6465_v34, 1  ;;  %v872_v20 = vmax.f32 %v714_v46, 0.0  ;;  %v1516_v24 = vrot.slane %v9255_v53, 7  ;;  %v6512_v26 = vrot.slane %v9254_v2, 7 }
 0x112   : > { %9489 = vst [vmem:[#allocation15_spill] sm:$0xff] %v6505_v16  ;;  %v9252_v28 = vshll.u32 %v6487_v41, 16  ;;  %v9256_v29 = vrot.slane %v6451_v23, 7  ;;  %v1146_v58 = vrot.slane %v6495_v57, 1  ;;  %v6519_v32 = vshll.u32 %v1079_v35, 16 }
 0x113   : > { %v6454_v25 = vpop.f32.mrf.mxu0  ;;  %v1509_v33 = vrot.slane %v6443_v18, 7  ;;  %v6525_v34 = vsel %vm1355_vm1, %v1361_v44, %v1363_v50  ;;  %v6527_v36 = vshrl.u32 %v1079_v35, 16  ;;  %v6529_v37 = vpack.c.bf16 %v870_v12, %v1017_v9 }
 0x114   : > { %9490 = vst [vmem:[#allocation16_spill] sm:$0xff] %v6519_v32  ;;  %9491 = vst [vmem:[#allocation17_spill] sm:$0xff] %v6525_v34  ;;  %v1523_v38 = vor.u32 %v9252_v28, %v6512_v26  ;;  %v9248_v39 = vshrl.u32 %v6525_v34, 16  ;;  %v1020_v46 = vmul.f32 0.0, %v872_v20  ;;  %v727_v60 = vadd.f32 %v6421_v4, %v6385_v0  ;;  %v5914_v4 = vld [vmem:[%s9241_s4 + $0xb0] sm:$0xff]  }
 0x115   : > { %v6463_v27 = vpop.f32.mrf.mxu0  ;;  %9492 = vst [vmem:[#allocation18_spill] sm:$0xff] %v6527_v36  ;;  %v6541_v31 = vadd.f32 %v6385_v0, %v6423_v6  ;;  %v1511_v44 = vor.u32 %v9256_v29, %v6417_v63  ;;  %v9253_v12 = vshll.u32 %v6525_v34, 16  ;;  %v6551_v20 = vsel %vm1355_vm1, %v1363_v50, %v1365_v19 }
 0x116   : > { %v1524_v35 = vsel %vm1508_vm2, %v1516_v24, %v1523_v38  ;;  %v1551_v9 = vrot.slane %v9248_v39, 7  ;;  %9493 = vst [vmem:[#allocation19_spill] sm:$0xff] %v6551_v20  ;;  %v722_v6 = vadd.f32 %v6385_v0, %v6454_v25  ;;  %v9257_v38 = vshrl.u32 %v6551_v20, 16  ;;  %v5915_v25 = vld [vmem:[%s9241_s4 + $0x38] sm:$0xff]  }
 0x117   : > { %v6473_v42 = vpop.f32.mrf.mxu0  ;;  %2222 = vmatprep.mubr.bf16.mxu1 %v1524_v35  ;;  %v1512_v24 = vsel %vm1508_vm2, %v1509_v33, %v1511_v44  ;;  %v1138_v39 = vrot.slane %v6519_v32, 1  ;;  %v6564_v10 = vor.u32 %v6505_v16, %v1146_v58  ;;  %v9260_v50 = vrot.slane %v6529_v37, 1 }
 0x118   : > { %2223 = vmatmul.mubr.bf16.vlgmr.msra.gmra.mxu1 %v1512_v24  ;;  %v1554_v1 = vor.u32 %v9253_v12, %v1551_v9  ;;  %v9258_v56 = vshll.u32 %v6551_v20, 16  ;;  %v6578_v33 = vrot.slane %v9257_v38, 7  ;;  %v9261_v35 = vrot.slane %v6484_v52, 7 }
 0x119   : > { %v6490_v54 = vpop.f32.mrf.mxu0  ;;  %5585 = vmatpush3.bf16.msra.mxu1 %v6379_v61  ;;  %v6581_v44 = vsel %vm1103_vm3, %v1134_v3, %v1138_v39  ;;  %v1142_v24 = vor.u32 %v6527_v36, %v1138_v39  ;;  %v6585_v12 = vpack.c.bf16 %v1020_v46, %v871_v5  ;;  %v875_v2 = vmax.f32 %v727_v60, 0.0  ;;  %v5919_v3 = vld [vmem:[%s9241_s4 + $0xa8] sm:$0xff]  }
 0x11a   : > { %9494 = vst [vmem:[#allocation20_spill] sm:$0xff] %v6581_v44  ;;  %v1555_v53 = vsel %vm1508_vm2, %v6436_v11, %v1554_v1  ;;  %v9259_v29 = vshrl.u32 %v6581_v44, 16  ;;  %5586 = vmatprep.subr.bf16.mxu1 %v5914_v4  ;;  %v873_v38 = vmax.f32 %v6541_v31, 0.0  ;;  %v730_v39 = vadd.f32 %v6440_v17, %v6385_v0 }
 0x11b   : > { %v6500_v13 = vpop.f32.mrf.mxu0  ;;  %v874_v5 = vmax.f32 %v722_v6, 0.0  ;;  %5537 = vmatmul.mubr.bf16.vlgmr.msra.gmra.mxu0 %v1555_v53  ;;  %v1573_v1 = vor.u32 %v9258_v56, %v6578_v33  ;;  %v9264_v11 = vshll.u32 %v6581_v44, 16  ;;  %v6605_v46 = vsel %vm1103_vm3, %v1142_v24, %v1146_v58  ;;  %v5916_v53 = vld [vmem:[%s9241_s4 + $0x30] sm:$0xff]  }
 0x11c   : > { %v1543_v60 = vrot.slane %v9259_v29, 7  ;;  %9495 = vst [vmem:[#allocation21_spill] sm:$0xff] %v6605_v46  ;;  %v6610_v31 = vsel %vm1355_vm1, %v1365_v19, %v9260_v50  ;;  %3169 = vmatpush1.bf16.msra.mxu0 %v5915_v25  ;;  %v6618_v6 = vshll.u32 %v6529_v37, 16  ;;  %v1538_v58 = vor.u32 %v9261_v35, %v6449_v22 }
 0x11d   : > { %v6516_v30 = vpop.f32.mrf.mxu0  ;;  %9496 = vst [vmem:[#allocation22_spill] sm:$0xff] %v6610_v31  ;;  %v1574_v56 = vsel %vm1508_vm2, %v1551_v9, %v1573_v1  ;;  %v9267_v24 = vshrl.u32 %v6605_v46, 16  ;;  %5587 = vmatpush3.bf16.msra.mxu1 %v5914_v4  ;;  %3170 = vmatprep.subr.bf16.mxu0 %v9262_v14  ;;  %v6627_v19 = vshll.u32 %v6585_v12, 16  ;;  %v1023_v29 = vmul.f32 0.0, %v875_v2 }
 0x11e   : > { %9497 = vst [vmem:[#allocation23_spill] sm:$0xff] %v6618_v6  ;;  %5540 = vmatprep.mubr.bf16.mxu0 %v1574_v56  ;;  %v1546_v50 = vor.u32 %v9264_v11, %v1543_v60  ;;  %5588 = vmatprep.subr.bf16.mxu1 %v5919_v3  ;;  %v738_v1 = vadd.f32 %v6385_v0, %v6500_v13  ;;  %v9270_v35 = vshll.u32 %v6605_v46, 16  ;;  %v6643_v2 = vshrl.u32 %v6529_v37, 16  ;;  %v5917_v13 = vld [vmem:[%s9241_s4 + $0x28] sm:$0xff]  }
 0x11f   : > { %v6535_v40 = vpop.f32.mrf.mxu0  ;;  %9498 = vst [vmem:[#allocation24_spill] sm:$0xff] %v6627_v19  ;;  %v6638_v4 = vrot.slane %v9267_v24, 7  ;;  %v876_v56 = vmax.f32 %v730_v39, 0.0  ;;  %v6645_v25 = vpack.c.bf16 %v874_v5, %v873_v38  ;;  %v6655_v24 = vshrl.u32 %v6585_v12, 16  ;;  %v5926_v5 = vld [vmem:[%s9241_s4 + $0xa0] sm:$0xff]  }
 0x120   : > { %9499 = vst [vmem:[#allocation25_spill] sm:$0xff] %v6643_v2  ;;  %v1547_v11 = vsel %vm1508_vm2, %v6512_v26, %v1546_v50  ;;  %3171 = vmatpush1.bf16.msra.mxu0 %v5916_v53  ;;  %v9500_v39 = vrot.slane %v6451_v23, 7  ;;  %v9501_v50 = vmov 0   ;;  %v9502_v14 = vshrl.u32 %v6610_v31, 16 }
 0x121   : > { %v6553_v21 = vpop.f32.mrf.mxu0  ;;  %2230 = vmatprep.mubr.bf16.mxu1 %v1547_v11  ;;  %v1565_v26 = vor.u32 %v9270_v35, %v6638_v4  ;;  %3172 = vmatprep.subr.bf16.mxu0 %v9501_v50  ;;  %v735_v7 = vadd.f32 %v6385_v0, %v6473_v42  ;;  %v878_v45 = vmax.f32 %v738_v1, 0.0  ;;  %v5918_v42 = vld [vmem:[%s9241_s4 + $0x20] sm:$0xff]  }
 0x122   : > { %v1539_v38 = vsel %vm1508_vm2, %v9500_v39, %v1538_v58  ;;  %v1589_v11 = vrot.slane %v9502_v14, 7  ;;  %v9503_v58 = vrot.slane %v6585_v12, 1  ;;  %v9504_v39 = vrot.slane %v6529_v37, 1  ;;  %5589 = vmatpush3.bf16.msra.mxu1 %v5919_v3 }
 0x123   : > { %v6570_v28 = vpop.f32.mrf.mxu0  ;;  %2231 = vmatmul.mubr.bf16.gmra.mxu1 %v1539_v38  ;;  %v1566_v38 = vsel %vm1508_vm2, %v1543_v60, %v1565_v26  ;;  %v6685_v14 = vpack.c.bf16 %v876_v56, %v1023_v29  ;;  %v9506_v37 = vshll.u32 %v6610_v31, 16  ;;  %v5933_v29 = vld [vmem:[%s9241_s4 + $0x98] sm:$0xff]   ;;  %v6701_v3 = vadd.f32 %v6463_v27, %v6385_v0  ;;  %5590 = vmatprep.subr.bf16.mxu1 %v5926_v5 }
 0x124   : > { %v6677_v35 = vsel %vm1355_vm1, %v9504_v39, %v9503_v58  ;;  %2238 = vmatprep.mubr.bf16.mxu1 %v1566_v38  ;;  %v9278_v39 = vrot.slane %v6527_v36, 7  ;;  %3173 = vmatpush1.bf16.msra.mxu0 %v5917_v13  ;;  %v9507_v56 = vrot.slane %v6618_v6, 1  ;;  %v746_v26 = vadd.f32 %v6490_v54, %v6385_v0 }
 0x125   : > { %v6590_v61 = vpop.f32.mrf.mxu0  ;;  %9505 = vst [vmem:[#allocation26_spill] sm:$0xff] %v6677_v35  ;;  %v9277_v53 = vshrl.u32 %v6677_v35, 16  ;;  %v1592_v58 = vor.u32 %v9506_v37, %v1589_v11  ;;  %v9279_v1 = vshll.u32 %v6677_v35, 16  ;;  %3174 = vmatprep.subr.bf16.mxu0 %v9501_v50  ;;  %v877_v34 = vmax.f32 %v735_v7, 0.0 }
 0x126   : > { %v6712_v13 = vsel %vm1103_vm3, %v6564_v10, %v9507_v56  ;;  %v1557_v38 = vor.u32 %v9278_v39, %v6519_v32  ;;  %v1026_v10 = vmul.f32 0.0, %v878_v45  ;;  %v751_v56 = vadd.f32 %v6385_v0, %v6535_v40  ;;  %5591 = vmatpush3.bf16.msra.mxu1 %v5926_v5  ;;  %v5920_v5 = vld [vmem:[%s9241_s4 + $0x18] sm:$0xff]  }
 0x127   : > { %v6612_v17 = vpop.f32.mrf.mxu0  ;;  %v6705_v60 = vrot.slane %v9277_v53, 7  ;;  %9508 = vst [vmem:[#allocation27_spill] sm:$0xff] %v6712_v13  ;;  %v1593_v27 = vsel %vm1508_vm2, %v6578_v33, %v1592_v58  ;;  %v9280_v37 = vshrl.u32 %v6712_v13, 16  ;;  %v6731_v33 = vshll.u32 %v6685_v14, 16  ;;  %5592 = vmatprep.subr.bf16.mxu1 %v5933_v29 }
 0x128   : > { %5541 = vmatmul.mubr.bf16.gmra.mxu0 %v1593_v27  ;;  %v9510_v45 = vrot.slane %v6645_v25, 1  ;;  %v9511_v7 = vrot.slane %v6585_v12, 1  ;;  %v9513_v12 = vrot.slane %v6484_v52, 7  ;;  %v879_v35 = vmax.f32 %v6701_v3, 0.0 }
 0x129   : > { %v6632_v9 = vpop.f32.mrf.mxu0  ;;  %v1611_v54 = vor.u32 %v9279_v1, %v6705_v60  ;;  %9509 = vst [vmem:[#allocation28_spill] sm:$0xff] %v6731_v33  ;;  %v6735_v58 = vrot.slane %v9280_v37, 7  ;;  %3175 = vmatpush1.bf16.msra.mxu0 %v5918_v42  ;;  %v5934_v1 = vld [vmem:[%s9241_s4 + $0x90] sm:$0xff]   ;;  %v6761_v42 = vshll.u32 %v6645_v25, 16  ;;  %v880_v31 = vmax.f32 %v746_v26, 0.0 }
 0x12a   : > { %v6743_v40 = vsel %vm1355_vm1, %v9511_v7, %v9510_v45  ;;  %v1558_v45 = vsel %vm1508_vm2, %v9513_v12, %v1557_v38  ;;  %3176 = vmatprep.subr.bf16.mxu0 %v9501_v50  ;;  %v9514_v37 = vshll.u32 %v6712_v13, 16  ;;  %v6769_v48 = vpack.c.bf16 %v1026_v10, %v877_v34  ;;  %5593 = vmatpush3.bf16.msra.mxu1 %v5933_v29 }
 0x12b   : > { %v6649_v20 = vpop.f32.mrf.mxu0  ;;  %9512 = vst [vmem:[#allocation29_spill] sm:$0xff] %v6743_v40  ;;  %v1612_v39 = vsel %vm1508_vm2, %v1589_v11, %v1611_v54  ;;  %v9286_v7 = vshrl.u32 %v6743_v40, 16  ;;  %2239 = vmatmul.mubr.bf16.gmra.mxu1 %v1558_v45  ;;  %v881_v38 = vmax.f32 %v751_v56, 0.0  ;;  %v754_v12 = vadd.f32 %v6385_v0, %v6570_v28  ;;  %v5921_v28 = vld [vmem:[%s9241_s4 + $0x10] sm:$0xff]   ;;  %5594 = vmatprep.subr.bf16.mxu1 %v5934_v1 }
 0x12c   : > { %5544 = vmatprep.mubr.bf16.mxu0 %v1612_v39  ;;  %v1584_v11 = vor.u32 %v9514_v37, %v6735_v58  ;;  %v9515_v39 = vrot.slane %v6618_v6, 1  ;;  %v9292_v34 = vshll.u32 %v6743_v40, 16  ;;  %v9516_v29 = vrot.slane %v6627_v19, 1 }
 0x12d   : > { %v6679_v51 = vpop.f32.mrf.mxu0  ;;  %v1627_v32 = vrot.slane %v9286_v7, 7  ;;  %3177 = vmatpush1.bf16.msra.mxu0 %v5920_v5  ;;  %v6793_v45 = vshrl.u32 %v6685_v14, 16  ;;  %v9518_v5 = vrot.slane %v6645_v25, 1  ;;  %v1375_v46 = vrot.slane %v6769_v48, 1 }
 0x12e   : > { %v1158_v26 = vor.u32 %v6643_v2, %v9515_v39  ;;  %v1585_v37 = vsel %vm1508_vm2, %v6638_v4, %v1584_v11  ;;  %v6790_v56 = vor.u32 %v6655_v24, %v9516_v29  ;;  %v762_v4 = vadd.f32 %v6553_v21, %v6385_v0  ;;  %3178 = vmatprep.subr.bf16.mxu0 %v9501_v50 }
 0x12f   : > { %v6691_v62 = vpop.f32.mrf.mxu0  ;;  %2246 = vmatprep.mubr.bf16.mxu1 %v1585_v37  ;;  %v9517_v11 = vrot.slane %v6685_v14, 1  ;;  %v1630_v3 = vor.u32 %v9292_v34, %v1627_v32  ;;  %v6812_v37 = vpack.c.bf16 %v880_v31, %v879_v35  ;;  %v1029_v22 = vmul.f32 0.0, %v881_v38  ;;  %5595 = vmatpush3.bf16.msra.mxu1 %v5934_v1  ;;  %v5922_v35 = vld [vmem:[%s9241_s4 + $0x8] sm:$0xff]  }
 0x130   : > { %v9299_v7 = vrot.slane %v6505_v16, 7  ;;  %v6829_v31 = vshrl.u32 %v6645_v25, 16  ;;  %v884_v1 = vmax.f32 %v762_v4, 0.0  ;;  %v9520_v38 = vrot.slane %v6627_v19, 1 }
 0x131   : > { %v6723_v53 = vpop.f32.mrf.mxu0  ;;  %v6802_v39 = vsel %vm1355_vm1, %v9518_v5, %v9517_v11  ;;  %v882_v11 = vmax.f32 %v754_v12, 0.0  ;;  %v1631_v5 = vsel %vm1508_vm2, %v6705_v60, %v1630_v3  ;;  %3179 = vmatpush1.bf16.msra.mxu0 %v5921_v28  ;;  %v759_v60 = vadd.f32 %v6516_v30, %v6385_v0 }
 0x132   : > { %9519 = vst [vmem:[#allocation30_spill] sm:$0xff] %v6802_v39  ;;  %v9295_v13 = vshrl.u32 %v6802_v39, 16  ;;  %v9296_v34 = vshll.u32 %v6802_v39, 16  ;;  %5545 = vmatmul.mubr.bf16.gmra.mxu0 %v1631_v5  ;;  %v6836_v12 = vsel %vm1103_vm3, %v1158_v26, %v9520_v38  ;;  %v9522_v3 = vrot.slane %v6731_v33, 1  ;;  %3180 = vmatprep.subr.bf16.mxu0 %v9501_v50 }
 0x133   : > { %v6745_v27 = vpop.f32.mrf.mxu0  ;;  %9521 = vst [vmem:[#allocation31_spill] sm:$0xff] %v6836_v12  ;;  %v1576_v30 = vor.u32 %v9299_v7, %v6495_v57  ;;  %v9523_v26 = vrot.slane %v6761_v42, 1  ;;  %v6867_v7 = vshll.u32 %v6812_v37, 16  ;;  %v775_v4 = vadd.f32 %v6590_v61, %v6385_v0 }
 0x134   : > { %v6819_v29 = vrot.slane %v9295_v13, 7  ;;  %v6841_v28 = vor.u32 %v6793_v45, %v9522_v3  ;;  %v1377_v3 = vrot.slane %v6812_v37, 1  ;;  %v6859_v13 = vpack.c.bf16 %v882_v11, %v1029_v22  ;;  %v5923_v22 = vld [vmem:[%s9241_s4] sm:$0xff]  }
 0x135   : > { %v6767_v54 = vpop.f32.mrf.mxu0  ;;  %v6856_v38 = vor.u32 %v6829_v31, %v9523_v26  ;;  %9526 = vst [vmem:[#allocation33_spill] sm:$0xff] %v6867_v7  ;;  %v9527_v26 = vrot.slane %v6527_v36, 7  ;;  %3181 = vmatpush1.bf16.msra.mxu0 %v5922_v35  ;;  %v9528_v11 = vshrl.u32 %v6836_v12, 16  ;;  %v9304_v61 = vshll.u32 %v6836_v12, 16 }
 0x136   : > { %v1649_v25 = vor.u32 %v9296_v34, %v6819_v29  ;;  %v9524_v34 = vrot.slane %v6685_v14, 1  ;;  %v883_v14 = vmax.f32 %v759_v60, 0.0  ;;  %v767_v35 = vadd.f32 %v6385_v0, %v6612_v17  ;;  %3182 = vmatprep.subr.bf16.mxu0 %v9501_v50 }
 0x137   : > { %v6782_v10 = vpop.f32.mrf.mxu0  ;;  %v1577_v52 = vsel %vm1508_vm2, %v9527_v26, %v1576_v30  ;;  %v6880_v44 = vrot.slane %v9528_v11, 7  ;;  %v887_v26 = vmax.f32 %v775_v4, 0.0  ;;  %v9534_v4 = vrot.slane %v6761_v42, 1 }
 0x138   : > { %v6864_v39 = vsel %vm1355_vm1, %v9524_v34, %v1375_v46  ;;  %v1650_v57 = vsel %vm1508_vm2, %v1627_v32, %v1649_v25  ;;  %v1032_v34 = vmul.f32 0.0, %v884_v1  ;;  %2247 = vmatmul.mubr.bf16.gmra.mxu1 %v1577_v52  ;;  %v6884_v32 = vshrl.u32 %v6812_v37, 16 }
 0x139   : > { %v6810_v21 = vpop.f32.mrf.mxu0  ;;  %9525 = vst [vmem:[#allocation32_spill] sm:$0xff] %v6864_v39  ;;  %5548 = vmatprep.mubr.bf16.mxu0 %v1650_v57  ;;  %v9305_v25 = vshrl.u32 %v6864_v39, 16  ;;  %v770_v57 = vadd.f32 %v6385_v0, %v6649_v20  ;;  %v1603_v37 = vor.u32 %v9304_v61, %v6880_v44  ;;  %v6900_v1 = vsel %vm1355_vm1, %v1375_v46, %v1377_v3  ;;  %v5924_v20 = vld [vmem:[%s9241_s4 + $0x78] sm:$0xff]   ;;  %v5935_v61 = vld [vmem:[%s9241_s4 + $0x88] sm:$0xff]  }
 0x13a   : > { %9529 = vst [vmem:[#allocation34_spill] sm:$0xff] %v6884_v32  ;;  %9530 = vst [vmem:[#allocation35_spill] sm:$0xff] %v6900_v1  ;;  %3183 = vmatpush1.bf16.msra.mxu0 %v5923_v22  ;;  %v6912_v52 = vpack.c.bf16 %v1032_v34, %v883_v14  ;;  %v6920_v22 = vshll.u32 %v6859_v13, 16  ;;  %v885_v17 = vmax.f32 %v767_v35, 0.0  ;;  %v9532_v30 = vshll.u32 %v6864_v39, 16  ;;  %5596 = vmatprep.subr.bf16.mxu1 %v5935_v61 }
 0x13b   : > { %v6823_v40 = vpop.f32.mrf.mxu0  ;;  %v1665_v11 = vrot.slane %v9305_v25, 7  ;;  %v1604_v46 = vsel %vm1508_vm2, %v6735_v58, %v1603_v37  ;;  %v9309_v25 = vrot.slane %v6643_v2, 7  ;;  %3184 = vmatprep.subr.bf16.mxu0 %v9501_v50  ;;  %v9533_v14 = vshrl.u32 %v6900_v1, 16  ;;  %5597 = vmatpush3.bf16.msra.mxu1 %v5935_v61 }
 0x13c   : > { %9531 = vst [vmem:[#allocation36_spill] sm:$0xff] %v6920_v22  ;;  %2254 = vmatprep.mubr.bf16.mxu1 %v1604_v46  ;;  %v886_v58 = vmax.f32 %v770_v57, 0.0  ;;  %v6935_v35 = vsel %vm1103_vm3, %v6790_v56, %v9534_v4  ;;  %v9536_v46 = vrot.slane %v6859_v13, 1  ;;  %v6946_v57 = vshrl.u32 %v6769_v48, 16  ;;  %v5925_v56 = vld [vmem:[%s9241_s4 + $0x70] sm:$0xff]  }
 0x13d   : > { %v6850_v5 = vpop.f32.mrf.mxu0  ;;  %v1668_v12 = vor.u32 %v9532_v30, %v1665_v11  ;;  %v1684_v34 = vrot.slane %v9533_v14, 7  ;;  %v1595_v37 = vor.u32 %v9309_v25, %v6618_v6  ;;  %9535 = vst [vmem:[#allocation37_spill] sm:$0xff] %v6935_v35  ;;  %v6943_v14 = vshll.u32 %v6769_v48, 16 }
 0x13e   : > { %v6940_v30 = vsel %vm1355_vm1, %v1377_v3, %v9536_v46  ;;  %v778_v25 = vadd.f32 %v6632_v9, %v6385_v0  ;;  %3185 = vmatpush2.bf16.msra.mxu0 %v5924_v20  ;;  %v6956_v3 = vshll.u32 %v6912_v52, 16  ;;  %v1035_v61 = vmul.f32 0.0, %v887_v26 }
 0x13f   : > { %v6890_v60 = vpop.f32.mrf.mxu0  ;;  %9537 = vst [vmem:[#allocation38_spill] sm:$0xff] %v6940_v30  ;;  %v1669_v39 = vsel %vm1508_vm2, %v6819_v29, %v1668_v12  ;;  %v9539_v4 = vshll.u32 %v6900_v1, 16  ;;  %v9540_v46 = vrot.slane %v6505_v16, 7  ;;  %3186 = vmatprep.subr.bf16.mxu0 %v9501_v50  ;;  %v6965_v29 = vshrl.u32 %v6859_v13, 16 }
 0x140   : > { %9538 = vst [vmem:[#allocation39_spill] sm:$0xff] %v6956_v3  ;;  %5549 = vmatmul.mubr.bf16.gmra.mxu0 %v1669_v39  ;;  %v786_v12 = vadd.f32 %v6385_v0, %v6745_v27  ;;  %v9317_v20 = vshrl.u32 %v6935_v35, 16  ;;  %v9316_v39 = vshrl.u32 %v6940_v30, 16  ;;  %v6974_v1 = vpack.c.bf16 %v886_v58, %v885_v17  ;;  %v5927_v17 = vld [vmem:[%s9241_s4 + $0x68] sm:$0xff]  }
 0x141   : > { %v6926_v36 = vpop.f32.mrf.mxu0  ;;  %v1687_v48 = vor.u32 %v9539_v4, %v1684_v34  ;;  %v1596_v9 = vsel %vm1508_vm2, %v9540_v46, %v1595_v37  ;;  %9541 = vst [vmem:[#allocation40_spill] sm:$0xff] %v6965_v29  ;;  %v9321_v46 = vshll.u32 %v6940_v30, 16  ;;  %v888_v6 = vmax.f32 %v778_v25, 0.0 }
 0x142   : > { %2255 = vmatmul.mubr.bf16.gmra.mxu1 %v1596_v9  ;;  %v1619_v27 = vrot.slane %v9317_v20, 7  ;;  %v9320_v9 = vshll.u32 %v6935_v35, 16  ;;  %v6983_v16 = vrot.slane %v9316_v39, 7  ;;  %3187 = vmatpush2.bf16.msra.mxu0 %v5925_v56  ;;  %v783_v56 = vadd.f32 %v6385_v0, %v6691_v62 }
 0x143   : > { %v6971_v26 = vpop.f32.mrf.mxu0  ;;  %v1688_v37 = vsel %vm1508_vm2, %v1665_v11, %v1687_v48  ;;  %v9542_v11 = vrot.slane %v6867_v7, 1  ;;  %v6995_v48 = vshrl.u32 %v6912_v52, 16  ;;  %3188 = vmatprep.subr.bf16.mxu0 %v9501_v50  ;;  %v890_v39 = vmax.f32 %v786_v12, 0.0 }
 0x144   : > { %5552 = vmatprep.mubr.bf16.mxu0 %v1688_v37  ;;  %v1381_v37 = vrot.slane %v6912_v52, 1  ;;  %v1622_v20 = vor.u32 %v9320_v9, %v1619_v27  ;;  %v9543_v25 = vrot.slane %v6920_v22, 1  ;;  %v9544_v62 = vrot.slane %v6731_v33, 1  ;;  %v5928_v52 = vld [vmem:[%s9241_s4 + $0x60] sm:$0xff]  }
 0x145   : > { %v6991_v58 = vor.u32 %v6884_v32, %v9542_v11  ;;  %v1706_v11 = vor.u32 %v9321_v46, %v6983_v16  ;;  %v7006_v4 = vpop.f32.mrf.mxu0  ;;  %v7021_v9 = vpack.c.bf16 %v888_v6, %v1035_v61  ;;  %v791_v46 = vadd.f32 %v6679_v51, %v6385_v0 }
 0x146   : > { %v7011_v63 = vor.u32 %v6965_v29, %v9543_v25  ;;  %v7019_v12 = vsel %vm1103_vm3, %v6856_v38, %v9544_v62  ;;  %v1623_v30 = vsel %vm1508_vm2, %v6880_v44, %v1622_v20  ;;  %3189 = vmatpush2.bf16.msra.mxu0 %v5927_v17  ;;  %v794_v23 = vadd.f32 %v6723_v53, %v6385_v0 }
 0x147   : > { %9545 = vst [vmem:[#allocation41_spill] sm:$0xff] %v7019_v12  ;;  %v1707_v25 = vsel %vm1508_vm2, %v1684_v34, %v1706_v11  ;;  %2262 = vmatprep.mubr.bf16.mxu1 %v1623_v30  ;;  %v799_v6 = vadd.f32 %v6385_v0, %v6782_v10  ;;  %v9546_v51 = vrot.slane %v6655_v24, 7  ;;  %v9324_v44 = vshrl.u32 %v7019_v12, 16  ;;  %v7045_v53 = vpop.f32.mrf.mxu0  ;;  %3190 = vmatprep.subr.bf16.mxu0 %v9501_v50 }
 0x148   : > { %5553 = vmatmul.mubr.bf16.gmra.mxu0 %v1707_v25  ;;  %v889_v34 = vmax.f32 %v783_v56, 0.0  ;;  %v1038_v61 = vmul.f32 0.0, %v890_v39  ;;  %v9328_v20 = vshll.u32 %v7019_v12, 16  ;;  %v9547_v17 = vrot.slane %v6859_v13, 1 }
 0x149   : > { %v1614_v38 = vor.u32 %v9546_v51, %v6627_v19  ;;  %v9549_v10 = vrot.slane %v6643_v2, 7  ;;  %v7053_v62 = vrot.slane %v9324_v44, 7  ;;  %v9550_v56 = vrot.slane %v6974_v1, 1 }
 0x14a   : > { %v7043_v11 = vsel %vm1355_vm1, %v9547_v17, %v1381_v37  ;;  %v7062_v25 = vshll.u32 %v7021_v9, 16  ;;  %v7065_v51 = vshrl.u32 %v7021_v9, 16  ;;  %v891_v17 = vmax.f32 %v791_v46, 0.0  ;;  %3191 = vmatpush2.bf16.msra.mxu0 %v5928_v52 }
 0x14b   : > { %9548 = vst [vmem:[#allocation42_spill] sm:$0xff] %v7043_v11  ;;  %v1615_v30 = vsel %vm1508_vm2, %v9549_v10, %v1614_v38  ;;  %v9329_v39 = vshrl.u32 %v7043_v11, 16  ;;  %v7059_v13 = vsel %vm1355_vm1, %v1381_v37, %v9550_v56  ;;  %v810_v38 = vadd.f32 %v6810_v21, %v6385_v0  ;;  %v5929_v10 = vld [vmem:[%s9241_s4 + $0x58] sm:$0xff]   ;;  %3192 = vmatprep.subr.bf16.mxu0 %v9501_v50 }
 0x14c   : > { %9551 = vst [vmem:[#allocation43_spill] sm:$0xff] %v7059_v13  ;;  %2263 = vmatmul.mubr.bf16.gmra.mxu1 %v1615_v30  ;;  %v893_v44 = vmax.f32 %v799_v6, 0.0  ;;  %v802_v37 = vadd.f32 %v6385_v0, %v6823_v40  ;;  %v1641_v56 = vor.u32 %v9328_v20, %v7053_v62  ;;  %v1385_v21 = vrot.slane %v7021_v9, 1  ;;  %v7083_v6 = vpop.f32.mrf.mxu0 }
 0x14d   : > { %v1722_v46 = vrot.slane %v9329_v39, 7  ;;  %v892_v52 = vmax.f32 %v794_v23, 0.0  ;;  %v9335_v30 = vshll.u32 %v7043_v11, 16  ;;  %v9333_v19 = vshrl.u32 %v7059_v13, 16 }
 0x14e   : > { %v7086_v40 = vshll.u32 %v6974_v1, 16  ;;  %v7088_v35 = vpack.c.bf16 %v1038_v61, %v889_v34  ;;  %v1642_v20 = vsel %vm1508_vm2, %v1619_v27, %v1641_v56  ;;  %v9334_v39 = vshll.u32 %v7059_v13, 16  ;;  %3193 = vmatpush2.bf16.msra.mxu0 %v5929_v10  ;;  %v5930_v34 = vld [vmem:[%s9241_s4 + $0x50] sm:$0xff]  }
 0x14f   : > { %v807_v12 = vadd.f32 %v6767_v54, %v6385_v0  ;;  %v896_v9 = vmax.f32 %v810_v38, 0.0  ;;  %2270 = vmatprep.mubr.bf16.mxu1 %v1642_v20  ;;  %v1725_v23 = vor.u32 %v9335_v30, %v1722_v46  ;;  %v7098_v2 = vrot.slane %v9333_v19, 7  ;;  %3194 = vmatprep.subr.bf16.mxu0 %v9501_v50  ;;  %v5931_v30 = vld [vmem:[%s9241_s4 + $0x48] sm:$0xff]  }
 0x150   : > { %v1041_v27 = vmul.f32 0.0, %v893_v44  ;;  %v894_v61 = vmax.f32 %v802_v37, 0.0  ;;  %v823_v56 = vadd.f32 %v6850_v5, %v6385_v0  ;;  %v9336_v54 = vrot.slane %v6829_v31, 7  ;;  %v833_v44 = vpop.f32.mrf.mxu0 }
 0x151   : > { %v7107_v20 = vpack.c.bf16 %v892_v52, %v891_v17  ;;  %v1726_v38 = vsel %vm1508_vm2, %v6983_v16, %v1725_v23  ;;  %v1744_v10 = vor.u32 %v9334_v39, %v7098_v2  ;;  %v9337_v19 = vrot.slane %v6943_v14, 1 }
 0x152   : > { %5556 = vmatprep.mubr.bf16.mxu0 %v1726_v38  ;;  %v815_v5 = vadd.f32 %v6385_v0, %v6890_v60  ;;  %v1633_v17 = vor.u32 %v9336_v54, %v6761_v42  ;;  %v9552_v52 = vrot.slane %v6974_v1, 1  ;;  %v818_v39 = vadd.f32 %v6385_v0, %v6971_v26  ;;  %3195 = vmatpush2.bf16.msra.mxu0 %v5930_v34  ;;  %v5490_v11 = vpop.f32.mrf.mxu0 }
 0x153   : > { %v1745_v23 = vsel %vm1508_vm2, %v1722_v46, %v1744_v10  ;;  %v7133_v38 = vsel %vm1103_vm3, %v6841_v28, %v9337_v19  ;;  %v5936_v46 = vld [vmem:[%s9241_s4 + $0x80] sm:$0xff]   ;;  %v895_v10 = vmax.f32 %v807_v12, 0.0  ;;  %v7142_v26 = vpack.c.bf16 %v894_v61, %v1041_v27  ;;  %3196 = vmatprep.subr.bf16.mxu0 %v9501_v50 }
 0x154   : > { %v7124_v16 = vsel %vm1355_vm1, %v9552_v52, %v1385_v21  ;;  %v1044_v52 = vmul.f32 0.0, %v896_v9  ;;  %v899_v54 = vmax.f32 %v823_v56, 0.0  ;;  %5557 = vmatmul.mubr.bf16.gmra.mxu0 %v1745_v23  ;;  %v9554_v28 = vrot.slane %v6655_v24, 7  ;;  %5598 = vmatprep.subr.bf16.mxu1 %v5936_v46 }
 0x155   : > { %9553 = vst [vmem:[#allocation44_spill] sm:$0xff] %v7124_v16  ;;  %v9342_v60 = vshrl.u32 %v7124_v16, 16  ;;  %v9343_v19 = vshrl.u32 %v7133_v38, 16  ;;  %v9344_v37 = vshll.u32 %v7133_v38, 16  ;;  %v7154_v9 = vshrl.u32 %v6974_v1, 16  ;;  %v5932_v1 = vld [vmem:[%s9241_s4 + $0x40] sm:$0xff]   ;;  %5599 = vmatpush3.bf16.msra.mxu1 %v5936_v46 }
 0x156   : > { %v1634_v34 = vsel %vm1508_vm2, %v9554_v28, %v1633_v17  ;;  %v897_v27 = vmax.f32 %v815_v5, 0.0  ;;  %v826_v61 = vadd.f32 %v6926_v36, %v6385_v0  ;;  %v898_v56 = vmax.f32 %v818_v39, 0.0  ;;  %3197 = vmatpush2.bf16.msra.mxu0 %v5931_v30  ;;  %3876 = vmatprep.subr.bf16.mxu1 %v9501_v50 }
 0x157   : > { %v1760_v13 = vrot.slane %v9342_v60, 7  ;;  %2271 = vmatmul.mubr.bf16.gmra.mxu1 %v1634_v34  ;;  %v7160_v17 = vrot.slane %v9343_v19, 7  ;;  %v9345_v23 = vshll.u32 %v7124_v16, 16  ;;  %v9555_v28 = vrot.slane %v7088_v35, 1  ;;  %3198 = vmatprep.subr.bf16.mxu0 %v9501_v50 }
 0x158   : > { %v1389_v0 = vrot.slane %v7107_v20, 1  ;;  %v7172_v36 = vpack.c.bf16 %v1044_v52, %v895_v10  ;;  %v1047_v30 = vmul.f32 0.0, %v899_v54  ;;  %v846_v10 = vpop.f32.mrf.mxu0  ;;  %v900_v52 = vmax.f32 %v826_v61, 0.0 }
 0x159   : > { %v7166_v60 = vsel %vm1355_vm1, %v1385_v21, %v9555_v28  ;;  %v1660_v34 = vor.u32 %v9344_v37, %v7160_v17  ;;  %v1763_v46 = vor.u32 %v9345_v23, %v1760_v13  ;;  %v7187_v28 = vld [vmem:[%s9240_s3] ss:$0 sm:$0xff]  ;;  %v9347_v12 = vrot.slane %v6793_v45, 7 }
 0x15a   : > { %9556 = vst [vmem:[#allocation45_spill] sm:$0xff] %v7166_v60  ;;  %v9346_v39 = vshrl.u32 %v7166_v60, 16  ;;  %v7191_v19 = vadd.f32 %v7187_v28, %v7006_v4  ;;  %v7196_v37 = vpack.c.bf16 %v898_v56, %v897_v27  ;;  %v834_v21 = vadd.f32 %v7187_v28, %v833_v44  ;;  %3199 = vmatpush2.bf16.msra.mxu0 %v5932_v1 }
 0x15b   : > { %v1661_v23 = vsel %vm1508_vm2, %v7053_v62, %v1660_v34  ;;  %v1764_v61 = vsel %vm1508_vm2, %v7098_v2, %v1763_v46  ;;  %v9557_v4 = vshll.u32 %v7166_v60, 16  ;;  %v1652_v27 = vor.u32 %v9347_v12, %v6731_v33  ;;  %v5491_v46 = vpop.f32.mrf.mxu0 }
 0x15c   : > { %v1779_v54 = vrot.slane %v9346_v39, 7  ;;  %2278 = vmatprep.mubr.bf16.mxu1 %v1661_v23  ;;  %5560 = vmatprep.mubr.bf16.mxu0 %v1764_v61  ;;  %v9558_v56 = vrot.slane %v6943_v14, 1  ;;  %v831_v2 = vadd.f32 %v7187_v28, %v7045_v53  ;;  %v842_v44 = vadd.f32 %v7187_v28, %v7083_v6 }
 0x15d   : > { %v7217_v23 = vadd.f32 %v7187_v28, %v5490_v11  ;;  %v9559_v1 = vrot.slane %v7088_v35, 1  ;;  %v9562_v53 = vrot.slane %v6867_v7, 1  ;;  %v9564_v11 = vrot.slane %v7142_v26, 1 }
 0x15e   : > { %v1782_v39 = vor.u32 %v9557_v4, %v1779_v54  ;;  %v1190_v62 = vor.u32 %v6946_v57, %v9558_v56  ;;  %v9561_v4 = vrot.slane %v6829_v31, 7  ;;  %v7239_v12 = vpack.c.bf16 %v900_v52, %v1047_v30  ;;  %v849_v52 = vpop.f32.mrf.mxu0 }
 0x15f   : > { %v7222_v34 = vsel %vm1355_vm1, %v9559_v1, %v1389_v0  ;;  %v7236_v6 = vsel %vm1355_vm1, %v1389_v0, %v9564_v11  ;;  %v1393_v1 = vrot.slane %v7172_v36, 1  ;;  %v1395_v0 = vrot.slane %v7196_v37, 1 }
 0x160   : > { %9560 = vst [vmem:[#allocation46_spill] sm:$0xff] %v7222_v34  ;;  %v1783_v61 = vsel %vm1508_vm2, %v1760_v13, %v1782_v39  ;;  %v1653_v56 = vsel %vm1508_vm2, %v9561_v4, %v1652_v27  ;;  %v7231_v5 = vsel %vm1103_vm3, %v1190_v62, %v9562_v53  ;;  %9565 = vst [vmem:[#allocation48_spill] sm:$0xff] %v7236_v6  ;;  %v902_v13 = vmax.f32 %v834_v21, 0.0 }
 0x161   : > { %9563 = vst [vmem:[#allocation47_spill] sm:$0xff] %v7231_v5  ;;  %5561 = vmatmul.mubr.bf16.gmra.mxu0 %v1783_v61  ;;  %2279 = vmatmul.mubr.bf16.gmra.mxu1 %v1653_v56  ;;  %v9353_v39 = vshrl.u32 %v7231_v5, 16  ;;  %v903_v27 = vmax.f32 %v7191_v19, 0.0  ;;  %v9355_v62 = vshrl.u32 %v7222_v34, 16  ;;  %v9358_v30 = vshrl.u32 %v7236_v6, 16 }
 0x162   : > { %v901_v61 = vmax.f32 %v831_v2, 0.0  ;;  %v904_v56 = vmax.f32 %v842_v44, 0.0  ;;  %v907_v19 = vmax.f32 %v7217_v23, 0.0  ;;  %v1050_v60 = vmul.f32 0.0, %v902_v13 }
 0x163   : > { %v1676_v11 = vrot.slane %v9353_v39, 7  ;;  %v1798_v4 = vrot.slane %v9355_v62, 7  ;;  %v9566_v53 = vshll.u32 %v7231_v5, 16  ;;  %v1817_v50 = vrot.slane %v9358_v30, 7 }
 0x164   : > { %v847_v39 = vadd.f32 %v7187_v28, %v846_v10  ;;  %v9567_v33 = vshll.u32 %v7222_v34, 16  ;;  %v858_v2 = vadd.f32 %v7187_v28, %v5491_v46  ;;  %v850_v44 = vadd.f32 %v7187_v28, %v849_v52 }
 0x165   : > { %v1679_v16 = vor.u32 %v9566_v53, %v1676_v11  ;;  %v1670_v23 = vrot.slane %v6946_v57, 7  ;;  %v9568_v62 = vshll.u32 %v7236_v6, 16  ;;  %v9569_v30 = vrot.slane %v6920_v22, 1 }
 0x166   : > { %v1801_v21 = vor.u32 %v9567_v33, %v1798_v4  ;;  %v905_v5 = vmax.f32 %v847_v39, 0.0  ;;  %v908_v46 = vmax.f32 %v858_v2, 0.0  ;;  %v906_v52 = vmax.f32 %v850_v44, 0.0 }
 0x167   : > { %v1680_v13 = vsel %vm1508_vm2, %v7160_v17, %v1679_v16  ;;  %v1820_v53 = vor.u32 %v9568_v62, %v1817_v50  ;;  %v7272_v10 = vsel %vm1103_vm3, %v6991_v58, %v9569_v30  ;;  %v1671_v34 = vor.u32 %v1670_v23, %v6943_v14 }
 0x168   : > { %9570 = vst [vmem:[#allocation49_spill] sm:$0xff] %v7272_v10  ;;  %2286 = vmatprep.mubr.bf16.mxu1 %v1680_v13  ;;  %v1802_v33 = vsel %vm1508_vm2, %v1779_v54, %v1801_v21  ;;  %v1053_v17 = vmul.f32 0.0, %v905_v5  ;;  %v9364_v62 = vshrl.u32 %v7272_v10, 16  ;;  %v9363_v39 = vshll.u32 %v7272_v10, 16 }
 0x169   : > { %5564 = vmatprep.mubr.bf16.mxu0 %v1802_v33  ;;  %v1821_v16 = vsel %vm1508_vm2, %v1798_v4, %v1820_v53  ;;  %v1056_v6 = vmul.f32 0.0, %v908_v46  ;;  %v9571_v58 = vrot.slane %v6793_v45, 7  ;;  %v9572_v54 = vrot.slane %v7142_v26, 1 }
 0x16a   : > { %5565 = vmatmul.mubr.bf16.gmra.mxu0 %v1821_v16  ;;  %v7288_v2 = vsel %vm1355_vm1, %v1393_v1, %v1395_v0  ;;  %v1397_v5 = vrot.slane %v7239_v12, 1  ;;  %v7291_v4 = vpack.c.bf16 %v1050_v60, %v901_v61  ;;  %v1695_v44 = vrot.slane %v9364_v62, 7 }
 0x16b   : > { %v1672_v30 = vsel %vm1508_vm2, %v9571_v58, %v1671_v34  ;;  %v7285_v21 = vsel %vm1355_vm1, %v9572_v54, %v1393_v1  ;;  %9574 = vst [vmem:[#allocation51_spill] sm:$0xff] %v7288_v2  ;;  %v7296_v53 = vpack.c.bf16 %v904_v56, %v903_v27  ;;  %v9366_v33 = vshrl.u32 %v7288_v2, 16 }
 0x16c   : > { %9573 = vst [vmem:[#allocation50_spill] sm:$0xff] %v7285_v21  ;;  %2287 = vmatmul.mubr.bf16.gmra.mxu1 %v1672_v30  ;;  %v9365_v13 = vshrl.u32 %v7285_v21, 16  ;;  %v9368_v34 = vshll.u32 %v7285_v21, 16  ;;  %v1689_v46 = vrot.slane %v6884_v32, 7  ;;  %v7301_v1 = vpack.c.bf16 %v1056_v6, %v907_v19 }
 0x16d   : > { %v7303_v16 = vpack.c.bf16 %v906_v52, %v1053_v17  ;;  %v1698_v60 = vor.u32 %v9363_v39, %v1695_v44  ;;  %v9575_v58 = vrot.slane %v6956_v3, 1  ;;  %v9576_v56 = vrot.slane %v7062_v25, 1 }
 0x16e   : > { %v9577_v54 = vrot.slane %v7086_v40, 1  ;;  %v1836_v19 = vrot.slane %v9365_v13, 7  ;;  %v1399_v52 = vrot.slane %v7291_v4, 1  ;;  %v1855_v39 = vrot.slane %v9366_v33, 7 }
 0x16f   : > { %v1214_v27 = vor.u32 %v6995_v48, %v9575_v58  ;;  %v7314_v30 = vor.u32 %v7065_v51, %v9576_v56  ;;  %v1699_v17 = vsel %vm1508_vm2, %v1676_v11, %v1698_v60  ;;  %v1690_v58 = vor.u32 %v1689_v46, %v6867_v7 }
 0x170   : > { %v1222_v6 = vor.u32 %v7154_v9, %v9577_v54  ;;  %v1401_v62 = vrot.slane %v7296_v53, 1  ;;  %2294 = vmatprep.mubr.bf16.mxu1 %v1699_v17  ;;  %v1839_v56 = vor.u32 %v9368_v34, %v1836_v19  ;;  %v9578_v54 = vrot.slane %v6956_v3, 1 }
 0x171   : > { %v7336_v61 = vsel %vm1355_vm1, %v1395_v0, %v1397_v5  ;;  %v1403_v60 = vrot.slane %v7303_v16, 1  ;;  %v9580_v33 = vshll.u32 %v7288_v2, 16  ;;  %v1691_v21 = vsel %vm1508_vm2, %v1670_v23, %v1690_v58 }
 0x172   : > { %v7333_v13 = vsel %vm1103_vm3, %v7011_v63, %v9578_v54  ;;  %9579 = vst [vmem:[#allocation52_spill] sm:$0xff] %v7336_v61  ;;  %v1840_v34 = vsel %vm1508_vm2, %v1817_v50, %v1839_v56  ;;  %v9372_v63 = vshrl.u32 %v7336_v61, 16  ;;  %v9375_v11 = vshll.u32 %v7336_v61, 16 }
 0x173   : > { %v1858_v7 = vor.u32 %v9580_v33, %v1855_v39  ;;  %v9373_v17 = vshrl.u32 %v7333_v13, 16  ;;  %v9374_v32 = vshll.u32 %v7333_v13, 16  ;;  %5568 = vmatprep.mubr.bf16.mxu0 %v1840_v34  ;;  %v7352_v33 = vsel %vm1355_vm1, %v1397_v5, %v1399_v52 }
 0x174   : > { %2295 = vmatmul.mubr.bf16.gmra.mxu1 %v1691_v21  ;;  %9581 = vst [vmem:[#allocation53_spill] sm:$0xff] %v7352_v33  ;;  %v1874_v50 = vrot.slane %v9372_v63, 7  ;;  %v9378_v23 = vshrl.u32 %v7352_v33, 16  ;;  %v1708_v34 = vrot.slane %v6965_v29, 7  ;;  %v9582_v21 = vrot.slane %v7086_v40, 1 }
 0x175   : > { %v1859_v0 = vsel %vm1508_vm2, %v1836_v19, %v1858_v7  ;;  %v1714_v54 = vrot.slane %v9373_v17, 7  ;;  %v7367_v5 = vsel %vm1355_vm1, %v1399_v52, %v1401_v62  ;;  %v7370_v56 = vsel %vm1355_vm1, %v1401_v62, %v1403_v60 }
 0x176   : > { %5569 = vmatmul.mubr.bf16.gmra.mxu0 %v1859_v0  ;;  %v7364_v19 = vsel %vm1103_vm3, %v1214_v27, %v9582_v21  ;;  %9583 = vst [vmem:[#allocation54_spill] sm:$0xff] %v7367_v5  ;;  %9584 = vst [vmem:[#allocation55_spill] sm:$0xff] %v7370_v56  ;;  %v1877_v0 = vor.u32 %v9375_v11, %v1874_v50  ;;  %v1893_v63 = vrot.slane %v9378_v23, 7  ;;  %v9381_v52 = vshrl.u32 %v7367_v5, 16 }
 0x177   : > { %v1717_v7 = vor.u32 %v9374_v32, %v1714_v54  ;;  %v1709_v17 = vor.u32 %v1708_v34, %v6920_v22  ;;  %v9382_v32 = vshrl.u32 %v7364_v19, 16  ;;  %v9383_v21 = vshll.u32 %v7367_v5, 16 }
 0x178   : > { %v1878_v62 = vsel %vm1508_vm2, %v1855_v39, %v1877_v0  ;;  %v9585_v11 = vshll.u32 %v7352_v33, 16  ;;  %v9385_v27 = vshll.u32 %v7370_v56, 16  ;;  %v9586_v0 = vshll.u32 %v7364_v19, 16 }
 0x179   : > { %v1718_v58 = vsel %vm1508_vm2, %v1695_v44, %v1717_v7  ;;  %v1710_v23 = vsel %vm1508_vm2, %v1689_v46, %v1709_v17  ;;  %v1733_v2 = vrot.slane %v9382_v32, 7  ;;  %5572 = vmatprep.mubr.bf16.mxu0 %v1878_v62  ;;  %v1912_v44 = vrot.slane %v9381_v52, 7 }
 0x17a   : > { %2302 = vmatprep.mubr.bf16.mxu1 %v1718_v58  ;;  %v1896_v61 = vor.u32 %v9585_v11, %v1893_v63  ;;  %v9384_v7 = vshrl.u32 %v7370_v56, 16  ;;  %v9388_v58 = vrot.slane %v6995_v48, 7  ;;  %v9587_v46 = vrot.slane %v7062_v25, 1 }
 0x17b   : > { %v1736_v11 = vor.u32 %v9586_v0, %v1733_v2  ;;  %v9588_v62 = vrot.slane %v7301_v1, 1  ;;  %v7407_v32 = vshll.u32 %v7107_v20, 16  ;;  %v7455_v56 = vshrl.u32 %v7088_v35, 16 }
 0x17c   : > { %v1897_v39 = vsel %vm1508_vm2, %v1874_v50, %v1896_v61  ;;  %v7399_v17 = vsel %vm1103_vm3, %v1222_v6, %v9587_v46  ;;  %2303 = vmatmul.mubr.bf16.gmra.mxu1 %v1710_v23  ;;  %v1915_v61 = vor.u32 %v9383_v21, %v1912_v44  ;;  %v1931_v50 = vrot.slane %v9384_v7, 7 }
 0x17d   : > { %v7404_v52 = vsel %vm1355_vm1, %v1403_v60, %v9588_v62  ;;  %9589 = vst [vmem:[#allocation56_spill] sm:$0xff] %v7407_v32  ;;  %v9386_v0 = vshrl.u32 %v7399_v17, 16  ;;  %v7415_v6 = vshrl.u32 %v7107_v20, 16  ;;  %v1737_v46 = vsel %vm1508_vm2, %v1714_v54, %v1736_v11  ;;  %v7433_v54 = vld [vmem:[%s9241_s4 + $0x238] sm:$0xff]  }
 0x17e   : > { %5573 = vmatmul.mubr.bf16.gmra.mxu0 %v1897_v39  ;;  %v9396_v60 = vshll.u32 %v7399_v17, 16  ;;  %v9387_v62 = vshrl.u32 %v7404_v52, 16  ;;  %2310 = vmatprep.mubr.bf16.mxu1 %v1737_v46  ;;  %v1916_v23 = vsel %vm1508_vm2, %v1893_v63, %v1915_v61  ;;  %v1934_v21 = vor.u32 %v9385_v27, %v1931_v50 }
 0x17f   : > { %9590 = vst [vmem:[#allocation57_spill] sm:$0xff] %v7415_v6  ;;  %v1728_v7 = vor.u32 %v9388_v58, %v6956_v3  ;;  %v7428_v20 = vrot.slane %v9386_v0, 7  ;;  %5576 = vmatprep.mubr.bf16.mxu0 %v1916_v23  ;;  %v9591_v11 = vrot.slane %v6411_v59, 1  ;;  %v9592_v61 = vrot.slane %v7301_v1, 1  ;;  %5648 = vmatprep.subr.bf16.mxu0 %v7433_v54 }
 0x180   : > { %v1950_v63 = vrot.slane %v9387_v62, 7  ;;  %v1115_v27 = vsel %vm1103_vm3, %v6492_v55, %v6430_v8  ;;  %v7447_v0 = vshll.u32 %v7088_v35, 16  ;;  %v1242_v39 = vrot.slane %v7407_v32, 1 }
 0x181   : > { %v1408_v46 = vsel %vm1355_vm1, %v9592_v61, %v9591_v11  ;;  %v1755_v23 = vor.u32 %v9396_v60, %v7428_v20  ;;  %v1935_v11 = vsel %vm1508_vm2, %v1912_v44, %v1934_v21  ;;  %v9594_v8 = vshll.u32 %v7404_v52, 16 }
 0x182   : > { %9593 = vst [vmem:[#allocation58_spill] sm:$0xff] %v7447_v0  ;;  %v1967_v62 = vshrl.u32 %v1408_v46, 16  ;;  %v1970_v58 = vshll.u32 %v1408_v46, 16  ;;  %v2649_v33 = vshrl.u32 %v1115_v27, 16  ;;  %v2652_v3 = vshll.u32 %v1115_v27, 16 }
 0x183   : > { %v1953_v55 = vor.u32 %v9594_v8, %v1950_v63  ;;  %v1729_v60 = vsel %vm1508_vm2, %v1708_v34, %v1728_v7  ;;  %v1756_v46 = vsel %vm1508_vm2, %v1733_v2, %v1755_v23  ;;  %v2657_v29 = vshll.u32 %v6479_v47, 16 }
 0x184   : > { %v3675_v61 = vrot.slane %v1967_v62, 3  ;;  %v3676_v5 = vrot.slane %v1970_v58, 4  ;;  %2311 = vmatmul.mubr.bf16.gmra.mxu1 %v1729_v60  ;;  %v1969_v35 = vrot.slane %v1967_v62, 7  ;;  %v1746_v21 = vrot.slane %v7154_v9, 7 }
 0x185   : > { %v1954_v22 = vsel %vm1508_vm2, %v1931_v50, %v1953_v55  ;;  %v1234_v44 = vrot.slane %v7447_v0, 1  ;;  %v7469_v8 = vshll.u32 %v7142_v26, 16  ;;  %2318 = vmatprep.mubr.bf16.mxu1 %v1756_v46  ;;  %v9596_v34 = vshrl.u32 %v6479_v47, 16 }
 0x186   : > { %v7464_v10 = vor.u32 %v3676_v5, %v3675_v61  ;;  %5577 = vmatmul.mubr.bf16.gmra.mxu0 %v1935_v11  ;;  %v2659_v27 = vrot.slane %v2657_v29, 4  ;;  %v2644_v7 = vrot.slane %v6443_v18, 3  ;;  %v2651_v50 = vrot.slane %v2649_v33, 3 }
 0x187   : > { %9595 = vst [vmem:[#allocation59_spill] sm:$0xff] %v7469_v8  ;;  %v2656_v2 = vrot.slane %v9596_v34, 3  ;;  %5580 = vmatprep.mubr.bf16.mxu0 %v1954_v22  ;;  %v2654_v60 = vrot.slane %v2652_v3, 4  ;;  %v7476_v5 = vsel %vm1103_vm3, %v7314_v30, %v1234_v44  ;;  %v2643_v62 = vor.u32 %v6481_v49, %v6475_v43 }
 0x188   : > { %v1747_v23 = vor.u32 %v1746_v21, %v7086_v40  ;;  %v9406_v11 = vshrl.u32 %v7476_v5, 16  ;;  %v9405_v47 = vshll.u32 %v7476_v5, 16  ;;  %v7484_v29 = vor.u32 %v6502_v15, %v2644_v7 }
 0x189   : > { %v1972_v18 = vor.u32 %v1970_v58, %v1969_v35  ;;  %v1238_v22 = vor.u32 %v7455_v56, %v1234_v44  ;;  %v1246_v3 = vor.u32 %v7415_v6, %v1242_v39  ;;  %v2660_v30 = vor.u32 %v2659_v27, %v2656_v2 }
 0x18a   : > { %v1771_v33 = vrot.slane %v9406_v11, 7  ;;  %v2647_v43 = vsel %vm2640_vm4, %v2643_v62, %v7484_v29  ;;  %v1250_v49 = vrot.slane %v7469_v8, 1  ;;  %v2655_v55 = vor.u32 %v2654_v60, %v2651_v50 }
 0x18b   : > { %v7494_v61 = vsel %vm1103_vm3, %v1238_v22, %v1242_v39  ;;  %v9597_v15 = vrot.slane %v6995_v48, 7  ;;  %v1765_v35 = vrot.slane %v7065_v51, 7  ;;  %v7504_v34 = vshll.u32 %v7172_v36, 16 }
 0x18c   : > { %v1774_v46 = vor.u32 %v9405_v47, %v1771_v33  ;;  %v9402_v44 = vshrl.u32 %v7494_v61, 16  ;;  %v7507_v2 = vshrl.u32 %v7142_v26, 16  ;;  %v1973_v39 = vsel %vm1508_vm2, %v1950_v63, %v1972_v18 }
 0x18d   : > { %v1748_v58 = vsel %vm1508_vm2, %v9597_v15, %v1747_v23  ;;  %9598 = vst [vmem:[#allocation60_spill] sm:$0xff] %v7504_v34  ;;  %v9401_v27 = vshll.u32 %v7494_v61, 16  ;;  %v2661_v7 = vsel %vm2640_vm4, %v2655_v55, %v2660_v30  ;;  %v7517_v62 = vsel %vm1103_vm3, %v1246_v3, %v1250_v49 }
 0x18e   : > { %9599 = vst [vmem:[#allocation61_spill] sm:$0xff] %v7507_v2  ;;  %2319 = vmatmul.mubr.bf16.gmra.mxu1 %v1748_v58  ;;  %5581 = vmatmul.mubr.bf16.gmra.mxu0 %v1973_v39  ;;  %v1775_v50 = vsel %vm1508_vm2, %v7428_v20, %v1774_v46  ;;  %v1790_v60 = vrot.slane %v9402_v44, 7  ;;  %v9600_v26 = vshrl.u32 %v6487_v41, 16  ;;  %v9601_v23 = vshll.u32 %v6487_v41, 16 }
 0x18f   : > { %3200 = vmatprep.mubr.bf16.mxu0 %v2661_v7  ;;  %2326 = vmatprep.mubr.bf16.mxu1 %v1775_v50  ;;  %v1766_v22 = vor.u32 %v1765_v35, %v7062_v25  ;;  %v9404_v20 = vshrl.u32 %v7517_v62, 16  ;;  %v1258_v15 = vrot.slane %v7504_v34, 1  ;;  %v1254_v3 = vor.u32 %v7507_v2, %v1250_v49  ;;  %v9603_v7 = vld [vmem:[#allocation12_spill] sm:$0xff] }
 0x190   : > { %v2680_v63 = vrot.slane %v9600_v26, 3  ;;  %v2681_v18 = vrot.slane %v9601_v23, 4  ;;  %v1793_v55 = vor.u32 %v9401_v27, %v1790_v60  ;;  %v7530_v58 = vshrl.u32 %v7172_v36, 16  ;;  %v9604_v23 = vld [vmem:[#allocation9_spill] sm:$0xff] }
 0x191   : > { %v1767_v39 = vsel %vm1508_vm2, %v1746_v21, %v1766_v22  ;;  %v2676_v41 = vrot.slane %v9603_v7, 3  ;;  %v1784_v50 = vrot.slane %v7455_v56, 7  ;;  %v2677_v27 = vrot.slane %v9604_v23, 4 }
 0x192   : > { %9602 = vst [vmem:[#allocation62_spill] sm:$0xff] %v7530_v58  ;;  %v2682_v46 = vor.u32 %v2681_v18, %v2680_v63  ;;  %v1794_v26 = vsel %vm1508_vm2, %v1771_v33, %v1793_v55  ;;  %v1809_v44 = vrot.slane %v9404_v20, 7  ;;  %v9403_v49 = vshll.u32 %v7517_v62, 16  ;;  %v9605_v63 = vld [vmem:[#allocation20_spill] sm:$0xff]  ;;  %v9608_v20 = vld [vmem:[#allocation13_spill] sm:$0xff] }
 0x193   : > { %v9606_v21 = vshrl.u32 %v9605_v63, 16  ;;  %v9607_v22 = vshll.u32 %v9605_v63, 16  ;;  %v7549_v33 = vshll.u32 %v7196_v37, 16  ;;  %v2678_v23 = vor.u32 %v2677_v27, %v2676_v41  ;;  %v9609_v41 = vld [vmem:[#allocation11_spill] sm:$0xff] }
 0x194   : > { %v2683_v36 = vsel %vm2640_vm4, %v2660_v30, %v2682_v46  ;;  %v5945_v30 = vld [vmem:[%s9241_s4 + $0x230] sm:$0xff]   ;;  %v1812_v55 = vor.u32 %v9403_v49, %v1809_v44  ;;  %v2688_v47 = vrot.slane %v9608_v20, 3 }
 0x195   : > { %v2692_v18 = vrot.slane %v9606_v21, 3  ;;  %v2693_v7 = vrot.slane %v9607_v22, 4  ;;  %v7565_v21 = vshrl.u32 %v7196_v37, 16  ;;  %v2679_v22 = vsel %vm2640_vm4, %v7484_v29, %v2678_v23  ;;  %v9610_v29 = vld [vmem:[#allocation21_spill] sm:$0xff] }
 0x196   : > { %2327 = vmatmul.mubr.bf16.gmra.mxu1 %v1767_v39  ;;  %3201 = vmatmul.mubr.bf16.vlgmr.msra.gmra.mxu0 %v2647_v43  ;;  %v7546_v39 = vsel %vm1103_vm3, %v1254_v3, %v1258_v15  ;;  %v1785_v43 = vor.u32 %v1784_v50, %v7447_v0  ;;  %v1262_v3 = vor.u32 %v7530_v58, %v1258_v15  ;;  %v1803_v15 = vrot.slane %v7415_v6, 7 }
 0x197   : > { %2334 = vmatprep.mubr.bf16.mxu1 %v1794_v26  ;;  %3208 = vmatprep.mubr.bf16.mxu0 %v2683_v36  ;;  %v9407_v26 = vshrl.u32 %v7546_v39, 16  ;;  %v2694_v63 = vor.u32 %v2693_v7, %v2692_v18  ;;  %v7561_v36 = vshll.u32 %v7239_v12, 16  ;;  %v1813_v27 = vsel %vm1508_vm2, %v1790_v60, %v1812_v55 }
 0x198   : > { %5649 = vmatpush3.bf16.msra.mxu0 %v7433_v54  ;;  %v1266_v54 = vrot.slane %v7549_v33, 1  ;;  %v1786_v49 = vsel %vm1508_vm2, %v1765_v35, %v1785_v43  ;;  %v2689_v18 = vrot.slane %v9609_v41, 4  ;;  %v9409_v37 = vshll.u32 %v7546_v39, 16 }
 0x199   : > { %5650 = vmatprep.subr.bf16.mxu0 %v5945_v30  ;;  %v1828_v7 = vrot.slane %v9407_v26, 7  ;;  %v9611_v35 = vshrl.u32 %v9610_v29, 16  ;;  %v9612_v20 = vshll.u32 %v9610_v29, 16  ;;  %v1804_v60 = vor.u32 %v1803_v15, %v7407_v32 }
 0x19a   : > { %v2690_v41 = vor.u32 %v2689_v18, %v2688_v47  ;;  %v7592_v29 = vshrl.u32 %v7239_v12, 16  ;;  %v1822_v32 = vrot.slane %v7507_v2, 7 }
 0x19b   : > { %v2704_v43 = vrot.slane %v9611_v35, 3  ;;  %v2705_v11 = vrot.slane %v9612_v20, 4  ;;  %v1831_v55 = vor.u32 %v9409_v37, %v1828_v7  ;;  %v9613_v20 = vld [vmem:[#allocation18_spill] sm:$0xff] }
 0x19c   : > { %5651 = vmatpush3.bf16.msra.mxu0 %v5945_v30  ;;  %v2695_v30 = vsel %vm2640_vm4, %v2682_v46, %v2694_v63  ;;  %v1274_v46 = vrot.slane %v7561_v36, 1  ;;  %v2700_v26 = vrot.slane %v9613_v20, 3 }
 0x19d   : > { %v2706_v35 = vor.u32 %v2705_v11, %v2704_v43  ;;  %v1832_v37 = vsel %vm1508_vm2, %v1809_v44, %v1831_v55  ;;  %v7615_v55 = vshll.u32 %v7291_v4, 16 }
 0x19e   : > { %2335 = vmatmul.mubr.bf16.gmra.mxu1 %v1786_v49  ;;  %3209 = vmatmul.mubr.bf16.gmra.mxu0 %v2679_v22  ;;  %v7583_v49 = vsel %vm1103_vm3, %v1262_v3, %v1266_v54  ;;  %v2691_v3 = vsel %vm2640_vm4, %v2678_v23, %v2690_v41  ;;  %v9614_v22 = vld [vmem:[#allocation16_spill] sm:$0xff] }
 0x19f   : > { %2342 = vmatprep.mubr.bf16.mxu1 %v1813_v27  ;;  %3216 = vmatprep.mubr.bf16.mxu0 %v2695_v30  ;;  %v1270_v27 = vor.u32 %v7565_v21, %v1266_v54  ;;  %v1805_v30 = vsel %vm1508_vm2, %v1784_v50, %v1804_v60  ;;  %v2701_v6 = vrot.slane %v9614_v22, 4  ;;  %v9615_v54 = vshrl.u32 %v7583_v49, 16  ;;  %v9617_v50 = vld [vmem:[#allocation27_spill] sm:$0xff]  ;;  %9620 = vst [vmem:[#allocation9_spill] sm:$0xff] %v7615_v55 }
 0x1a0   : > { %v9412_v11 = vshll.u32 %v7583_v49, 16  ;;  %v7604_v12 = vsel %vm2640_vm4, %v2694_v63, %v2706_v35  ;;  %v9618_v23 = vshrl.u32 %v9617_v50, 16  ;;  %v9619_v43 = vshll.u32 %v9617_v50, 16  ;;  %v9622_v50 = vld [vmem:[#allocation15_spill] sm:$0xff] }
 0x1a1   : > { %v1847_v47 = vrot.slane %v9615_v54, 7  ;;  %9616 = vst [vmem:[#allocation12_spill] sm:$0xff] %v7604_v12  ;;  %v7611_v44 = vsel %vm1103_vm3, %v1270_v27, %v1274_v46  ;;  %v1823_v22 = vor.u32 %v1822_v32, %v7469_v8  ;;  %v7623_v54 = vshll.u32 %v7296_v53, 16 }
 0x1a2   : > { %v2716_v18 = vrot.slane %v9618_v23, 3  ;;  %v2717_v60 = vrot.slane %v9619_v43, 4  ;;  %v7626_v27 = vshrl.u32 %v7291_v4, 16  ;;  %v2712_v23 = vrot.slane %v9622_v50, 3 }
 0x1a3   : > { %v1850_v63 = vor.u32 %v9412_v11, %v1847_v47  ;;  %9621 = vst [vmem:[#allocation20_spill] sm:$0xff] %v7623_v54  ;;  %v1824_v43 = vsel %vm1508_vm2, %v1803_v15, %v1823_v22  ;;  %v1282_v11 = vrot.slane %v7615_v55, 1 }
 0x1a4   : > { %v2718_v20 = vor.u32 %v2717_v60, %v2716_v18  ;;  %v9625_v18 = vshrl.u32 %v7611_v44, 16  ;;  %v9420_v60 = vshll.u32 %v7611_v44, 16 }
 0x1a6   : > { %2343 = vmatmul.mubr.bf16.gmra.mxu1 %v1805_v30  ;;  %3217 = vmatmul.mubr.bf16.gmra.mxu0 %v2691_v3  ;;  %v2702_v3 = vor.u32 %v2701_v6, %v2700_v26  ;;  %v1278_v30 = vor.u32 %v7592_v29, %v1274_v46  ;;  %v1841_v26 = vrot.slane %v7530_v58, 7  ;;  %v1851_v46 = vsel %vm1508_vm2, %v1828_v7, %v1850_v63  ;;  %v5950_v63 = vld [vmem:[%s9241_s4 + $0x228] sm:$0xff]  }
 0x1a7   : > { %2350 = vmatprep.mubr.bf16.mxu1 %v1832_v37  ;;  %3224 = vmatprep.mubr.bf16.mxu0 %v7604_v12  ;;  %v9623_v12 = vld [vmem:[#allocation14_spill] sm:$0xff]  ;;  %v1866_v4 = vrot.slane %v9625_v18, 7  ;;  %v7642_v15 = vsel %vm2640_vm4, %v2706_v35, %v2718_v20  ;;  %v7657_v35 = vshrl.u32 %v7296_v53, 16  ;;  %v9632_v53 = vshrl.u32 %v7333_v13, 16 }
 0x1a8   : > { %v2713_v6 = vrot.slane %v9623_v12, 4  ;;  %v7634_v37 = vsel %vm2640_vm4, %v2690_v41, %v2702_v3  ;;  %9626 = vst [vmem:[#allocation11_spill] sm:$0xff] %v7642_v15  ;;  %v9627_v12 = vld [vmem:[#allocation31_spill] sm:$0xff]  ;;  %v1842_v7 = vor.u32 %v1841_v26, %v7504_v34  ;;  %5652 = vmatprep.subr.bf16.mxu0 %v5950_v63 }
 0x1a9   : > { %9624 = vst [vmem:[#allocation13_spill] sm:$0xff] %v7634_v37  ;;  %v9628_v22 = vshrl.u32 %v9627_v12, 16  ;;  %v9629_v41 = vshll.u32 %v9627_v12, 16  ;;  %v1290_v12 = vrot.slane %v7623_v54, 1  ;;  %v9631_v34 = vld [vmem:[#allocation23_spill] sm:$0xff]  ;;  %v2800_v0 = vrot.slane %v9632_v53, 3  ;;  %5653 = vmatpush3.bf16.msra.mxu0 %v5950_v63 }
 0x1aa   : > { %v2725_v8 = vrot.slane %v9631_v34, 4 }
 0x1ab   : > { %v2728_v50 = vrot.slane %v9628_v22, 3  ;;  %v2729_v58 = vrot.slane %v9629_v41, 4  ;;  %v1286_v41 = vor.u32 %v7626_v27, %v1282_v11 }
 0x1ad   : > { %v2730_v22 = vor.u32 %v2729_v58, %v2728_v50  ;;  %v1843_v58 = vsel %vm1508_vm2, %v1822_v32, %v1842_v7 }
 0x1ae   : > { %2351 = vmatmul.mubr.bf16.gmra.mxu1 %v1824_v43  ;;  %3225 = vmatmul.mubr.bf16.gmra.mxu0 %v7634_v37  ;;  %v7649_v43 = vsel %vm1103_vm3, %v1278_v30, %v1282_v11  ;;  %v2714_v30 = vor.u32 %v2713_v6, %v2712_v23  ;;  %v9635_v11 = vshll.u32 %v7333_v13, 16  ;;  %v9636_v6 = vld [vmem:[#allocation37_spill] sm:$0xff] }
 0x1af   : > { %2358 = vmatprep.mubr.bf16.mxu1 %v1851_v46  ;;  %3232 = vmatprep.mubr.bf16.mxu0 %v7642_v15  ;;  %v1869_v46 = vor.u32 %v9420_v60, %v1866_v4  ;;  %v9630_v15 = vld [vmem:[#allocation25_spill] sm:$0xff]  ;;  %v7670_v60 = vshll.u32 %v7303_v16, 16  ;;  %v9638_v53 = vshrl.u32 %v7649_v43, 16  ;;  %v9421_v2 = vshll.u32 %v7649_v43, 16 }
 0x1b0   : > { %v2724_v37 = vrot.slane %v9630_v15, 3  ;;  %v7673_v18 = vsel %vm2640_vm4, %v2702_v3, %v2714_v30  ;;  %v2801_v23 = vrot.slane %v9635_v11, 4  ;;  %v9637_v15 = vshrl.u32 %v9636_v6, 16 }
 0x1b1   : > { %9633 = vst [vmem:[#allocation21_spill] sm:$0xff] %v7670_v60  ;;  %9634 = vst [vmem:[#allocation18_spill] sm:$0xff] %v7673_v18  ;;  %v1870_v34 = vsel %vm1508_vm2, %v1847_v47, %v1869_v46  ;;  %v7683_v63 = vrot.slane %v9638_v53, 7  ;;  %v7688_v3 = vsel %vm2640_vm4, %v2718_v20, %v2730_v22  ;;  %v9640_v32 = vshll.u32 %v9636_v6, 16 }
 0x1b2   : > { %v2740_v50 = vrot.slane %v9637_v15, 3  ;;  %9639 = vst [vmem:[#allocation16_spill] sm:$0xff] %v7688_v3  ;;  %v7693_v47 = vsel %vm1103_vm3, %v1286_v41, %v1290_v12  ;;  %v7695_v7 = vor.u32 %v2801_v23, %v2800_v0  ;;  %v2726_v46 = vor.u32 %v2725_v8, %v2724_v37 }
 0x1b3   : > { %v2741_v13 = vrot.slane %v9640_v32, 4  ;;  %v1294_v15 = vor.u32 %v7657_v35, %v1290_v12  ;;  %v1888_v20 = vor.u32 %v9421_v2, %v7683_v63  ;;  %v9642_v41 = vshrl.u32 %v7364_v19, 16 }
 0x1b4   : > { %v1298_v0 = vrot.slane %v7670_v60, 1  ;;  %v9643_v8 = vshll.u32 %v7364_v19, 16  ;;  %v7712_v53 = vsel %vm2640_vm4, %v2714_v30, %v2726_v46  ;;  %v2736_v32 = vrot.slane %v6655_v24, 3 }
 0x1b5   : > { %v2812_v6 = vrot.slane %v9642_v41, 3  ;;  %v2742_v23 = vor.u32 %v2741_v13, %v2740_v50  ;;  %9644 = vst [vmem:[#allocation27_spill] sm:$0xff] %v7712_v53  ;;  %v1889_v19 = vsel %vm1508_vm2, %v1866_v4, %v1888_v20  ;;  %v9647_v30 = vshrl.u32 %v7693_v47, 16 }
 0x1b6   : > { %2359 = vmatmul.mubr.bf16.gmra.mxu1 %v1843_v58  ;;  %3233 = vmatmul.mubr.bf16.gmra.mxu0 %v7673_v18  ;;  %v9641_v58 = vrot.slane %v7565_v21, 7  ;;  %v2813_v37 = vrot.slane %v9643_v8, 4  ;;  %v9646_v18 = vshrl.u32 %v7399_v17, 16  ;;  %v9648_v24 = vshll.u32 %v7399_v17, 16 }
 0x1b7   : > { %2366 = vmatprep.mubr.bf16.mxu1 %v1870_v34  ;;  %3240 = vmatprep.mubr.bf16.mxu0 %v7688_v3  ;;  %v9424_v34 = vrot.slane %v7592_v29, 7  ;;  %v9425_v3 = vshll.u32 %v7693_v47, 16  ;;  %v7724_v13 = vrot.slane %v9647_v30, 7 }
 0x1b8   : > { %v1861_v11 = vor.u32 %v9641_v58, %v7549_v33  ;;  %v9645_v58 = vld [vmem:[#allocation24_spill] sm:$0xff]  ;;  %v2814_v41 = vor.u32 %v2813_v37, %v2812_v6  ;;  %v2824_v50 = vrot.slane %v9646_v18, 3  ;;  %v7733_v6 = vsel %vm2640_vm4, %v2730_v22, %v2742_v23  ;;  %v9650_v18 = vld [vmem:[#allocation41_spill] sm:$0xff] }
 0x1b9   : > { %v2737_v2 = vrot.slane %v9645_v58, 4  ;;  %9649 = vst [vmem:[#allocation15_spill] sm:$0xff] %v7733_v6  ;;  %v9651_v8 = vshrl.u32 %v9650_v18, 16  ;;  %v9652_v4 = vshll.u32 %v9650_v18, 16  ;;  %v7748_v58 = vshrl.u32 %v7303_v16, 16 }
 0x1ba   : > { %v1862_v12 = vsel %vm1508_vm2, %v1841_v26, %v1861_v11  ;;  %v7727_v26 = vsel %vm1103_vm3, %v1294_v15, %v1298_v0  ;;  %v2825_v11 = vrot.slane %v9648_v24, 4  ;;  %v9654_v15 = vld [vmem:[#allocation6_spill] sm:$0xff]  ;;  %v1880_v24 = vor.u32 %v9424_v34, %v7561_v36 }
 0x1bb   : > { %v2752_v37 = vrot.slane %v9651_v8, 3  ;;  %v2753_v20 = vrot.slane %v9652_v4, 4  ;;  %v7745_v17 = vadd.f32 %v7187_v28, %v9654_v15  ;;  %v2738_v30 = vor.u32 %v2737_v2, %v2736_v32 }
 0x1bc   : > { %v2826_v22 = vor.u32 %v2825_v11, %v2824_v50  ;;  %v1907_v28 = vor.u32 %v9425_v3, %v7724_v13  ;;  %v9656_v16 = vshrl.u32 %v7476_v5, 16  ;;  %v9657_v50 = vshll.u32 %v7476_v5, 16  ;;  %v5954_v3 = vld [vmem:[%s9241_s4 + $0x220] sm:$0xff]  }
 0x1bd   : > { %v7767_v2 = vshll.u32 %v7301_v1, 16  ;;  %v2754_v32 = vor.u32 %v2753_v20, %v2752_v37  ;;  %v2748_v15 = vrot.slane %v6829_v31, 3  ;;  %v2749_v34 = vrot.slane %v6761_v42, 4  ;;  %5654 = vmatprep.subr.bf16.mxu0 %v5954_v3 }
 0x1be   : > { %2367 = vmatmul.mubr.bf16.gmra.mxu1 %v1862_v12  ;;  %3241 = vmatmul.mubr.bf16.gmra.mxu0 %v7712_v53  ;;  %v7741_v12 = vsel %vm2640_vm4, %v7695_v7, %v2814_v41  ;;  %v7760_v8 = vsel %vm2640_vm4, %v2814_v41, %v2826_v22  ;;  %v2836_v4 = vrot.slane %v9656_v16, 3  ;;  %v2837_v11 = vrot.slane %v9657_v50, 4 }
 0x1bf   : > { %2374 = vmatprep.mubr.bf16.mxu1 %v1889_v19  ;;  %9653 = vst [vmem:[#allocation14_spill] sm:$0xff] %v7741_v12  ;;  %3248 = vmatprep.mubr.bf16.mxu0 %v7733_v6  ;;  %9655 = vst [vmem:[#allocation31_spill] sm:$0xff] %v7760_v8  ;;  %v1302_v41 = vor.u32 %v7748_v58, %v1298_v0  ;;  %v9659_v19 = vshrl.u32 %v7133_v38, 16  ;;  %v9660_v5 = vshll.u32 %v7133_v38, 16  ;;  %v9662_v31 = vrot.slane %v7565_v21, 7 }
 0x1c0   : > { %9658 = vst [vmem:[#allocation25_spill] sm:$0xff] %v7767_v2  ;;  %v2838_v18 = vor.u32 %v2837_v11, %v2836_v4  ;;  %v7780_v6 = vsel %vm2640_vm4, %v2726_v46, %v2738_v30  ;;  %v9428_v37 = vrot.slane %v7626_v27, 7  ;;  %v9427_v20 = vshll.u32 %v7727_v26, 16  ;;  %5655 = vmatpush3.bf16.msra.mxu0 %v5954_v3 }
 0x1c1   : > { %v2764_v16 = vrot.slane %v9659_v19, 3  ;;  %v2765_v50 = vrot.slane %v9660_v5, 4  ;;  %9661 = vst [vmem:[#allocation23_spill] sm:$0xff] %v7780_v6  ;;  %v1881_v42 = vsel %vm1508_vm2, %v9662_v31, %v1880_v24  ;;  %v1908_v0 = vsel %vm1508_vm2, %v7683_v63, %v1907_v28 }
 0x1c2   : > { %v9663_v38 = vshrl.u32 %v7727_v26, 16  ;;  %v7794_v46 = vsel %vm2640_vm4, %v2826_v22, %v2838_v18  ;;  %v9665_v4 = vshrl.u32 %v7494_v61, 16  ;;  %v1306_v24 = vrot.slane %v7767_v2, 1  ;;  %v5955_v22 = vld [vmem:[%s9241_s4 + $0x218] sm:$0xff]  }
 0x1c3   : > { %9664 = vst [vmem:[#allocation37_spill] sm:$0xff] %v7794_v46  ;;  %v7801_v5 = vsel %vm2640_vm4, %v2742_v23, %v2754_v32  ;;  %v2750_v63 = vor.u32 %v2749_v34, %v2748_v15  ;;  %v9667_v28 = vshll.u32 %v7494_v61, 16  ;;  %v995_v3 = vmax.f32 %v7745_v17, 0.0  ;;  %5656 = vmatprep.subr.bf16.mxu0 %v5955_v22 }
 0x1c4   : > { %v7791_v19 = vrot.slane %v9663_v38, 7  ;;  %v2848_v11 = vrot.slane %v9665_v4, 3  ;;  %9666 = vst [vmem:[#allocation24_spill] sm:$0xff] %v7801_v5  ;;  %v7813_v38 = vshrl.u32 %v7301_v1, 16  ;;  %v1899_v34 = vor.u32 %v9428_v37, %v7615_v55  ;;  %5657 = vmatpush3.bf16.msra.mxu0 %v5955_v22 }
 0x1c5   : > { %v2849_v31 = vrot.slane %v9667_v28, 4  ;;  %v7822_v15 = vsel %vm1103_vm3, %v1302_v41, %v1306_v24  ;;  %v9670_v17 = vshll.u32 %v7517_v62, 16  ;;  %v7834_v28 = vsel %vm2640_vm4, %v2738_v30, %v2750_v63  ;;  %v5957_v41 = vld [vmem:[%s9241_s4 + $0x210] sm:$0xff]  }
 0x1c6   : > { %2375 = vmatmul.mubr.bf16.gmra.mxu1 %v1881_v42  ;;  %3249 = vmatmul.mubr.bf16.gmra.mxu0 %v7780_v6  ;;  %v7809_v42 = vor.u32 %v2765_v50, %v2764_v16  ;;  %9668 = vst [vmem:[#allocation41_spill] sm:$0xff] %v7813_v38  ;;  %v1926_v61 = vor.u32 %v9427_v20, %v7791_v19  ;;  %v9669_v16 = vshrl.u32 %v7517_v62, 16  ;;  %9672 = vst [vmem:[#allocation6_spill] sm:$0xff] %v7834_v28  ;;  %v9677_v20 = vld [vmem:[#allocation47_spill] sm:$0xff] }
 0x1c7   : > { %2382 = vmatprep.mubr.bf16.mxu1 %v1908_v0  ;;  %3256 = vmatprep.mubr.bf16.mxu0 %v7801_v5  ;;  %v2850_v23 = vor.u32 %v2849_v31, %v2848_v11  ;;  %v2861_v1 = vrot.slane %v9670_v17, 4  ;;  %v9671_v0 = vshll.u32 %v6411_v59, 16  ;;  %v1310_v11 = vor.u32 %v7813_v38, %v1306_v24 }
 0x1c8   : > { %v2860_v50 = vrot.slane %v9669_v16, 3  ;;  %v7844_v62 = vsel %vm2640_vm4, %v2754_v32, %v7809_v42  ;;  %v2760_v22 = vrot.slane %v6793_v45, 3  ;;  %v9675_v16 = vld [vmem:[#allocation28_spill] sm:$0xff]  ;;  %v9676_v24 = vrot.slane %v7592_v29, 7  ;;  %5658 = vmatprep.subr.bf16.mxu0 %v5957_v41 }
 0x1c9   : > { %v7830_v4 = vrot.slane %v9671_v0, 1  ;;  %v7837_v31 = vsel %vm2640_vm4, %v2838_v18, %v2850_v23  ;;  %9674 = vst [vmem:[#allocation64_spill] sm:$0xff] %v7844_v62  ;;  %v2761_v17 = vrot.slane %v9675_v16, 4  ;;  %v9678_v18 = vshrl.u32 %v9677_v20, 16  ;;  %5659 = vmatpush3.bf16.msra.mxu0 %v5957_v41 }
 0x1ca   : > { %9673 = vst [vmem:[#allocation63_spill] sm:$0xff] %v7837_v31  ;;  %v2862_v0 = vor.u32 %v2861_v1, %v2860_v50  ;;  %v1900_v30 = vsel %vm1508_vm2, %v9676_v24, %v1899_v34  ;;  %v9433_v5 = vrot.slane %v7657_v35, 7  ;;  %v9431_v6 = vshrl.u32 %v7822_v15, 16 }
 0x1cb   : > { %v2776_v37 = vrot.slane %v9678_v18, 3  ;;  %v1927_v32 = vsel %vm1508_vm2, %v7724_v13, %v1926_v61  ;;  %v9680_v50 = vshrl.u32 %v7546_v39, 16  ;;  %v9681_v34 = vshll.u32 %v7546_v39, 16  ;;  %v5959_v39 = vld [vmem:[%s9241_s4 + $0x208] sm:$0xff]  }
 0x1cc   : > { %v7858_v45 = vsel %vm2640_vm4, %v2850_v23, %v2862_v0  ;;  %v9682_v24 = vshll.u32 %v9677_v20, 16  ;;  %v9432_v13 = vshll.u32 %v7822_v15, 16  ;;  %v7874_v23 = vsel %vm1103_vm3, %v1310_v11, %v7830_v4  ;;  %5660 = vmatprep.subr.bf16.mxu0 %v5959_v39 }
 0x1cd   : > { %9679 = vst [vmem:[#allocation28_spill] sm:$0xff] %v7858_v45  ;;  %v2872_v1 = vrot.slane %v9680_v50, 3  ;;  %v2873_v16 = vrot.slane %v9681_v34, 4  ;;  %v1062_v61 = vmul.f32 0.0, %v995_v3  ;;  %v2762_v41 = vor.u32 %v2761_v17, %v2760_v22  ;;  %5661 = vmatpush3.bf16.msra.mxu0 %v5959_v39  ;;  %v9685_v22 = vld [vmem:[#allocation8_spill] sm:$0xff] }
 0x1ce   : > { %2383 = vmatmul.mubr.bf16.gmra.mxu1 %v1900_v30  ;;  %3257 = vmatmul.mubr.bf16.gmra.mxu0 %v7834_v28  ;;  %v2777_v18 = vrot.slane %v9682_v24, 4  ;;  %v7869_v30 = vrot.slane %v9431_v6, 7  ;;  %v9684_v3 = vshrl.u32 %v7583_v49, 16  ;;  %v1356_v17 = vrot.slane %v9685_v22, 1  ;;  %v9690_v22 = vld [vmem:[#allocation5_spill] sm:$0xff] }
 0x1cf   : > { %2390 = vmatprep.mubr.bf16.mxu1 %v1927_v32  ;;  %3264 = vmatprep.mubr.bf16.mxu0 %v7844_v62  ;;  %v2874_v20 = vor.u32 %v2873_v16, %v2872_v1  ;;  %v1918_v32 = vor.u32 %v9433_v5, %v7623_v54  ;;  %v9686_v16 = vshll.u32 %v7583_v49, 16  ;;  %v1074_v5 = vmul.f32 0.0, %v1062_v61 }
 0x1d0   : > { %v1945_v50 = vor.u32 %v9432_v13, %v7869_v30  ;;  %v2884_v24 = vrot.slane %v9684_v3, 3  ;;  %v2778_v1 = vor.u32 %v2777_v18, %v2776_v37  ;;  %v5960_v13 = vld [vmem:[%s9241_s4 + $0x200] sm:$0xff]   ;;  %v7899_v11 = vsel %vm2640_vm4, %v2750_v63, %v2762_v41 }
 0x1d1   : > { %v7888_v34 = vsel %vm2640_vm4, %v2862_v0, %v2874_v20  ;;  %v2885_v6 = vrot.slane %v9686_v16, 4  ;;  %9687 = vst [vmem:[#allocation8_spill] sm:$0xff] %v7899_v11  ;;  %v2772_v0 = vrot.slane %v6946_v57, 3  ;;  %v9688_v39 = vrot.slane %v7626_v27, 7  ;;  %5662 = vmatprep.subr.bf16.mxu0 %v5960_v13 }
 0x1d2   : > { %9683 = vst [vmem:[#allocation47_spill] sm:$0xff] %v7888_v34  ;;  %v1946_v49 = vsel %vm1508_vm2, %v7791_v19, %v1945_v50  ;;  %v2773_v37 = vrot.slane %v6943_v14, 4  ;;  %v9689_v61 = vshrl.u32 %v7874_v23, 16  ;;  %v9691_v16 = vrot.slane %v9690_v22, 1  ;;  %5663 = vmatpush3.bf16.msra.mxu0 %v5960_v13 }
 0x1d3   : > { %v1919_v3 = vsel %vm1508_vm2, %v9688_v39, %v1918_v32  ;;  %v2886_v18 = vor.u32 %v2885_v6, %v2884_v24  ;;  %v9692_v62 = vshrl.u32 %v7611_v44, 16  ;;  %v9693_v32 = vshll.u32 %v7611_v44, 16  ;;  %v9695_v6 = vld [vmem:[#allocation49_spill] sm:$0xff] }
 0x1d4   : > { %v1961_v63 = vrot.slane %v9689_v61, 7  ;;  %v1358_v57 = vsel %vm1355_vm1, %v1356_v17, %v9691_v16  ;;  %v7921_v14 = vsel %vm2640_vm4, %v7809_v42, %v2778_v1  ;;  %v9696_v19 = vshrl.u32 %v9695_v6, 16  ;;  %v9700_v16 = vld [vmem:[#allocation10_spill] sm:$0xff] }
 0x1d5   : > { %v2896_v28 = vrot.slane %v9692_v62, 3  ;;  %v2897_v39 = vrot.slane %v9693_v32, 4  ;;  %9694 = vst [vmem:[#allocation5_spill] sm:$0xff] %v7921_v14  ;;  %v9697_v24 = vshll.u32 %v9695_v6, 16  ;;  %v9699_v44 = vrot.slane %v7748_v58, 7 }
 0x1d6   : > { %2391 = vmatmul.mubr.bf16.gmra.mxu1 %v1919_v3  ;;  %3265 = vmatmul.mubr.bf16.gmra.mxu0 %v7899_v11  ;;  %v2788_v50 = vrot.slane %v9696_v19, 3  ;;  %v7928_v3 = vsel %vm2640_vm4, %v2874_v20, %v2886_v18  ;;  %v9439_v13 = vshll.u32 %v7874_v23, 16  ;;  %v2774_v61 = vor.u32 %v2773_v37, %v2772_v0  ;;  %v9705_v0 = vld [vmem:[#allocation34_spill] sm:$0xff] }
 0x1d7   : > { %2398 = vmatprep.mubr.bf16.mxu1 %v1946_v49  ;;  %v2789_v17 = vrot.slane %v9697_v24, 4  ;;  %9698 = vst [vmem:[#allocation49_spill] sm:$0xff] %v7928_v3  ;;  %3272 = vmatprep.mubr.bf16.mxu0 %v7921_v14  ;;  %v1937_v62 = vor.u32 %v9699_v44, %v7670_v60  ;;  %v2898_v42 = vor.u32 %v2897_v39, %v2896_v28  ;;  %v2663_v49 = vshrl.u32 %v1358_v57, 16 }
 0x1d8   : > { %v2666_v22 = vshll.u32 %v1358_v57, 16  ;;  %v2671_v32 = vshll.u32 %v9700_v16, 16  ;;  %v1964_v6 = vor.u32 %v9439_v13, %v1961_v63  ;;  %v9702_v19 = vshrl.u32 %v7649_v43, 16  ;;  %v9707_v63 = vld [vmem:[#allocation33_spill] sm:$0xff] }
 0x1d9   : > { %v7939_v20 = vsel %vm2640_vm4, %v2886_v18, %v2898_v42  ;;  %v9703_v14 = vshll.u32 %v7649_v43, 16  ;;  %v9704_v11 = vmov 0.0   ;;  %v2790_v28 = vor.u32 %v2789_v17, %v2788_v50 }
 0x1da   : > { %9701 = vst [vmem:[#allocation10_spill] sm:$0xff] %v7939_v20  ;;  %v2908_v24 = vrot.slane %v9702_v19, 3  ;;  %v7946_v53 = vpack.c.bf16 %v9704_v11, %v1074_v5  ;;  %v2784_v37 = vrot.slane %v9705_v0, 3  ;;  %v9706_v57 = vrot.slane %v7657_v35, 7 }
 0x1db   : > { %v2909_v44 = vrot.slane %v9703_v14, 4  ;;  %v2785_v13 = vrot.slane %v9707_v63, 4  ;;  %v1955_v18 = vrot.slane %v7813_v38, 7  ;;  %v2665_v54 = vrot.slane %v2663_v49, 3  ;;  %v2224_v63 = vpop.f32.mrf.mxu1 }
 0x1dc   : > { %v1938_v39 = vsel %vm1508_vm2, %v9706_v57, %v1937_v62  ;;  %v2668_v19 = vrot.slane %v2666_v22, 4  ;;  %v9708_v43 = vshrl.u32 %v9700_v16, 16  ;;  %v2673_v55 = vrot.slane %v2671_v32, 4  ;;  %v9712_v22 = vld [vmem:[#allocation7_spill] sm:$0xff]  ;;  %v9717_v57 = vld [vmem:[#allocation36_spill] sm:$0xff] }
 0x1dd   : > { %v2910_v60 = vor.u32 %v2909_v44, %v2908_v24  ;;  %v7957_v5 = vsel %vm2640_vm4, %v2762_v41, %v2774_v61  ;;  %v1965_v11 = vsel %vm1508_vm2, %v7869_v30, %v1964_v6  ;;  %v9711_v17 = vshrl.u32 %v7693_v47, 16  ;;  %v9716_v44 = vld [vmem:[#allocation40_spill] sm:$0xff] }
 0x1de   : > { %v2670_v14 = vrot.slane %v9708_v43, 3  ;;  %9709 = vst [vmem:[#allocation34_spill] sm:$0xff] %v7957_v5  ;;  %2399 = vmatmul.mubr.bf16.gmra.mxu1 %v1938_v39  ;;  %v9713_v24 = vshll.u32 %v9712_v22, 16  ;;  %3273 = vmatmul.mubr.bf16.gmra.mxu0 %v7957_v5  ;;  %v7971_v41 = vsel %vm2640_vm4, %v2778_v1, %v2790_v28  ;;  %v9715_v32 = vshll.u32 %v7693_v47, 16 }
 0x1df   : > { %v7962_v50 = vsel %vm2640_vm4, %v2898_v42, %v2910_v60  ;;  %v2920_v62 = vrot.slane %v9711_v17, 3  ;;  %9714 = vst [vmem:[#allocation7_spill] sm:$0xff] %v7971_v41  ;;  %2406 = vmatprep.mubr.bf16.mxu1 %v1965_v11  ;;  %3280 = vmatprep.mubr.bf16.mxu0 %v7971_v41  ;;  %v2786_v42 = vor.u32 %v2785_v13, %v2784_v37  ;;  %v2796_v0 = vrot.slane %v9716_v44, 3  ;;  %v9719_v11 = vld [vmem:[#allocation17_spill] sm:$0xff]  ;;  %v2226_v13 = vpop.f32.mrf.mxu1 }
 0x1e0   : > { %9710 = vst [vmem:[#allocation33_spill] sm:$0xff] %v7962_v50  ;;  %v2685_v16 = vrot.slane %v9713_v24, 4  ;;  %v2921_v30 = vrot.slane %v9715_v32, 4  ;;  %v1956_v6 = vor.u32 %v1955_v18, %v7767_v2  ;;  %v2797_v39 = vrot.slane %v9717_v57, 4 }
 0x1e1   : > { %v2669_v43 = vor.u32 %v2668_v19, %v2665_v54  ;;  %v2674_v17 = vor.u32 %v2673_v55, %v2670_v14  ;;  %v9718_v24 = vshrl.u32 %v9712_v22, 16  ;;  %v9720_v38 = vshrl.u32 %v9719_v11, 16 }
 0x1e2   : > { %v2922_v49 = vor.u32 %v2921_v30, %v2920_v62  ;;  %v9721_v32 = vshll.u32 %v9719_v11, 16  ;;  %v9722_v37 = vshrl.u32 %v7727_v26, 16  ;;  %v9723_v44 = vshll.u32 %v7727_v26, 16  ;;  %v5538_v62 = vpop.f32.mrf.mxu0 }
 0x1e3   : > { %v2684_v1 = vrot.slane %v9718_v24, 3  ;;  %v2696_v47 = vrot.slane %v9720_v38, 3  ;;  %v1316_v54 = vshrl.u32 %v6411_v59, 16  ;;  %v9724_v55 = vshll.u32 %v7946_v53, 16  ;;  %v9725_v24 = vld [vmem:[#allocation39_spill] sm:$0xff] }
 0x1e4   : > { %v2697_v41 = vrot.slane %v9721_v32, 4  ;;  %v2932_v18 = vrot.slane %v9722_v37, 3  ;;  %v2933_v57 = vrot.slane %v9723_v44, 4  ;;  %v7994_v38 = vsel %vm2640_vm4, %v2910_v60, %v2922_v49  ;;  %v2227_v32 = vpop.f32.mrf.mxu1  ;;  %v2449_v2 = vpop.f32.mrf.mxu0 }
 0x1e5   : > { %v1322_v19 = vrot.slane %v9724_v55, 1  ;;  %v2798_v22 = vor.u32 %v2797_v39, %v2796_v0  ;;  %v2808_v30 = vrot.slane %v6995_v48, 3  ;;  %v2809_v11 = vrot.slane %v9725_v24, 4 }
 0x1e6   : > { %v2934_v13 = vor.u32 %v2933_v57, %v2932_v18  ;;  %v7999_v26 = vsel %vm2640_vm4, %v2774_v61, %v2786_v42  ;;  %v9727_v37 = vrot.slane %v7748_v58, 7  ;;  %v2675_v55 = vsel %vm2640_vm4, %v2669_v43, %v2674_v17  ;;  %v2229_v48 = vpop.f32.mrf.mxu1 }
 0x1e7   : > { %9726 = vst [vmem:[#allocation40_spill] sm:$0xff] %v7999_v26  ;;  %v2686_v14 = vor.u32 %v2685_v16, %v2684_v1  ;;  %v8005_v60 = vor.u32 %v2697_v41, %v2696_v47  ;;  %v8007_v0 = vadd.f32 %v2449_v2, %v2224_v63  ;;  %v9728_v61 = vshrl.u32 %v7822_v15, 16  ;;  %3281 = vmatmul.mubr.bf16.gmra.mxu0 %v7999_v26  ;;  %v5539_v2 = vpop.f32.mrf.mxu0 }
 0x1e8   : > { %v1957_v44 = vsel %vm1508_vm2, %v9727_v37, %v1956_v6  ;;  %v8010_v39 = vsel %vm2640_vm4, %v2922_v49, %v2934_v13  ;;  %v1318_v57 = vor.u32 %v1316_v54, %v7830_v4  ;;  %v8016_v6 = vrot.slane %v7946_v53, 1 }
 0x1e9   : > { %2407 = vmatmul.mubr.bf16.gmra.mxu1 %v1957_v44  ;;  %v2944_v18 = vrot.slane %v9728_v61, 3  ;;  %v8021_v16 = vsel %vm2640_vm4, %v2790_v28, %v7695_v7  ;;  %v9731_v41 = vshll.u32 %v7822_v15, 16  ;;  %v9732_v63 = vshrl.u32 %v7946_v53, 16  ;;  %v2452_v24 = vpop.f32.mrf.mxu0 }
 0x1ea   : > { %9729 = vst [vmem:[#allocation36_spill] sm:$0xff] %v8016_v6  ;;  %9730 = vst [vmem:[#allocation17_spill] sm:$0xff] %v8021_v16  ;;  %5600 = vmatprep.mubr.bf16.mxu1 %v2675_v55  ;;  %3288 = vmatprep.mubr.bf16.mxu0 %v8021_v16  ;;  %v8029_v4 = vsel %vm2640_vm4, %v2786_v42, %v2798_v22  ;;  %v2687_v1 = vsel %vm2640_vm4, %v2674_v17, %v2686_v14  ;;  %v9734_v28 = vshrl.u32 %v7404_v52, 16  ;;  %v2232_v42 = vpop.f32.mrf.mxu1  ;;  %v9738_v17 = vld [vmem:[#allocation19_spill] sm:$0xff] }
 0x1eb   : > { %v2945_v49 = vrot.slane %v9731_v41, 4  ;;  %v1326_v43 = vor.u32 %v9732_v63, %v1322_v19  ;;  %9733 = vst [vmem:[#allocation39_spill] sm:$0xff] %v8029_v4  ;;  %v8032_v47 = vor.u32 %v2809_v11, %v2808_v30  ;;  %v9735_v15 = vshll.u32 %v7404_v52, 16  ;;  %v5937_v52 = vld [vmem:[%s9241_s4 + $0x1b8] sm:$0xff]  }
 0x1ec   : > { %v2948_v37 = vrot.slane %v9734_v28, 3  ;;  %v9736_v55 = vshrl.u32 %v7874_v23, 16  ;;  %v2699_v61 = vsel %vm2640_vm4, %v2686_v14, %v8005_v60  ;;  %v8042_v41 = vadd.f32 %v2452_v24, %v2227_v32 }
 0x1ed   : > { %v2946_v7 = vor.u32 %v2945_v49, %v2944_v18  ;;  %v2949_v44 = vrot.slane %v9735_v15, 4  ;;  %v9739_v30 = vshrl.u32 %v9738_v17, 16  ;;  %v9740_v18 = vshll.u32 %v7874_v23, 16 }
 0x1ee   : > { %v3671_v48 = vrot.slane %v9736_v55, 3  ;;  %9737 = vst [vmem:[#allocation65_spill] sm:$0xff] %v8042_v41  ;;  %v8051_v63 = vadd.f32 %v5538_v62, %v2232_v42  ;;  %v9742_v28 = vshll.u32 %v9738_v17, 16  ;;  %v9743_v55 = vld [vmem:[#allocation22_spill] sm:$0xff]  ;;  %v8062_v24 = vsel %vm2640_vm4, %v2798_v22, %v8032_v47 }
 0x1ef   : > { %v2708_v11 = vrot.slane %v9739_v30, 3  ;;  %v3672_v49 = vrot.slane %v9740_v18, 4  ;;  %v9744_v14 = vshrl.u32 %v9743_v55, 16  ;;  %v8058_v32 = vsel %vm2640_vm4, %v2934_v13, %v2946_v7  ;;  %9745 = vst [vmem:[#allocation22_spill] sm:$0xff] %v8062_v24  ;;  %v2234_v18 = vpop.f32.mrf.mxu1  ;;  %3289 = vmatmul.mubr.bf16.gmra.mxu0 %v8029_v4 }
 0x1f0   : > { %9741 = vst [vmem:[#allocation19_spill] sm:$0xff] %v8051_v63  ;;  %v2709_v15 = vrot.slane %v9742_v28, 4  ;;  %v9746_v23 = vshll.u32 %v9743_v55, 16  ;;  %v1323_v62 = vsel %vm1103_vm3, %v1318_v57, %v1322_v19  ;;  %v2820_v42 = vrot.slane %v7154_v9, 3  ;;  %v5938_v19 = vld [vmem:[%s9241_s4 + $0x1b0] sm:$0xff]   ;;  %v8077_v57 = vpop.f32.mrf.mxu0  ;;  %3296 = vmatprep.mubr.bf16.mxu0 %v7741_v12 }
 0x1f1   : > { %v2720_v16 = vrot.slane %v9744_v14, 3  ;;  %v3673_v26 = vor.u32 %v3672_v49, %v3671_v48  ;;  %v8068_v17 = vor.u32 %v2949_v44, %v2948_v37  ;;  %v3684_v28 = vshrl.u32 %v1323_v62, 16  ;;  %5601 = vmatmul.mubr.bf16.vlgmr.msra.gmra.mxu1 %v2687_v1  ;;  %v2235_v13 = vpop.f32.mrf.mxu1 }
 0x1f2   : > { %v2721_v30 = vrot.slane %v9746_v23, 4  ;;  %v3687_v14 = vshll.u32 %v1323_v62, 16  ;;  %v3679_v22 = vrot.slane %v1316_v54, 3  ;;  %v3706_v63 = vshrl.u32 %v1326_v43, 16  ;;  %3877 = vmatpush1.bf16.msra.mxu1 %v5937_v52  ;;  %5604 = vmatprep.mubr.bf16.mxu1 %v2699_v61  ;;  %v2465_v62 = vpop.f32.mrf.mxu0 }
 0x1f3   : > { %v8071_v5 = vsel %vm2640_vm4, %v2946_v7, %v3673_v26  ;;  %v3709_v41 = vshll.u32 %v1326_v43, 16  ;;  %v8079_v37 = vadd.f32 %v5539_v2, %v2235_v13  ;;  %v3686_v44 = vrot.slane %v3684_v28, 3  ;;  %v2237_v43 = vpop.f32.mrf.mxu1 }
 0x1f4   : > { %9747 = vst [vmem:[#allocation66_spill] sm:$0xff] %v8071_v5  ;;  %v3689_v1 = vrot.slane %v3687_v14, 4  ;;  %v9748_v48 = vshll.u32 %v6411_v59, 16  ;;  %v2710_v54 = vor.u32 %v2709_v15, %v2708_v11  ;;  %v3708_v49 = vrot.slane %v3706_v63, 3 }
 0x1f5   : > { %v3711_v52 = vrot.slane %v3709_v41, 4  ;;  %v9749_v55 = vshrl.u32 %v7946_v53, 16  ;;  %v9750_v18 = vmov 0   ;;  %v9751_v28 = vshll.u32 %v7946_v53, 16  ;;  %v2240_v63 = vpop.f32.mrf.mxu1 }
 0x1f6   : > { %v3680_v7 = vrot.slane %v9748_v48, 4  ;;  %3878 = vmatprep.subr.bf16.mxu1 %v9750_v18  ;;  %v3690_v2 = vor.u32 %v3689_v1, %v3686_v44  ;;  %v8092_v13 = vsel %vm2640_vm4, %v8068_v17, %v7464_v10  ;;  %v9753_v61 = vrot.slane %v6411_v59, 1  ;;  %v8098_v44 = vpop.f32.mrf.mxu0 }
 0x1f7   : > { %v3701_v23 = vrot.slane %v9749_v55, 3  ;;  %v3702_v14 = vrot.slane %v9751_v28, 4  ;;  %9752 = vst [vmem:[#allocation67_spill] sm:$0xff] %v8092_v13  ;;  %v2722_v11 = vor.u32 %v2721_v30, %v2720_v16  ;;  %v3712_v15 = vor.u32 %v3711_v52, %v3708_v49  ;;  %3879 = vmatpush1.bf16.msra.mxu1 %v5938_v19  ;;  %v5939_v16 = vld [vmem:[%s9241_s4 + $0x1a8] sm:$0xff]   ;;  %v2242_v30 = vpop.f32.mrf.mxu1  ;;  %3297 = vmatmul.mubr.bf16.gmra.mxu0 %v8062_v24 }
 0x1f8   : > { %v1410_v41 = vsel %vm1355_vm1, %v9753_v61, %v8016_v6  ;;  %v8100_v53 = vadd.f32 %v2465_v62, %v2240_v63  ;;  %v8103_v1 = vsel %vm2640_vm4, %v3673_v26, %v3690_v2  ;;  %v8105_v55 = vor.u32 %v3680_v7, %v3679_v22  ;;  %3880 = vmatprep.subr.bf16.mxu1 %v9750_v18  ;;  %v2468_v22 = vpop.f32.mrf.mxu0  ;;  %v9757_v7 = vld [vmem:[#allocation26_spill] sm:$0xff] }
 0x1f9   : > { %v3693_v48 = vshrl.u32 %v1410_v41, 16  ;;  %v3696_v43 = vshll.u32 %v1410_v41, 16  ;;  %9754 = vst [vmem:[#allocation68_spill] sm:$0xff] %v8103_v1  ;;  %v3703_v28 = vor.u32 %v3702_v14, %v3701_v23  ;;  %v2821_v59 = vrot.slane %v7086_v40, 4  ;;  %v9761_v41 = vld [vmem:[#allocation29_spill] sm:$0xff]  ;;  %3304 = vmatprep.mubr.bf16.mxu0 %v7760_v8 }
 0x1fa   : > { %9755 = vst [vmem:[#allocation69_spill] sm:$0xff] %v8105_v55  ;;  %v8113_v19 = vsel %vm2640_vm4, %v3690_v2, %v3712_v15  ;;  %v8117_v26 = vsel %vm2640_vm4, %v8005_v60, %v2710_v54  ;;  %v9758_v23 = vshrl.u32 %v9757_v7, 16  ;;  %v9759_v62 = vshll.u32 %v9757_v7, 16  ;;  %v5941_v7 = vld [vmem:[%s9241_s4 + $0x1a0] sm:$0xff]  }
 0x1fb   : > { %9756 = vst [vmem:[#allocation70_spill] sm:$0xff] %v8113_v19  ;;  %v3695_v49 = vrot.slane %v3693_v48, 3  ;;  %v3698_v52 = vrot.slane %v3696_v43, 4  ;;  %v8125_v61 = vsel %vm2640_vm4, %v8105_v55, %v3703_v28  ;;  %5605 = vmatmul.mubr.bf16.gmra.mxu1 %v8117_v26  ;;  %v8129_v2 = vsel %vm2640_vm4, %v2710_v54, %v2722_v11  ;;  %v2243_v43 = vpop.f32.mrf.mxu1  ;;  %v9798_v8 = vld [vmem:[#allocation45_spill] sm:$0xff] }
 0x1fc   : > { %v2732_v40 = vrot.slane %v9758_v23, 3  ;;  %v2733_v14 = vrot.slane %v9759_v62, 4  ;;  %9760 = vst [vmem:[#allocation26_spill] sm:$0xff] %v8125_v61  ;;  %v9762_v63 = vshrl.u32 %v9761_v41, 16  ;;  %v9763_v15 = vshll.u32 %v9761_v41, 16  ;;  %5608 = vmatprep.mubr.bf16.mxu1 %v8129_v2  ;;  %3881 = vmatpush1.bf16.msra.mxu1 %v5939_v16 }
 0x1fd   : > { %v8135_v30 = vor.u32 %v3698_v52, %v3695_v49  ;;  %v8139_v28 = vadd.f32 %v2468_v22, %v2243_v43  ;;  %v2822_v54 = vor.u32 %v2821_v59, %v2820_v42  ;;  %v2245_v23 = vpop.f32.mrf.mxu1  ;;  %3882 = vmatprep.subr.bf16.mxu1 %v9750_v18  ;;  %v8153_v22 = vpop.f32.mrf.mxu0  ;;  %v2832_v42 = vrot.slane %v7065_v51, 3  ;;  %v5942_v59 = vld [vmem:[%s9241_s4 + $0x198] sm:$0xff]  }
 0x1fe   : > { %v2744_v60 = vrot.slane %v9762_v63, 3  ;;  %v2745_v48 = vrot.slane %v9763_v15, 4  ;;  %v2734_v52 = vor.u32 %v2733_v14, %v2732_v40  ;;  %v2833_v16 = vrot.slane %v7062_v25, 4  ;;  %v9767_v63 = vld [vmem:[#allocation30_spill] sm:$0xff]  ;;  %v9770_v25 = vld [vmem:[#allocation32_spill] sm:$0xff] }
 0x1ff   : > { %9764 = vst [vmem:[#allocation29_spill] sm:$0xff] %v8135_v30  ;;  %v8150_v49 = vsel %vm2640_vm4, %v7464_v10, %v8135_v30  ;;  %v2481_v41 = vpop.f32.mrf.mxu0  ;;  %v8157_v9 = vsel %vm2640_vm4, %v8032_v47, %v2822_v54  ;;  %v2248_v14 = vpop.f32.mrf.mxu1  ;;  %v9768_v47 = vshrl.u32 %v9767_v63, 16  ;;  %v9769_v51 = vshll.u32 %v9767_v63, 16 }
 0x200   : > { %9765 = vst [vmem:[#allocation71_spill] sm:$0xff] %v8150_v49  ;;  %v2746_v62 = vor.u32 %v2745_v48, %v2744_v60  ;;  %9766 = vst [vmem:[#allocation72_spill] sm:$0xff] %v8157_v9  ;;  %3883 = vmatpush1.bf16.msra.mxu1 %v5941_v7  ;;  %v8164_v10 = vsel %vm2640_vm4, %v2722_v11, %v2734_v52  ;;  %v8179_v11 = vadd.f32 %v8077_v57, %v2248_v14 }
 0x201   : > { %v8167_v40 = vpop.f32.mrf.mxu0  ;;  %3884 = vmatprep.subr.bf16.mxu1 %v9750_v18  ;;  %v2756_v60 = vrot.slane %v9768_v47, 3  ;;  %v2757_v15 = vrot.slane %v9769_v51, 4  ;;  %v9771_v43 = vshrl.u32 %v9770_v25, 16  ;;  %v9772_v23 = vshll.u32 %v9770_v25, 16  ;;  %3305 = vmatmul.mubr.bf16.gmra.mxu0 %v8157_v9  ;;  %v2250_v63 = vpop.f32.mrf.mxu1 }
 0x202   : > { %v8176_v48 = vsel %vm2640_vm4, %v2734_v52, %v2746_v62  ;;  %3312 = vmatprep.mubr.bf16.mxu0 %v7794_v46  ;;  %v5943_v52 = vld [vmem:[%s9241_s4 + $0x190] sm:$0xff]   ;;  %v2834_v51 = vor.u32 %v2833_v16, %v2832_v42  ;;  %v2844_v63 = vrot.slane %v7455_v56, 3  ;;  %v9799_v24 = vshrl.u32 %v9798_v8, 16 }
 0x203   : > { %5609 = vmatmul.mubr.bf16.gmra.mxu1 %v8164_v10  ;;  %v2768_v7 = vrot.slane %v9771_v43, 3  ;;  %v2769_v30 = vrot.slane %v9772_v23, 4  ;;  %v2484_v57 = vpop.f32.mrf.mxu0  ;;  %v2758_v14 = vor.u32 %v2757_v15, %v2756_v60  ;;  %v2251_v47 = vpop.f32.mrf.mxu1  ;;  %v9773_v15 = vld [vmem:[#allocation58_spill] sm:$0xff]  ;;  %v9774_v42 = vld [vmem:[#allocation35_spill] sm:$0xff] }
 0x204   : > { %5612 = vmatprep.mubr.bf16.mxu1 %v8176_v48  ;;  %3885 = vmatpush1.bf16.msra.mxu1 %v5942_v59  ;;  %v8193_v43 = vadd.f32 %v8098_v44, %v2251_v47  ;;  %v5944_v59 = vld [vmem:[%s9241_s4 + $0x188] sm:$0xff]   ;;  %v2845_v13 = vrot.slane %v9773_v15, 4  ;;  %v9776_v44 = vshll.u32 %v9774_v42, 16  ;;  %v8211_v56 = vsel %vm2640_vm4, %v2822_v54, %v2834_v51 }
 0x205   : > { %3886 = vmatprep.subr.bf16.mxu1 %v9750_v18  ;;  %v2770_v25 = vor.u32 %v2769_v30, %v2768_v7  ;;  %v2253_v23 = vpop.f32.mrf.mxu1  ;;  %v8200_v49 = vsel %vm2640_vm4, %v2746_v62, %v2758_v14  ;;  %v8202_v60 = vpop.f32.mrf.mxu0  ;;  %v9775_v30 = vshrl.u32 %v9774_v42, 16  ;;  %9777 = vst [vmem:[#allocation30_spill] sm:$0xff] %v8211_v56  ;;  %v9778_v47 = vld [vmem:[#allocation38_spill] sm:$0xff] }
 0x206   : > { %v2781_v7 = vrot.slane %v9776_v44, 4  ;;  %v9779_v23 = vshrl.u32 %v9778_v47, 16  ;;  %v9780_v6 = vshll.u32 %v9778_v47, 16 }
 0x207   : > { %v2780_v16 = vrot.slane %v9775_v30, 3  ;;  %v8215_v62 = vsel %vm2640_vm4, %v2758_v14, %v2770_v25  ;;  %v8223_v42 = vpop.f32.mrf.mxu0  ;;  %v5946_v14 = vld [vmem:[%s9241_s4 + $0x180] sm:$0xff]  }
 0x208   : > { %3887 = vmatpush1.bf16.msra.mxu1 %v5943_v52  ;;  %v2256_v52 = vpop.f32.mrf.mxu1  ;;  %v2792_v15 = vrot.slane %v9779_v23, 3  ;;  %v2793_v30 = vrot.slane %v9780_v6, 4  ;;  %v2846_v6 = vor.u32 %v2845_v13, %v2844_v63  ;;  %v9783_v63 = vld [vmem:[#allocation42_spill] sm:$0xff] }
 0x209   : > { %3888 = vmatprep.subr.bf16.mxu1 %v9750_v18  ;;  %3313 = vmatmul.mubr.bf16.gmra.mxu0 %v8211_v56  ;;  %v8225_v54 = vadd.f32 %v2481_v41, %v2256_v52  ;;  %v8231_v23 = vpop.f32.mrf.mxu0  ;;  %v2782_v47 = vor.u32 %v2781_v7, %v2780_v16  ;;  %v9781_v52 = vld [vmem:[#allocation57_spill] sm:$0xff]  ;;  %v9784_v7 = vshrl.u32 %v9783_v63, 16 }
 0x20a   : > { %3320 = vmatprep.mubr.bf16.mxu0 %v7837_v31  ;;  %v2258_v44 = vpop.f32.mrf.mxu1  ;;  %v2794_v61 = vor.u32 %v2793_v30, %v2792_v15  ;;  %v2856_v1 = vrot.slane %v9781_v52, 3  ;;  %v5947_v31 = vld [vmem:[%s9241_s4 + $0x1f8] sm:$0xff]  }
 0x20b   : > { %5613 = vmatmul.mubr.bf16.gmra.mxu1 %v8200_v49  ;;  %v8234_v55 = vpop.f32.mrf.mxu0  ;;  %v9782_v44 = vld [vmem:[#allocation56_spill] sm:$0xff]  ;;  %v8244_v16 = vsel %vm2640_vm4, %v2770_v25, %v2782_v47  ;;  %v2804_v15 = vrot.slane %v9784_v7, 3  ;;  %v9787_v25 = vld [vmem:[#allocation43_spill] sm:$0xff] }
 0x20c   : > { %5616 = vmatprep.mubr.bf16.mxu1 %v8215_v62  ;;  %3889 = vmatpush1.bf16.msra.mxu1 %v5944_v59  ;;  %v2259_v19 = vpop.f32.mrf.mxu1  ;;  %v2857_v59 = vrot.slane %v9782_v44, 4  ;;  %v8258_v30 = vsel %vm2640_vm4, %v2782_v47, %v2794_v61  ;;  %v9789_v44 = vshll.u32 %v9787_v25, 16  ;;  %v5948_v47 = vld [vmem:[%s9241_s4 + $0x1f0] sm:$0xff]  }
 0x20d   : > { %3890 = vmatprep.subr.bf16.mxu1 %v9750_v18  ;;  %v8236_v41 = vadd.f32 %v2484_v57, %v2259_v19  ;;  %v8246_v13 = vpop.f32.mrf.mxu0  ;;  %v9785_v19 = vshll.u32 %v9783_v63, 16 }
 0x20e   : > { %v2261_v5 = vpop.f32.mrf.mxu1  ;;  %v2817_v56 = vrot.slane %v9789_v44, 4 }
 0x20f   : > { %v2805_v57 = vrot.slane %v9785_v19, 4  ;;  %v8254_v5 = vsel %vm2640_vm4, %v2834_v51, %v2846_v6  ;;  %v8266_v63 = vpop.f32.mrf.mxu0  ;;  %v2858_v51 = vor.u32 %v2857_v59, %v2856_v1  ;;  %v9792_v1 = vld [vmem:[#allocation61_spill] sm:$0xff] }
 0x210   : > { %3891 = vmatpush1.bf16.msra.mxu1 %v5946_v14  ;;  %9786 = vst [vmem:[#allocation32_spill] sm:$0xff] %v8254_v5  ;;  %v9788_v14 = vshrl.u32 %v9787_v25, 16  ;;  %v2264_v7 = vpop.f32.mrf.mxu1  ;;  %v2868_v59 = vrot.slane %v9792_v1, 3 }
 0x211   : > { %3892 = vmatprep.subr.bf16.mxu1 %v9750_v18  ;;  %3321 = vmatmul.mubr.bf16.gmra.mxu0 %v8254_v5  ;;  %v8272_v19 = vpop.f32.mrf.mxu0  ;;  %v8275_v25 = vadd.f32 %v8153_v22, %v2264_v7  ;;  %v8279_v46 = vsel %vm2640_vm4, %v2846_v6, %v2858_v51 }
 0x212   : > { %v2816_v52 = vrot.slane %v9788_v14, 3  ;;  %3328 = vmatprep.mubr.bf16.mxu0 %v7858_v45  ;;  %v2806_v14 = vor.u32 %v2805_v57, %v2804_v15  ;;  %v2266_v5 = vpop.f32.mrf.mxu1  ;;  %9791 = vst [vmem:[#allocation35_spill] sm:$0xff] %v8279_v46  ;;  %v5949_v45 = vld [vmem:[%s9241_s4 + $0x1e8] sm:$0xff]  }
 0x213   : > { %5617 = vmatmul.mubr.bf16.gmra.mxu1 %v8244_v16  ;;  %9790 = vst [vmem:[#allocation58_spill] sm:$0xff] %v8275_v25  ;;  %v8285_v9 = vpop.f32.mrf.mxu0 }
 0x214   : > { %5620 = vmatprep.mubr.bf16.mxu1 %v8258_v30  ;;  %3893 = vmatpush2.bf16.msra.mxu1 %v5947_v31  ;;  %v2818_v44 = vor.u32 %v2817_v56, %v2816_v52  ;;  %v2267_v31 = vpop.f32.mrf.mxu1  ;;  %v8288_v22 = vsel %vm2640_vm4, %v2794_v61, %v2806_v14  ;;  %v9794_v56 = vld [vmem:[#allocation44_spill] sm:$0xff] }
 0x215   : > { %3894 = vmatprep.subr.bf16.mxu1 %v9750_v18  ;;  %v8291_v15 = vadd.f32 %v8167_v40, %v2267_v31  ;;  %v9795_v57 = vshrl.u32 %v9794_v56, 16  ;;  %v9796_v5 = vshll.u32 %v9794_v56, 16  ;;  %v2840_v40 = vrot.slane %v9799_v24, 3  ;;  %v8313_v56 = vpop.f32.mrf.mxu0 }
 0x216   : > { %v8300_v7 = vsel %vm2640_vm4, %v2806_v14, %v2818_v44  ;;  %v2269_v61 = vpop.f32.mrf.mxu1  ;;  %v9800_v31 = vshll.u32 %v9798_v8, 16  ;;  %v5951_v14 = vld [vmem:[%s9241_s4 + $0x1e0] sm:$0xff]  }
 0x217   : > { %9793 = vst [vmem:[#allocation38_spill] sm:$0xff] %v8291_v15  ;;  %v2828_v6 = vrot.slane %v9795_v57, 3  ;;  %v2829_v52 = vrot.slane %v9796_v5, 4  ;;  %v8316_v8 = vpop.f32.mrf.mxu0 }
 0x218   : > { %3895 = vmatpush2.bf16.msra.mxu1 %v5948_v47  ;;  %v9797_v47 = vld [vmem:[#allocation59_spill] sm:$0xff]  ;;  %v2841_v12 = vrot.slane %v9800_v31, 4  ;;  %v9802_v31 = vld [vmem:[#allocation62_spill] sm:$0xff] }
 0x219   : > { %3896 = vmatprep.subr.bf16.mxu1 %v9750_v18  ;;  %v2869_v1 = vrot.slane %v9797_v47, 4  ;;  %3329 = vmatmul.mubr.bf16.gmra.mxu0 %v8279_v46  ;;  %v2830_v57 = vor.u32 %v2829_v52, %v2828_v6  ;;  %v2272_v47 = vpop.f32.mrf.mxu1  ;;  %v8325_v46 = vpop.f32.mrf.mxu0 }
 0x21a   : > { %3336 = vmatprep.mubr.bf16.mxu0 %v7888_v34  ;;  %v2842_v5 = vor.u32 %v2841_v12, %v2840_v40  ;;  %v8319_v61 = vadd.f32 %v8223_v42, %v2272_v47  ;;  %v2880_v34 = vrot.slane %v9802_v31, 3  ;;  %v9803_v12 = vld [vmem:[#allocation60_spill] sm:$0xff] }
 0x21b   : > { %5621 = vmatmul.mubr.bf16.gmra.mxu1 %v8288_v22  ;;  %v2870_v24 = vor.u32 %v2869_v1, %v2868_v59  ;;  %v8328_v6 = vsel %vm2640_vm4, %v2818_v44, %v2830_v57  ;;  %v2274_v59 = vpop.f32.mrf.mxu1  ;;  %v2881_v52 = vrot.slane %v9803_v12, 4  ;;  %v9804_v1 = vld [vmem:[#allocation46_spill] sm:$0xff]  ;;  %v9809_v44 = vld [vmem:[#allocation48_spill] sm:$0xff] }
 0x21c   : > { %5624 = vmatprep.mubr.bf16.mxu1 %v8300_v7  ;;  %3897 = vmatpush2.bf16.msra.mxu1 %v5949_v45  ;;  %9801 = vst [vmem:[#allocation57_spill] sm:$0xff] %v8319_v61  ;;  %v5952_v45 = vld [vmem:[%s9241_s4 + $0x1d8] sm:$0xff]   ;;  %v9805_v40 = vshrl.u32 %v9804_v1, 16  ;;  %v9806_v42 = vshll.u32 %v9804_v1, 16  ;;  %v8341_v31 = vsel %vm2640_vm4, %v2830_v57, %v2842_v5  ;;  %v9810_v59 = vshrl.u32 %v9809_v44, 16  ;;  %v5953_v57 = vld [vmem:[%s9241_s4 + $0x1d0] sm:$0xff]  }
 0x21d   : > { %3898 = vmatprep.subr.bf16.mxu1 %v9750_v18  ;;  %9808 = vst [vmem:[#allocation42_spill] sm:$0xff] %v8341_v31  ;;  %v9811_v12 = vshll.u32 %v9809_v44, 16  ;;  %v2275_v1 = vpop.f32.mrf.mxu1 }
 0x21e   : > { %v2852_v4 = vrot.slane %v9805_v40, 3  ;;  %v2853_v47 = vrot.slane %v9806_v42, 4  ;;  %v2864_v61 = vrot.slane %v9810_v59, 3  ;;  %v8353_v40 = vadd.f32 %v8234_v55, %v2275_v1  ;;  %v5956_v55 = vld [vmem:[%s9241_s4 + $0x1c8] sm:$0xff]  }
 0x21f   : > { %v2865_v15 = vrot.slane %v9811_v12, 4  ;;  %v2277_v42 = vpop.f32.mrf.mxu1  ;;  %v2882_v59 = vor.u32 %v2881_v52, %v2880_v34  ;;  %v9814_v34 = vld [vmem:[#allocation50_spill] sm:$0xff] }
 0x220   : > { %3899 = vmatpush2.bf16.msra.mxu1 %v5951_v14  ;;  %v8337_v14 = vsel %vm2640_vm4, %v2858_v51, %v2870_v24  ;;  %v8350_v51 = vpop.f32.mrf.mxu0  ;;  %9812 = vst [vmem:[#allocation43_spill] sm:$0xff] %v8353_v40  ;;  %v2854_v44 = vor.u32 %v2853_v47, %v2852_v4  ;;  %v9816_v52 = vshll.u32 %v9814_v34, 16 }
 0x221   : > { %3900 = vmatprep.subr.bf16.mxu1 %v9750_v18  ;;  %9807 = vst [vmem:[#allocation56_spill] sm:$0xff] %v8337_v14  ;;  %3337 = vmatmul.mubr.bf16.gmra.mxu0 %v8337_v14  ;;  %v2866_v12 = vor.u32 %v2865_v15, %v2864_v61  ;;  %v2280_v25 = vpop.f32.mrf.mxu1  ;;  %v9815_v15 = vshrl.u32 %v9814_v34, 16 }
 0x222   : > { %3344 = vmatprep.mubr.bf16.mxu0 %v7928_v3  ;;  %v8359_v14 = vpop.f32.mrf.mxu0  ;;  %v2892_v3 = vrot.slane %v7565_v21, 3  ;;  %v8370_v4 = vsel %vm2640_vm4, %v2842_v5, %v2854_v44  ;;  %v2877_v47 = vrot.slane %v9816_v52, 4  ;;  %v9819_v5 = vld [vmem:[#allocation51_spill] sm:$0xff] }
 0x223   : > { %5625 = vmatmul.mubr.bf16.gmra.mxu1 %v8328_v6  ;;  %v2876_v61 = vrot.slane %v9815_v15, 3  ;;  %v9820_v1 = vshrl.u32 %v9819_v5, 16  ;;  %v9821_v42 = vshll.u32 %v9819_v5, 16 }
 0x224   : > { %5628 = vmatprep.mubr.bf16.mxu1 %v8341_v31  ;;  %3901 = vmatpush2.bf16.msra.mxu1 %v5952_v45  ;;  %v2893_v31 = vrot.slane %v7549_v33, 4  ;;  %v8367_v45 = vadd.f32 %v8202_v60, %v2280_v25  ;;  %v8378_v33 = vsel %vm2640_vm4, %v2870_v24, %v2882_v59  ;;  %v8380_v21 = vpop.f32.mrf.mxu0  ;;  %v8384_v60 = vsel %vm2640_vm4, %v2854_v44, %v2866_v12  ;;  %v2282_v25 = vpop.f32.mrf.mxu1  ;;  %v5958_v44 = vld [vmem:[%s9241_s4 + $0x1c0] sm:$0xff]  }
 0x225   : > { %3902 = vmatprep.subr.bf16.mxu1 %v9750_v18  ;;  %9817 = vst [vmem:[#allocation44_spill] sm:$0xff] %v8378_v33  ;;  %9818 = vst [vmem:[#allocation59_spill] sm:$0xff] %v8384_v60  ;;  %v2889_v34 = vrot.slane %v9821_v42, 4  ;;  %v2878_v5 = vor.u32 %v2877_v47, %v2876_v61 }
 0x226   : > { %9813 = vst [vmem:[#allocation61_spill] sm:$0xff] %v8367_v45  ;;  %v8393_v24 = vpop.f32.mrf.mxu0  ;;  %v2894_v15 = vor.u32 %v2893_v31, %v2892_v3  ;;  %v2283_v52 = vpop.f32.mrf.mxu1 }
 0x227   : > { %v8399_v25 = vadd.f32 %v8231_v23, %v2283_v52  ;;  %v8410_v31 = vsel %vm2640_vm4, %v2866_v12, %v2878_v5  ;;  %v9825_v23 = vld [vmem:[#allocation52_spill] sm:$0xff] }
 0x228   : > { %3903 = vmatpush2.bf16.msra.mxu1 %v5953_v57  ;;  %v2888_v57 = vrot.slane %v9820_v1, 3  ;;  %v8402_v1 = vpop.f32.mrf.mxu0  ;;  %v2285_v42 = vpop.f32.mrf.mxu1  ;;  %9824 = vst [vmem:[#allocation60_spill] sm:$0xff] %v8410_v31  ;;  %v9826_v52 = vshrl.u32 %v9825_v23, 16 }
 0x229   : > { %3904 = vmatprep.subr.bf16.mxu1 %v9750_v18  ;;  %3345 = vmatmul.mubr.bf16.gmra.mxu0 %v8378_v33  ;;  %9822 = vst [vmem:[#allocation45_spill] sm:$0xff] %v8399_v25 }
 0x22a   : > { %3352 = vmatprep.mubr.bf16.mxu0 %v7939_v20  ;;  %v2890_v33 = vor.u32 %v2889_v34, %v2888_v57  ;;  %v8405_v20 = vsel %vm2640_vm4, %v2882_v59, %v2894_v15  ;;  %v8407_v3 = vpop.f32.mrf.mxu0  ;;  %v2900_v61 = vrot.slane %v9826_v52, 3  ;;  %v8420_v57 = vld [vmem:[%s9241_s4 + $0x238] sm:$0xff]   ;;  %v9829_v34 = vld [vmem:[#allocation53_spill] sm:$0xff] }
 0x22b   : > { %5629 = vmatmul.mubr.bf16.gmra.mxu1 %v8370_v4  ;;  %9823 = vst [vmem:[#allocation62_spill] sm:$0xff] %v8405_v20 }
 0x22c   : > { %5632 = vmatprep.mubr.bf16.mxu1 %v8384_v60  ;;  %3905 = vmatpush2.bf16.msra.mxu1 %v5956_v55  ;;  %v2904_v55 = vrot.slane %v7592_v29, 3  ;;  %v2288_v59 = vpop.f32.mrf.mxu1  ;;  %v8425_v12 = vsel %vm2640_vm4, %v2878_v5, %v2890_v33  ;;  %v2905_v29 = vrot.slane %v7561_v36, 4 }
 0x22d   : > { %3906 = vmatprep.subr.bf16.mxu1 %v9750_v18  ;;  %v9827_v18 = vshll.u32 %v9825_v23, 16  ;;  %9828 = vst [vmem:[#allocation46_spill] sm:$0xff] %v8425_v12  ;;  %v9831_v23 = vshll.u32 %v9829_v34, 16  ;;  %v8436_v25 = vadd.f32 %v8266_v63, %v2288_v59  ;;  %v2916_v63 = vrot.slane %v7626_v27, 3  ;;  %v9839_v27 = vld [vmem:[#allocation55_spill] sm:$0xff] }
 0x22e   : > { %v2290_v5 = vpop.f32.mrf.mxu1  ;;  %v2906_v40 = vor.u32 %v2905_v29, %v2904_v55 }
 0x22f   : > { %v2901_v47 = vrot.slane %v9827_v18, 4  ;;  %v2913_v52 = vrot.slane %v9831_v23, 4  ;;  %v8433_v18 = vpop.f32.mrf.mxu0  ;;  %9832 = vst [vmem:[#allocation48_spill] sm:$0xff] %v8436_v25  ;;  %v9834_v25 = vld [vmem:[#allocation9_spill] sm:$0xff]  ;;  %v9835_v5 = vld [vmem:[#allocation54_spill] sm:$0xff] }
 0x230   : > { %3907 = vmatpush2.bf16.msra.mxu1 %v5958_v44  ;;  %v9830_v44 = vshrl.u32 %v9829_v34, 16  ;;  %v9837_v55 = vshll.u32 %v9835_v5, 16 }
 0x231   : > { %5776 = vmatprep.subr.bf16.mxu1 %v8420_v57  ;;  %3353 = vmatmul.mubr.bf16.gmra.mxu0 %v8405_v20  ;;  %v8440_v45 = vpop.f32.mrf.mxu0  ;;  %v2902_v36 = vor.u32 %v2901_v47, %v2900_v61  ;;  %v8457_v47 = vsel %vm2640_vm4, %v2894_v15, %v2906_v40 }
 0x232   : > { %v2912_v42 = vrot.slane %v9830_v44, 3  ;;  %3360 = vmatprep.mubr.bf16.mxu0 %v7962_v50  ;;  %v2291_v44 = vpop.f32.mrf.mxu1  ;;  %v2917_v50 = vrot.slane %v9834_v25, 4  ;;  %v2925_v61 = vrot.slane %v9837_v55, 4  ;;  %9838 = vst [vmem:[#allocation51_spill] sm:$0xff] %v8457_v47  ;;  %v9841_v25 = vshll.u32 %v9839_v27, 16 }
 0x233   : > { %5633 = vmatmul.mubr.bf16.gmra.mxu1 %v8410_v31  ;;  %v8442_v34 = vpop.f32.mrf.mxu0  ;;  %v8445_v23 = vadd.f32 %v8285_v9, %v2291_v44  ;;  %v8449_v59 = vsel %vm2640_vm4, %v2890_v33, %v2902_v36  ;;  %v9840_v9 = vshrl.u32 %v9839_v27, 16 }
 0x234   : > { %5636 = vmatprep.mubr.bf16.mxu1 %v8425_v12  ;;  %v2914_v31 = vor.u32 %v2913_v52, %v2912_v42  ;;  %v2293_v20 = vpop.f32.mrf.mxu1  ;;  %v9836_v12 = vshrl.u32 %v9835_v5, 16  ;;  %v2937_v42 = vrot.slane %v9841_v25, 4  ;;  %v2918_v5 = vor.u32 %v2917_v50, %v2916_v63  ;;  %v9842_v63 = vld [vmem:[#allocation20_spill] sm:$0xff] }
 0x235   : > { %9833 = vst [vmem:[#allocation50_spill] sm:$0xff] %v8445_v23  ;;  %v2936_v33 = vrot.slane %v9840_v9, 3 }
 0x236   : > { %v2924_v60 = vrot.slane %v9836_v12, 3  ;;  %v2296_v29 = vpop.f32.mrf.mxu1  ;;  %v8461_v20 = vsel %vm2640_vm4, %v2902_v36, %v2914_v31  ;;  %v8467_v52 = vpop.f32.mrf.mxu0 }
 0x237   : > { %v8471_v12 = vadd.f32 %v8246_v13, %v2296_v29  ;;  %v2938_v9 = vor.u32 %v2937_v42, %v2936_v33  ;;  %v8488_v29 = vsel %vm2640_vm4, %v2906_v40, %v2918_v5 }
 0x238   : > { %v2298_v15 = vpop.f32.mrf.mxu1  ;;  %v8475_v36 = vpop.f32.mrf.mxu0  ;;  %v2926_v44 = vor.u32 %v2925_v61, %v2924_v60  ;;  %v2928_v60 = vrot.slane %v7657_v35, 3 }
 0x239   : > { %3361 = vmatmul.mubr.bf16.gmra.mxu0 %v8457_v47 }
 0x23a   : > { %3368 = vmatprep.mubr.bf16.mxu0 %v7994_v38  ;;  %v2299_v55 = vpop.f32.mrf.mxu1  ;;  %v8477_v27 = vpop.f32.mrf.mxu0  ;;  %v8485_v13 = vsel %vm2640_vm4, %v2914_v31, %v2926_v44  ;;  %v8492_v50 = vsel %vm2640_vm4, %v2926_v44, %v2938_v9 }
 0x23b   : > { %5637 = vmatmul.mubr.bf16.gmra.mxu1 %v8449_v59  ;;  %v8480_v25 = vadd.f32 %v8272_v19, %v2299_v55  ;;  %v2929_v19 = vrot.slane %v9842_v63, 4 }
 0x23c   : > { %5640 = vmatprep.mubr.bf16.mxu1 %v8461_v20  ;;  %v2301_v47 = vpop.f32.mrf.mxu1  ;;  %v8482_v23 = vpop.f32.mrf.mxu0 }
 0x23d   : > { %v2930_v33 = vor.u32 %v2929_v19, %v2928_v60  ;;  %v2940_v60 = vrot.slane %v7748_v58, 3  ;;  %v9846_v19 = vld [vmem:[#allocation21_spill] sm:$0xff] }
 0x23e   : > { %v2304_v15 = vpop.f32.mrf.mxu1  ;;  %v8496_v61 = vpop.f32.mrf.mxu0 }
 0x23f   : > { %9843 = vst [vmem:[#allocation52_spill] sm:$0xff] %v8496_v61  ;;  %v8500_v31 = vadd.f32 %v8316_v8, %v2304_v15  ;;  %v8515_v8 = vsel %vm2640_vm4, %v2938_v9, %v8068_v17  ;;  %v8518_v15 = vsel %vm2640_vm4, %v2918_v5, %v2930_v33 }
 0x240   : > { %v2306_v40 = vpop.f32.mrf.mxu1  ;;  %v8504_v47 = vpop.f32.mrf.mxu0  ;;  %9845 = vst [vmem:[#allocation9_spill] sm:$0xff] %v8515_v8 }
 0x241   : > { %3369 = vmatmul.mubr.bf16.gmra.mxu0 %v8488_v29 }
 0x242   : > { %3376 = vmatprep.mubr.bf16.mxu0 %v8010_v39  ;;  %v2307_v42 = vpop.f32.mrf.mxu1  ;;  %v8506_v44 = vpop.f32.mrf.mxu0 }
 0x243   : > { %5641 = vmatmul.mubr.bf16.gmra.mxu1 %v8485_v13  ;;  %9844 = vst [vmem:[#allocation53_spill] sm:$0xff] %v8506_v44  ;;  %v8509_v35 = vadd.f32 %v8350_v51, %v2307_v42  ;;  %v2941_v44 = vrot.slane %v9846_v19, 4  ;;  %v9848_v42 = vld [vmem:[#allocation12_spill] sm:$0xff] }
 0x244   : > { %5644 = vmatprep.mubr.bf16.mxu1 %v8492_v50  ;;  %v2309_v55 = vpop.f32.mrf.mxu1  ;;  %v8511_v63 = vpop.f32.mrf.mxu0 }
 0x245   : > { %v8533_v9 = vor.u32 %v2941_v44, %v2940_v60 }
 0x246   : > { %v2312_v40 = vpop.f32.mrf.mxu1  ;;  %v8523_v61 = vpop.f32.mrf.mxu0 }
 0x247   : > { %9847 = vst [vmem:[#allocation54_spill] sm:$0xff] %v8523_v61  ;;  %v8527_v51 = vadd.f32 %v8313_v56, %v2312_v40  ;;  %v8544_v56 = vsel %vm2640_vm4, %v2930_v33, %v8533_v9  ;;  %v5995_v33 = vld [vmem:[%s9241_s4 + $0x230] sm:$0xff]  }
 0x248   : > { %v2314_v17 = vpop.f32.mrf.mxu1  ;;  %v8531_v5 = vpop.f32.mrf.mxu0 }
 0x249   : > { %3377 = vmatmul.mubr.bf16.gmra.mxu0 %v8518_v15 }
 0x24a   : > { %3384 = vmatprep.mubr.bf16.mxu0 %v8058_v32  ;;  %v2315_v55 = vpop.f32.mrf.mxu1  ;;  %v8535_v58 = vpop.f32.mrf.mxu0 }
 0x24b   : > { %5645 = vmatmul.mubr.bf16.gmra.mxu1 %v8515_v8  ;;  %9849 = vst [vmem:[#allocation55_spill] sm:$0xff] %v8535_v58  ;;  %v8538_v19 = vadd.f32 %v8325_v46, %v2315_v55  ;;  %v9853_v46 = vld [vmem:[#allocation11_spill] sm:$0xff] }
 0x24c   : > { %3908 = vmatprep.mubr.bf16.mxu1 %v9848_v42  ;;  %v2317_v8 = vpop.f32.mrf.mxu1  ;;  %v8540_v61 = vpop.f32.mrf.mxu0  ;;  %v9851_v42 = vld [vmem:[#allocation13_spill] sm:$0xff] }
 0x24d   : > { %9850 = vst [vmem:[#allocation20_spill] sm:$0xff] %v8540_v61 }
 0x24e   : > { %v2320_v40 = vpop.f32.mrf.mxu1  ;;  %v8547_v17 = vpop.f32.mrf.mxu0 }
 0x24f   : > { %9852 = vst [vmem:[#allocation21_spill] sm:$0xff] %v8547_v17  ;;  %v8551_v44 = vadd.f32 %v8380_v21, %v2320_v40 }
 0x250   : > { %v2322_v8 = vpop.f32.mrf.mxu1  ;;  %v8556_v60 = vpop.f32.mrf.mxu0 }
 0x251   : > { %3385 = vmatmul.mubr.bf16.gmra.mxu0 %v8544_v56  ;;  %9854 = vst [vmem:[#allocation12_spill] sm:$0xff] %v8556_v60  ;;  %v9857_v8 = vld [vmem:[#allocation18_spill] sm:$0xff] }
 0x252   : > { %5664 = vmatprep.mubr.bf16.mxu0 %v8117_v26  ;;  %v2323_v55 = vpop.f32.mrf.mxu1  ;;  %v5996_v26 = vld [vmem:[%s9241_s4 + $0x228] sm:$0xff]  }
 0x253   : > { %3909 = vmatmul.mubr.bf16.vlgmr.msra.gmra.mxu1 %v9851_v42  ;;  %v8561_v42 = vpop.f32.mrf.mxu0  ;;  %v8564_v21 = vadd.f32 %v8402_v1, %v2323_v55  ;;  %v9858_v1 = vld [vmem:[#allocation16_spill] sm:$0xff] }
 0x254   : > { %5784 = vmatpush3.bf16.msra.mxu1 %v8420_v57  ;;  %3916 = vmatprep.mubr.bf16.mxu1 %v9853_v46  ;;  %9855 = vst [vmem:[#allocation13_spill] sm:$0xff] %v8561_v42  ;;  %v2325_v57 = vpop.f32.mrf.mxu1 }
 0x255   : > { %5777 = vmatprep.subr.bf16.mxu1 %v5995_v33  ;;  %v8569_v40 = vpop.f32.mrf.mxu0 }
 0x256   : > { %9856 = vst [vmem:[#allocation11_spill] sm:$0xff] %v8569_v40  ;;  %v2328_v46 = vpop.f32.mrf.mxu1 }
 0x257   : > { %v3202_v17 = vpop.f32.mrf.mxu0  ;;  %v8574_v42 = vadd.f32 %v8359_v14, %v2328_v46  ;;  %v9859_v46 = vld [vmem:[#allocation65_spill] sm:$0xff] }
 0x258   : > { %5785 = vmatpush3.bf16.msra.mxu1 %v5995_v33  ;;  %v8578_v33 = vadd.f32 %v3202_v17, %v8007_v0  ;;  %v2330_v55 = vpop.f32.mrf.mxu1 }
 0x259   : > { %5778 = vmatprep.subr.bf16.mxu1 %v5996_v26  ;;  %5665 = vmatmul.mubr.bf16.vlgmr.msra.gmra.mxu0 %v8129_v2  ;;  %v3204_v57 = vpop.f32.mrf.mxu0  ;;  %v9860_v55 = vld [vmem:[#allocation27_spill] sm:$0xff] }
 0x25a   : > { %5668 = vmatprep.mubr.bf16.mxu0 %v8164_v10  ;;  %v2331_v40 = vpop.f32.mrf.mxu1  ;;  %v5998_v10 = vld [vmem:[%s9241_s4 + $0x218] sm:$0xff]  }
 0x25b   : > { %3917 = vmatmul.mubr.bf16.gmra.mxu1 %v9857_v8  ;;  %v5997_v8 = vld [vmem:[%s9241_s4 + $0x220] sm:$0xff]   ;;  %v3205_v2 = vpop.f32.mrf.mxu0  ;;  %v8585_v14 = vadd.f32 %v8393_v24, %v2331_v40  ;;  %v9861_v40 = vld [vmem:[#allocation15_spill] sm:$0xff] }
 0x25c   : > { %3924 = vmatprep.mubr.bf16.mxu1 %v9858_v1  ;;  %5786 = vmatpush3.bf16.msra.mxu1 %v5996_v26  ;;  %v8588_v1 = vadd.f32 %v3205_v2, %v9859_v46  ;;  %v2333_v0 = vpop.f32.mrf.mxu1  ;;  %v9862_v2 = vld [vmem:[#allocation19_spill] sm:$0xff] }
 0x25d   : > { %5779 = vmatprep.subr.bf16.mxu1 %v5997_v8  ;;  %v3207_v17 = vpop.f32.mrf.mxu0 }
 0x25e   : > { %v2336_v26 = vpop.f32.mrf.mxu1  ;;  %v5999_v17 = vld [vmem:[%s9241_s4 + $0x210] sm:$0xff]  }
 0x25f   : > { %v3210_v57 = vpop.f32.mrf.mxu0  ;;  %v8596_v24 = vadd.f32 %v8433_v18, %v2336_v26 }
 0x260   : > { %5787 = vmatpush3.bf16.msra.mxu1 %v5997_v8  ;;  %v8600_v46 = vadd.f32 %v3210_v57, %v9862_v2  ;;  %v2338_v8 = vpop.f32.mrf.mxu1  ;;  %v9863_v2 = vld [vmem:[#allocation23_spill] sm:$0xff] }
 0x261   : > { %5780 = vmatprep.subr.bf16.mxu1 %v5998_v10  ;;  %5669 = vmatmul.mubr.bf16.gmra.mxu0 %v8176_v48  ;;  %v3212_v0 = vpop.f32.mrf.mxu0 }
 0x262   : > { %5672 = vmatprep.mubr.bf16.mxu0 %v8200_v49  ;;  %v6000_v49 = vld [vmem:[%s9241_s4 + $0x208] sm:$0xff]   ;;  %v9864_v0 = vld [vmem:[#allocation24_spill] sm:$0xff] }
 0x263   : > { %3925 = vmatmul.mubr.bf16.gmra.mxu1 %v9860_v55  ;;  %v2339_v55 = vpop.f32.mrf.mxu1  ;;  %v3213_v48 = vpop.f32.mrf.mxu0 }
 0x264   : > { %3932 = vmatprep.mubr.bf16.mxu1 %v9861_v40  ;;  %5788 = vmatpush3.bf16.msra.mxu1 %v5998_v10  ;;  %v8607_v18 = vadd.f32 %v8442_v34, %v2339_v55  ;;  %v8610_v26 = vadd.f32 %v3213_v48, %v8079_v37  ;;  %v6001_v48 = vld [vmem:[%s9241_s4 + $0x200] sm:$0xff]  }
 0x265   : > { %5781 = vmatprep.subr.bf16.mxu1 %v5999_v17  ;;  %v2341_v57 = vpop.f32.mrf.mxu1  ;;  %v3215_v40 = vpop.f32.mrf.mxu0 }
 0x267   : > { %v2344_v10 = vpop.f32.mrf.mxu1  ;;  %v3218_v8 = vpop.f32.mrf.mxu0 }
 0x268   : > { %5789 = vmatpush3.bf16.msra.mxu1 %v5999_v17  ;;  %v8618_v34 = vadd.f32 %v8407_v3, %v2344_v10  ;;  %v8622_v37 = vadd.f32 %v3218_v8, %v8100_v53 }
 0x269   : > { %5782 = vmatprep.subr.bf16.mxu1 %v6000_v49  ;;  %5673 = vmatmul.mubr.bf16.gmra.mxu0 %v8215_v62  ;;  %v2346_v17 = vpop.f32.mrf.mxu1  ;;  %v3220_v55 = vpop.f32.mrf.mxu0 }
 0x26a   : > { %5676 = vmatprep.mubr.bf16.mxu0 %v8244_v16 }
 0x26b   : > { %3933 = vmatmul.mubr.bf16.gmra.mxu1 %v9863_v2  ;;  %v2347_v57 = vpop.f32.mrf.mxu1  ;;  %v3221_v62 = vpop.f32.mrf.mxu0  ;;  %v9865_v2 = vld [vmem:[#allocation6_spill] sm:$0xff] }
 0x26c   : > { %3940 = vmatprep.mubr.bf16.mxu1 %v9864_v0  ;;  %5790 = vmatpush3.bf16.msra.mxu1 %v6000_v49  ;;  %v8629_v3 = vadd.f32 %v8440_v45, %v2347_v57  ;;  %v8632_v40 = vadd.f32 %v3221_v62, %v8139_v28  ;;  %v9866_v0 = vld [vmem:[#allocation64_spill] sm:$0xff] }
 0x26d   : > { %5783 = vmatprep.subr.bf16.mxu1 %v6001_v48  ;;  %v2349_v53 = vpop.f32.mrf.mxu1  ;;  %v3223_v10 = vpop.f32.mrf.mxu0 }
 0x26e   : > { %v9867_v10 = vld [vmem:[#allocation8_spill] sm:$0xff] }
 0x26f   : > { %v2352_v16 = vpop.f32.mrf.mxu1  ;;  %v3226_v49 = vpop.f32.mrf.mxu0 }
 0x270   : > { %5791 = vmatpush3.bf16.msra.mxu1 %v6001_v48  ;;  %v8637_v8 = vadd.f32 %v8475_v36, %v2352_v16  ;;  %v8641_v45 = vadd.f32 %v3226_v49, %v8179_v11 }
 0x271   : > { %5677 = vmatmul.mubr.bf16.gmra.mxu0 %v8258_v30  ;;  %v2354_v28 = vpop.f32.mrf.mxu1  ;;  %v3228_v17 = vpop.f32.mrf.mxu0 }
 0x272   : > { %5680 = vmatprep.mubr.bf16.mxu0 %v8288_v22  ;;  %v9868_v22 = vld [vmem:[#allocation5_spill] sm:$0xff] }
 0x273   : > { %3941 = vmatmul.mubr.bf16.gmra.mxu1 %v9865_v2  ;;  %v2355_v55 = vpop.f32.mrf.mxu1  ;;  %v3229_v48 = vpop.f32.mrf.mxu0 }
 0x274   : > { %3948 = vmatprep.mubr.bf16.mxu1 %v9866_v0  ;;  %v8645_v57 = vadd.f32 %v8482_v23, %v2355_v55  ;;  %v8648_v62 = vadd.f32 %v3229_v48, %v8193_v43  ;;  %v9869_v48 = vld [vmem:[#allocation34_spill] sm:$0xff] }
 0x275   : > { %v2357_v30 = vpop.f32.mrf.mxu1  ;;  %v3231_v36 = vpop.f32.mrf.mxu0 }
 0x276   : > { %v9871_v36 = vld [vmem:[#allocation7_spill] sm:$0xff] }
 0x277   : > { %v2360_v53 = vpop.f32.mrf.mxu1  ;;  %v3234_v16 = vpop.f32.mrf.mxu0 }
 0x278   : > { %v8653_v11 = vadd.f32 %v8467_v52, %v2360_v53  ;;  %v8657_v2 = vadd.f32 %v3234_v16, %v8225_v54  ;;  %v9870_v54 = vld [vmem:[#allocation42_spill] sm:$0xff] }
 0x279   : > { %5681 = vmatmul.mubr.bf16.gmra.mxu0 %v8300_v7  ;;  %v2362_v43 = vpop.f32.mrf.mxu1  ;;  %v3236_v23 = vpop.f32.mrf.mxu0  ;;  %v9872_v53 = vld [vmem:[#allocation58_spill] sm:$0xff] }
 0x27a   : > { %5684 = vmatprep.mubr.bf16.mxu0 %v8328_v6  ;;  %v9873_v23 = vld [vmem:[#allocation38_spill] sm:$0xff] }
 0x27b   : > { %3949 = vmatmul.mubr.bf16.gmra.mxu1 %v9867_v10  ;;  %v2363_v49 = vpop.f32.mrf.mxu1  ;;  %v3237_v0 = vpop.f32.mrf.mxu0 }
 0x27c   : > { %3956 = vmatprep.mubr.bf16.mxu1 %v9868_v22  ;;  %v8661_v28 = vadd.f32 %v8477_v27, %v2363_v49  ;;  %v8664_v17 = vadd.f32 %v3237_v0, %v8236_v41 }
 0x27d   : > { %v2365_v7 = vpop.f32.mrf.mxu1  ;;  %v3239_v52 = vpop.f32.mrf.mxu0 }
 0x27e   : > { %v9874_v52 = vld [vmem:[#allocation40_spill] sm:$0xff] }
 0x27f   : > { %v2368_v55 = vpop.f32.mrf.mxu1  ;;  %v3242_v30 = vpop.f32.mrf.mxu0 }
 0x280   : > { %v8669_v6 = vadd.f32 %v8504_v47, %v2368_v55  ;;  %v8673_v10 = vadd.f32 %v3242_v30, %v9872_v53  ;;  %v9877_v30 = vld [vmem:[#allocation57_spill] sm:$0xff] }
 0x281   : > { %5685 = vmatmul.mubr.bf16.gmra.mxu0 %v9870_v54  ;;  %v2370_v41 = vpop.f32.mrf.mxu1  ;;  %v3244_v27 = vpop.f32.mrf.mxu0 }
 0x282   : > { %5688 = vmatprep.mubr.bf16.mxu0 %v8370_v4  ;;  %v9876_v4 = vld [vmem:[#allocation17_spill] sm:$0xff] }
 0x283   : > { %3957 = vmatmul.mubr.bf16.gmra.mxu1 %v9869_v48  ;;  %v2371_v16 = vpop.f32.mrf.mxu1  ;;  %v3245_v22 = vpop.f32.mrf.mxu0  ;;  %v9875_v48 = vld [vmem:[#allocation59_spill] sm:$0xff] }
 0x284   : > { %3964 = vmatprep.mubr.bf16.mxu1 %v9871_v36  ;;  %v8677_v43 = vadd.f32 %v8511_v63, %v2371_v16  ;;  %v8680_v49 = vadd.f32 %v3245_v22, %v9873_v23  ;;  %v9878_v36 = vld [vmem:[#allocation60_spill] sm:$0xff]  ;;  %v9879_v16 = vld [vmem:[#allocation43_spill] sm:$0xff] }
 0x285   : > { %v2373_v0 = vpop.f32.mrf.mxu1  ;;  %v3247_v47 = vpop.f32.mrf.mxu0 }
 0x286   : > { %v5961_v0 = vld [vmem:[%s9243_s6 + $0x38] sm:$0xff]  }
 0x287   : > { %v8682_v7 = vpop.f32.mrf.mxu1  ;;  %v3250_v55 = vpop.f32.mrf.mxu0  ;;  %5712 = vmatprep.subr.bf16.mxu0 %v5961_v0 }
 0x288   : > { %v8688_v54 = vadd.f32 %v3250_v55, %v9877_v30  ;;  %v9880_v55 = vld [vmem:[#allocation39_spill] sm:$0xff]  ;;  %v9882_v30 = vld [vmem:[#allocation14_spill] sm:$0xff]  ;;  %5713 = vmatpush3.bf16.msra.mxu0 %v5961_v0 }
 0x289   : > { %5689 = vmatmul.mubr.bf16.gmra.mxu0 %v9875_v48  ;;  %v2378_v63 = vpop.f32.mrf.mxu1  ;;  %v3252_v53 = vpop.f32.mrf.mxu0  ;;  %v5963_v0 = vld [vmem:[%s9243_s6 + $0x28] sm:$0xff]  }
 0x28a   : > { %5692 = vmatprep.mubr.bf16.mxu0 %v9878_v36  ;;  %v9883_v36 = vld [vmem:[#allocation61_spill] sm:$0xff] }
 0x28b   : > { %3965 = vmatmul.mubr.bf16.gmra.mxu1 %v9874_v52  ;;  %v8691_v41 = vpop.f32.mrf.mxu1  ;;  %v3253_v27 = vpop.f32.mrf.mxu0 }
 0x28c   : > { %3972 = vmatprep.mubr.bf16.mxu1 %v9876_v4  ;;  %v8694_v22 = vadd.f32 %v3253_v27, %v9879_v16  ;;  %v9881_v4 = vld [vmem:[#allocation46_spill] sm:$0xff] }
 0x28d   : > { %v2381_v23 = vpop.f32.mrf.mxu1  ;;  %v3255_v47 = vpop.f32.mrf.mxu0 }
 0x28e   : > { %v5962_v23 = vld [vmem:[%s9243_s6 + $0x30] sm:$0xff]  }
 0x28f   : > { %v8699_v52 = vpop.f32.mrf.mxu1  ;;  %v3258_v48 = vpop.f32.mrf.mxu0  ;;  %5714 = vmatprep.subr.bf16.mxu0 %v5962_v23 }
 0x290   : > { %v8705_v63 = vadd.f32 %v3258_v48, %v9883_v36  ;;  %5715 = vmatpush3.bf16.msra.mxu0 %v5962_v23 }
 0x291   : > { %5693 = vmatmul.mubr.bf16.gmra.mxu0 %v9881_v4  ;;  %v2386_v53 = vpop.f32.mrf.mxu1  ;;  %v3260_v27 = vpop.f32.mrf.mxu0  ;;  %5716 = vmatprep.subr.bf16.mxu0 %v5963_v0 }
 0x292   : > { %5696 = vmatprep.mubr.bf16.mxu0 %v8449_v59  ;;  %v9886_v59 = vld [vmem:[#allocation22_spill] sm:$0xff]  ;;  %v9887_v53 = vld [vmem:[#allocation31_spill] sm:$0xff]  ;;  %v5964_v27 = vld [vmem:[%s9243_s6 + $0x20] sm:$0xff]  }
 0x293   : > { %3973 = vmatmul.mubr.bf16.gmra.mxu1 %v9880_v55  ;;  %v8708_v16 = vpop.f32.mrf.mxu1  ;;  %v3261_v47 = vpop.f32.mrf.mxu0  ;;  %v9884_v55 = vld [vmem:[#allocation45_spill] sm:$0xff] }
 0x294   : > { %3980 = vmatprep.mubr.bf16.mxu1 %v9882_v30  ;;  %v8714_v60 = vadd.f32 %v3261_v47, %v9884_v55  ;;  %v9888_v47 = vld [vmem:[#allocation48_spill] sm:$0xff]  ;;  %5717 = vmatpush3.bf16.msra.mxu0 %v5963_v0 }
 0x295   : > { %v2389_v4 = vpop.f32.mrf.mxu1  ;;  %v3263_v30 = vpop.f32.mrf.mxu0  ;;  %5718 = vmatprep.subr.bf16.mxu0 %v5964_v27 }
 0x297   : > { %v8716_v48 = vpop.f32.mrf.mxu1  ;;  %v3266_v36 = vpop.f32.mrf.mxu0 }
 0x298   : > { %9885 = vst [vmem:[#allocation18_spill] sm:$0xff] %v8716_v48  ;;  %v8728_v55 = vadd.f32 %v3266_v36, %v9888_v47  ;;  %5719 = vmatpush3.bf16.msra.mxu0 %v5964_v27  ;;  %v9891_v36 = vld [vmem:[#allocation72_spill] sm:$0xff] }
 0x299   : > { %5697 = vmatmul.mubr.bf16.gmra.mxu0 %v8461_v20  ;;  %v2394_v23 = vpop.f32.mrf.mxu1  ;;  %v3268_v4 = vpop.f32.mrf.mxu0  ;;  %v9889_v20 = vld [vmem:[#allocation50_spill] sm:$0xff] }
 0x29a   : > { %5700 = vmatprep.mubr.bf16.mxu0 %v8485_v13  ;;  %v9892_v13 = vld [vmem:[#allocation37_spill] sm:$0xff]  ;;  %v5965_v4 = vld [vmem:[%s9243_s6 + $0x18] sm:$0xff]  }
 0x29b   : > { %3981 = vmatmul.mubr.bf16.gmra.mxu1 %v9886_v59  ;;  %v8731_v30 = vpop.f32.mrf.mxu1  ;;  %v3269_v59 = vpop.f32.mrf.mxu0  ;;  %5720 = vmatprep.subr.bf16.mxu0 %v5965_v4 }
 0x29c   : > { %3988 = vmatprep.mubr.bf16.mxu1 %v9887_v53  ;;  %v8734_v58 = vadd.f32 %v3269_v59, %v9889_v20  ;;  %5721 = vmatpush3.bf16.msra.mxu0 %v5965_v4  ;;  %v9896_v4 = vld [vmem:[#allocation63_spill] sm:$0xff] }
 0x29d   : > { %v2397_v53 = vpop.f32.mrf.mxu1  ;;  %v3271_v48 = vpop.f32.mrf.mxu0 }
 0x29e   : > { %v5967_v53 = vld [vmem:[%s9243_s6 + $0x8] sm:$0xff]  }
 0x29f   : > { %v8736_v61 = vpop.f32.mrf.mxu1  ;;  %v3274_v47 = vpop.f32.mrf.mxu0 }
 0x2a0   : > { %9890 = vst [vmem:[#allocation16_spill] sm:$0xff] %v8736_v61  ;;  %v8742_v0 = vadd.f32 %v3274_v47, %v8471_v12  ;;  %v5966_v12 = vld [vmem:[%s9243_s6 + $0x10] sm:$0xff]   ;;  %v9899_v61 = vld [vmem:[#allocation28_spill] sm:$0xff] }
 0x2a1   : > { %5701 = vmatmul.mubr.bf16.gmra.mxu0 %v8492_v50  ;;  %v2402_v23 = vpop.f32.mrf.mxu1  ;;  %v3276_v59 = vpop.f32.mrf.mxu0  ;;  %5722 = vmatprep.subr.bf16.mxu0 %v5966_v12 }
 0x2a2   : > { %5723 = vmatpush3.bf16.msra.mxu0 %v5966_v12 }
 0x2a3   : > { %3989 = vmatmul.mubr.bf16.gmra.mxu1 %v9891_v36  ;;  %v8747_v48 = vpop.f32.mrf.mxu1  ;;  %v3277_v27 = vpop.f32.mrf.mxu0  ;;  %5724 = vmatprep.subr.bf16.mxu0 %v5967_v53 }
 0x2a4   : > { %3996 = vmatprep.mubr.bf16.mxu1 %v9892_v13  ;;  %9893 = vst [vmem:[#allocation65_spill] sm:$0xff] %v8747_v48  ;;  %v8750_v20 = vadd.f32 %v3277_v27, %v8480_v25  ;;  %v9895_v13 = vld [vmem:[#allocation30_spill] sm:$0xff]  ;;  %v5968_v27 = vld [vmem:[%s9243_s6] sm:$0xff]  }
 0x2a5   : > { %v2405_v50 = vpop.f32.mrf.mxu1  ;;  %v3279_v36 = vpop.f32.mrf.mxu0 }
 0x2a6   : > { %5725 = vmatpush3.bf16.msra.mxu0 %v5967_v53 }
 0x2a7   : > { %v3282_v23 = vpop.f32.mrf.mxu0  ;;  %5726 = vmatprep.subr.bf16.mxu0 %v5968_v27 }
 0x2a8   : > { %v8763_v25 = vadd.f32 %v3282_v23, %v8500_v31  ;;  %v9898_v31 = vld [vmem:[#allocation32_spill] sm:$0xff] }
 0x2a9   : > { %v8758_v47 = vpop.f32.mrf.mxu1  ;;  %v3284_v50 = vpop.f32.mrf.mxu0 }
 0x2aa   : > { %9894 = vst [vmem:[#allocation27_spill] sm:$0xff] %v8758_v47  ;;  %5727 = vmatpush3.bf16.msra.mxu0 %v5968_v27  ;;  %v9900_v27 = vld [vmem:[#allocation35_spill] sm:$0xff] }
 0x2ab   : > { %3997 = vmatmul.mubr.bf16.gmra.mxu1 %v9895_v13  ;;  %v2410_v59 = vpop.f32.mrf.mxu1  ;;  %v3285_v47 = vpop.f32.mrf.mxu0 }
 0x2ac   : > { %4004 = vmatprep.mubr.bf16.mxu1 %v9896_v4  ;;  %v8771_v13 = vadd.f32 %v3285_v47, %v8509_v35 }
 0x2ad   : > { %v8768_v36 = vpop.f32.mrf.mxu1  ;;  %v3287_v12 = vpop.f32.mrf.mxu0 }
 0x2ae   : > { %9897 = vst [vmem:[#allocation15_spill] sm:$0xff] %v8768_v36 }
 0x2af   : > { %v2413_v48 = vpop.f32.mrf.mxu1  ;;  %v3290_v23 = vpop.f32.mrf.mxu0 }
 0x2b0   : > { %v8779_v50 = vadd.f32 %v3290_v23, %v8527_v51  ;;  %v9901_v23 = vld [vmem:[#allocation47_spill] sm:$0xff] }
 0x2b1   : > { %v5602_v4 = vpop.f32.mrf.mxu1  ;;  %v3292_v36 = vpop.f32.mrf.mxu0 }
 0x2b2   : > { %v8775_v59 = vadd.f32 %v5602_v4, %v8600_v46 }
 0x2b3   : > { %4005 = vmatmul.mubr.bf16.gmra.mxu1 %v9898_v31  ;;  %v3427_v53 = vpop.f32.mrf.mxu1  ;;  %v3293_v47 = vpop.f32.mrf.mxu0 }
 0x2b4   : > { %4012 = vmatprep.mubr.bf16.mxu1 %v9899_v61  ;;  %v8782_v35 = vadd.f32 %v3427_v53, %v8578_v33  ;;  %v8788_v31 = vadd.f32 %v3293_v47, %v8538_v19 }
 0x2b5   : > { %v5603_v48 = vpop.f32.mrf.mxu1  ;;  %v3295_v4 = vpop.f32.mrf.mxu0 }
 0x2b6   : > { %v8785_v12 = vadd.f32 %v5603_v48, %v8610_v26 }
 0x2b7   : > { %v3430_v46 = vpop.f32.mrf.mxu1  ;;  %v3298_v36 = vpop.f32.mrf.mxu0 }
 0x2b8   : > { %v8791_v61 = vadd.f32 %v3430_v46, %v8588_v1  ;;  %v8799_v26 = vadd.f32 %v3298_v36, %v8551_v44  ;;  %v9902_v36 = vld [vmem:[#allocation56_spill] sm:$0xff] }
 0x2b9   : > { %v3300_v19 = vpop.f32.mrf.mxu0 }
 0x2bb   : > { %v5606_v51 = vpop.f32.mrf.mxu1  ;;  %4013 = vmatmul.mubr.bf16.gmra.mxu1 %v9900_v27  ;;  %v3301_v1 = vpop.f32.mrf.mxu0 }
 0x2bc   : > { %v8795_v33 = vadd.f32 %v5606_v51, %v8641_v45  ;;  %4020 = vmatprep.mubr.bf16.mxu1 %v9901_v23  ;;  %v8808_v4 = vadd.f32 %v3301_v1, %v8564_v21 }
 0x2bd   : > { %v3443_v53 = vpop.f32.mrf.mxu1  ;;  %v3303_v51 = vpop.f32.mrf.mxu0 }
 0x2be   : > { %v8802_v48 = vadd.f32 %v3443_v53, %v8622_v37  ;;  %v9903_v53 = vld [vmem:[#allocation49_spill] sm:$0xff] }
 0x2bf   : > { %v5607_v47 = vpop.f32.mrf.mxu1 }
 0x2c0   : > { %v8805_v46 = vadd.f32 %v5607_v47, %v8648_v62 }
 0x2c1   : > { %v3446_v45 = vpop.f32.mrf.mxu1  ;;  %v3306_v23 = vpop.f32.mrf.mxu0 }
 0x2c2   : > { %v8811_v27 = vadd.f32 %v3446_v45, %v8632_v40  ;;  %v3307_v62 = vadd.f32 %v3306_v23, %v8574_v42  ;;  %v9904_v42 = vld [vmem:[#allocation44_spill] sm:$0xff] }
 0x2c3   : > { %v5610_v44 = vpop.f32.mrf.mxu1  ;;  %4021 = vmatmul.mubr.bf16.gmra.mxu1 %v9902_v36  ;;  %v3308_v47 = vpop.f32.mrf.mxu0 }
 0x2c4   : > { %v8815_v37 = vadd.f32 %v5610_v44, %v8673_v10  ;;  %4028 = vmatprep.mubr.bf16.mxu1 %v9903_v53 }
 0x2c5   : > { %v3459_v19 = vpop.f32.mrf.mxu1  ;;  %v3309_v51 = vpop.f32.mrf.mxu0 }
 0x2c6   : > { %v8820_v21 = vadd.f32 %v3459_v19, %v8657_v2  ;;  %v8826_v45 = vadd.f32 %v3309_v51, %v8585_v14  ;;  %v9905_v19 = vld [vmem:[#allocation10_spill] sm:$0xff] }
 0x2c7   : > { %v5611_v1 = vpop.f32.mrf.mxu1  ;;  %v3311_v10 = vpop.f32.mrf.mxu0 }
 0x2c8   : > { %v8823_v40 = vadd.f32 %v5611_v1, %v8680_v49 }
 0x2c9   : > { %v3462_v36 = vpop.f32.mrf.mxu1  ;;  %v3314_v23 = vpop.f32.mrf.mxu0 }
 0x2ca   : > { %v8829_v44 = vadd.f32 %v3462_v36, %v8664_v17  ;;  %v8837_v49 = vadd.f32 %v3314_v23, %v8596_v24  ;;  %v9907_v23 = vld [vmem:[#allocation62_spill] sm:$0xff] }
 0x2cb   : > { %v5614_v53 = vpop.f32.mrf.mxu1  ;;  %4029 = vmatmul.mubr.bf16.gmra.mxu1 %v9904_v42  ;;  %v3316_v14 = vpop.f32.mrf.mxu0 }
 0x2cc   : > { %v8833_v2 = vadd.f32 %v5614_v53, %v8705_v63  ;;  %4036 = vmatprep.mubr.bf16.mxu1 %v9905_v19 }
 0x2cd   : > { %v3475_v47 = vpop.f32.mrf.mxu1  ;;  %v3317_v17 = vpop.f32.mrf.mxu0 }
 0x2ce   : > { %v8840_v1 = vadd.f32 %v3475_v47, %v8688_v54  ;;  %v8846_v10 = vadd.f32 %v3317_v17, %v8607_v18  ;;  %v9908_v47 = vld [vmem:[#allocation33_spill] sm:$0xff] }
 0x2cf   : > { %v5615_v51 = vpop.f32.mrf.mxu1  ;;  %v3319_v53 = vpop.f32.mrf.mxu0 }
 0x2d0   : > { %v8843_v36 = vadd.f32 %v5615_v51, %v8714_v60 }
 0x2d1   : > { %v3478_v63 = vpop.f32.mrf.mxu1  ;;  %v3322_v19 = vpop.f32.mrf.mxu0 }
 0x2d2   : > { %9906 = vst [vmem:[#allocation19_spill] sm:$0xff] %v8843_v36  ;;  %v8849_v42 = vadd.f32 %v3478_v63, %v8694_v22  ;;  %v3323_v60 = vadd.f32 %v3322_v19, %v8618_v34 }
 0x2d3   : > { %v5618_v24 = vpop.f32.mrf.mxu1  ;;  %4037 = vmatmul.mubr.bf16.gmra.mxu1 %v9907_v23  ;;  %v3324_v51 = vpop.f32.mrf.mxu0 }
 0x2d4   : > { %v8853_v54 = vadd.f32 %v5618_v24, %v8742_v0  ;;  %4044 = vmatprep.mubr.bf16.mxu1 %v9908_v47  ;;  %v9909_v47 = vld [vmem:[#allocation51_spill] sm:$0xff] }
 0x2d5   : > { %v3491_v14 = vpop.f32.mrf.mxu1  ;;  %v3325_v53 = vpop.f32.mrf.mxu0 }
 0x2d6   : > { %v8858_v18 = vadd.f32 %v3491_v14, %v8728_v55  ;;  %v3326_v63 = vadd.f32 %v3325_v53, %v8629_v3 }
 0x2d7   : > { %v5619_v17 = vpop.f32.mrf.mxu1  ;;  %v3327_v36 = vpop.f32.mrf.mxu0 }
 0x2d8   : > { %v8861_v22 = vadd.f32 %v5619_v17, %v8750_v20 }
 0x2d9   : > { %v3494_v23 = vpop.f32.mrf.mxu1  ;;  %v3330_v34 = vpop.f32.mrf.mxu0 }
 0x2da   : > { %v8865_v0 = vadd.f32 %v3494_v23, %v8734_v58  ;;  %v3331_v55 = vadd.f32 %v3330_v34, %v8637_v8 }
 0x2db   : > { %v5622_v24 = vpop.f32.mrf.mxu1  ;;  %4045 = vmatmul.mubr.bf16.gmra.mxu1 %v9909_v47  ;;  %v3332_v14 = vpop.f32.mrf.mxu0 }
 0x2dc   : > { %v8869_v19 = vadd.f32 %v5622_v24, %v8779_v50  ;;  %4052 = vmatprep.mubr.bf16.mxu1 %v7994_v38 }
 0x2dd   : > { %v3507_v20 = vpop.f32.mrf.mxu1  ;;  %v3333_v51 = vpop.f32.mrf.mxu0 }
 0x2de   : > { %v8874_v3 = vadd.f32 %v3507_v20, %v8763_v25  ;;  %v3334_v17 = vadd.f32 %v3333_v51, %v8645_v57 }
 0x2df   : > { %v5623_v36 = vpop.f32.mrf.mxu1  ;;  %v3335_v23 = vpop.f32.mrf.mxu0 }
 0x2e0   : > { %v8877_v58 = vadd.f32 %v5623_v36, %v8788_v31 }
 0x2e1   : > { %v3510_v53 = vpop.f32.mrf.mxu1  ;;  %v3338_v8 = vpop.f32.mrf.mxu0 }
 0x2e2   : > { %v8881_v50 = vadd.f32 %v3510_v53, %v8771_v13  ;;  %v3339_v25 = vadd.f32 %v3338_v8, %v8653_v11 }
 0x2e3   : > { %v5626_v38 = vpop.f32.mrf.mxu1  ;;  %4053 = vmatmul.mubr.bf16.gmra.mxu1 %v8488_v29  ;;  %v3340_v31 = vpop.f32.mrf.mxu0 }
 0x2e4   : > { %v8884_v24 = vadd.f32 %v5626_v38, %v3307_v62  ;;  %4060 = vmatprep.mubr.bf16.mxu1 %v8010_v39 }
 0x2e5   : > { %v3523_v47 = vpop.f32.mrf.mxu1  ;;  %v3341_v20 = vpop.f32.mrf.mxu0 }
 0x2e6   : > { %v8889_v34 = vadd.f32 %v3523_v47, %v8799_v26  ;;  %v3342_v14 = vadd.f32 %v3341_v20, %v8661_v28  ;;  %v9911_v20 = vld [vmem:[#allocation66_spill] sm:$0xff] }
 0x2e7   : > { %v5627_v57 = vpop.f32.mrf.mxu1  ;;  %v3343_v36 = vpop.f32.mrf.mxu0 }
 0x2e8   : > { %v8892_v13 = vadd.f32 %v5627_v57, %v8826_v45  ;;  %v9913_v36 = vld [vmem:[#allocation25_spill] sm:$0xff] }
 0x2e9   : > { %v3526_v29 = vpop.f32.mrf.mxu1  ;;  %v3346_v11 = vpop.f32.mrf.mxu0 }
 0x2ea   : > { %v8896_v62 = vadd.f32 %v3526_v29, %v8808_v4  ;;  %v3347_v26 = vadd.f32 %v3346_v11, %v8669_v6 }
 0x2eb   : > { %v5630_v39 = vpop.f32.mrf.mxu1  ;;  %4061 = vmatmul.mubr.bf16.gmra.mxu1 %v8518_v15  ;;  %v3348_v45 = vpop.f32.mrf.mxu0 }
 0x2ec   : > { %v8899_v51 = vadd.f32 %v5630_v39, %v3323_v60  ;;  %4068 = vmatprep.mubr.bf16.mxu1 %v8058_v32  ;;  %v9910_v32 = vld [vmem:[#allocation52_spill] sm:$0xff]  ;;  %v9914_v45 = vld [vmem:[#allocation53_spill] sm:$0xff] }
 0x2ed   : > { %v3539_v53 = vpop.f32.mrf.mxu1  ;;  %v3349_v38 = vpop.f32.mrf.mxu0  ;;  %v2602_v31 = vadd.f32 %v9910_v32, %v8682_v7  ;;  %v2605_v7 = vadd.f32 %v9914_v45, %v8691_v41 }
 0x2ee   : > { %v8904_v23 = vadd.f32 %v3539_v53, %v8837_v49  ;;  %v3350_v4 = vadd.f32 %v3349_v38, %v8677_v43  ;;  %v3668_v43 = vrot.slane %v9913_v36, 4 }
 0x2ef   : > { %v5631_v28 = vpop.f32.mrf.mxu1  ;;  %v3351_v15 = vpop.f32.mrf.mxu0 }
 0x2f0   : > { %v8906_v8 = vadd.f32 %v5631_v28, %v3326_v63  ;;  %v9912_v63 = vld [vmem:[#allocation41_spill] sm:$0xff] }
 0x2f1   : > { %v3542_v47 = vpop.f32.mrf.mxu1  ;;  %v3354_v57 = vpop.f32.mrf.mxu0  ;;  %v3667_v29 = vrot.slane %v9912_v63, 3  ;;  %v9915_v63 = vld [vmem:[#allocation68_spill] sm:$0xff] }
 0x2f2   : > { %v8910_v60 = vadd.f32 %v3542_v47, %v8846_v10  ;;  %v3355_v39 = vadd.f32 %v3354_v57, %v2602_v31 }
 0x2f3   : > { %v5634_v6 = vpop.f32.mrf.mxu1  ;;  %4069 = vmatmul.mubr.bf16.gmra.mxu1 %v8544_v56  ;;  %v3356_v53 = vpop.f32.mrf.mxu0 }
 0x2f4   : > { %v8915_v49 = vadd.f32 %v5634_v6, %v3339_v25  ;;  %4076 = vmatprep.mubr.bf16.mxu1 %v9911_v20  ;;  %v3669_v25 = vor.u32 %v3668_v43, %v3667_v29 }
 0x2f5   : > { %v3555_v11 = vpop.f32.mrf.mxu1  ;;  %v3357_v38 = vpop.f32.mrf.mxu0 }
 0x2f6   : > { %v8920_v10 = vadd.f32 %v3555_v11, %v3331_v55  ;;  %v3358_v47 = vadd.f32 %v3357_v38, %v2605_v7  ;;  %v3670_v31 = vsel %vm2640_vm4, %v8533_v9, %v3669_v25  ;;  %v2610_v55 = vadd.f32 %v8531_v5, %v8699_v52 }
 0x2f7   : > { %v5635_v28 = vpop.f32.mrf.mxu1  ;;  %v3359_v32 = vpop.f32.mrf.mxu0 }
 0x2f8   : > { %v8924_v56 = vadd.f32 %v5635_v28, %v3342_v14  ;;  %v9919_v32 = vld [vmem:[#allocation54_spill] sm:$0xff] }
 0x2f9   : > { %v3558_v15 = vpop.f32.mrf.mxu1  ;;  %v3362_v20 = vpop.f32.mrf.mxu0 }
 0x2fa   : > { %v8926_v6 = vadd.f32 %v3558_v15, %v3334_v17  ;;  %v3363_v14 = vadd.f32 %v3362_v20, %v2610_v55  ;;  %v9916_v17 = vld [vmem:[#allocation20_spill] sm:$0xff]  ;;  %v9918_v15 = vld [vmem:[#allocation18_spill] sm:$0xff] }
 0x2fb   : > { %v5638_v57 = vpop.f32.mrf.mxu1  ;;  %4077 = vmatmul.mubr.bf16.gmra.mxu1 %v3670_v31  ;;  %v3364_v36 = vpop.f32.mrf.mxu0  ;;  %v2613_v11 = vadd.f32 %v9916_v17, %v8708_v16  ;;  %v2618_v31 = vadd.f32 %v9919_v32, %v9918_v15 }
 0x2fc   : > { %v8932_v41 = vadd.f32 %v5638_v57, %v3355_v39  ;;  %4084 = vmatprep.mubr.bf16.mxu1 %v9915_v63  ;;  %v9917_v39 = vld [vmem:[#allocation69_spill] sm:$0xff]  ;;  %v9920_v57 = vld [vmem:[#allocation70_spill] sm:$0xff] }
 0x2fd   : > { %v3571_v29 = vpop.f32.mrf.mxu1  ;;  %v3365_v9 = vpop.f32.mrf.mxu0  ;;  %v3682_v38 = vsel %vm2640_vm4, %v3669_v25, %v9917_v39  ;;  %v9925_v39 = vld [vmem:[#allocation12_spill] sm:$0xff] }
 0x2fe   : > { %v8935_v43 = vadd.f32 %v3571_v29, %v3347_v26  ;;  %v3366_v5 = vadd.f32 %v3365_v9, %v2613_v11  ;;  %v9922_v29 = vld [vmem:[#allocation55_spill] sm:$0xff] }
 0x2ff   : > { %v5639_v53 = vpop.f32.mrf.mxu1  ;;  %v3367_v7 = vpop.f32.mrf.mxu0 }
 0x300   : > { %v8939_v45 = vadd.f32 %v5639_v53, %v3358_v47  ;;  %v9924_v7 = vld [vmem:[#allocation16_spill] sm:$0xff] }
 0x301   : > { %v3574_v52 = vpop.f32.mrf.mxu1  ;;  %v3370_v55 = vpop.f32.mrf.mxu0 }
 0x302   : > { %v8941_v28 = vadd.f32 %v3574_v52, %v3350_v4  ;;  %v3371_v16 = vadd.f32 %v3370_v55, %v2618_v31  ;;  %v2621_v4 = vadd.f32 %v9922_v29, %v8731_v30  ;;  %v9928_v55 = vld [vmem:[#allocation9_spill] sm:$0xff]  ;;  %v9931_v29 = vld [vmem:[#allocation11_spill] sm:$0xff] }
 0x303   : > { %v5642_v26 = vpop.f32.mrf.mxu1  ;;  %4085 = vmatmul.mubr.bf16.gmra.mxu1 %v3682_v38  ;;  %v3372_v47 = vpop.f32.mrf.mxu0  ;;  %v2626_v38 = vadd.f32 %v9925_v39, %v9924_v7 }
 0x304   : > { %4092 = vmatprep.mubr.bf16.mxu1 %v9920_v57  ;;  %v8952_v36 = vadd.f32 %v5642_v26, %v3371_v16  ;;  %v9929_v16 = vld [vmem:[#allocation36_spill] sm:$0xff] }
 0x305   : > { %v3587_v20 = vpop.f32.mrf.mxu1  ;;  %v3373_v25 = vpop.f32.mrf.mxu0  ;;  %v3718_v47 = vshll.u32 %v9929_v16, 16 }
 0x306   : > { %v8948_v63 = vadd.f32 %v3587_v20, %v3363_v14  ;;  %v3374_v11 = vadd.f32 %v3373_v25, %v2621_v4  ;;  %v9927_v14 = vld [vmem:[#allocation26_spill] sm:$0xff]  ;;  %v3715_v20 = vshrl.u32 %v9929_v16, 16 }
 0x307   : > { %v5643_v17 = vpop.f32.mrf.mxu1  ;;  %v3375_v9 = vpop.f32.mrf.mxu0 }
 0x308   : > { %9921 = vst [vmem:[#allocation23_spill] sm:$0xff] %v8948_v63  ;;  %v8958_v15 = vadd.f32 %v5643_v17, %v3374_v11  ;;  %v3717_v39 = vrot.slane %v3715_v20, 3  ;;  %v9937_v63 = vld [vmem:[#allocation71_spill] sm:$0xff] }
 0x309   : > { %v3590_v53 = vpop.f32.mrf.mxu1  ;;  %v3378_v31 = vpop.f32.mrf.mxu0 }
 0x30a   : > { %v8954_v52 = vadd.f32 %v3590_v53, %v3366_v5  ;;  %9926 = vst [vmem:[#allocation6_spill] sm:$0xff] %v8958_v15  ;;  %v3379_v30 = vadd.f32 %v3378_v31, %v2626_v38  ;;  %v9930_v5 = vld [vmem:[#allocation65_spill] sm:$0xff]  ;;  %v9936_v15 = vld [vmem:[#allocation67_spill] sm:$0xff] }
 0x30b   : > { %v5646_v32 = vpop.f32.mrf.mxu1  ;;  %4093 = vmatmul.mubr.bf16.gmra.mxu1 %v9927_v14  ;;  %v3380_v57 = vpop.f32.mrf.mxu0  ;;  %v2629_v4 = vadd.f32 %v9931_v29, %v9930_v5  ;;  %v3720_v14 = vrot.slane %v3718_v47, 4  ;;  %v9934_v38 = vld [vmem:[#allocation21_spill] sm:$0xff] }
 0x30c   : > { %9923 = vst [vmem:[#allocation24_spill] sm:$0xff] %v8954_v52  ;;  %5704 = vmatprep.mubr.bf16.mxu1 %v9928_v55  ;;  %v9933_v55 = vld [vmem:[#allocation27_spill] sm:$0xff] }
 0x30d   : > { %v3603_v26 = vpop.f32.mrf.mxu1  ;;  %v3381_v11 = vpop.f32.mrf.mxu0  ;;  %v2634_v31 = vadd.f32 %v9934_v38, %v9933_v55  ;;  %v3721_v29 = vor.u32 %v3720_v14, %v3717_v39  ;;  %v9940_v38 = vld [vmem:[#allocation29_spill] sm:$0xff] }
 0x30e   : > { %v8966_v25 = vadd.f32 %v3603_v26, %v3379_v30  ;;  %v3382_v53 = vadd.f32 %v3381_v11, %v2629_v4  ;;  %v9938_v4 = vld [vmem:[#allocation15_spill] sm:$0xff]  ;;  %v9939_v11 = vld [vmem:[#allocation13_spill] sm:$0xff] }
 0x30f   : > { %v5647_v17 = vpop.f32.mrf.mxu1  ;;  %v3383_v7 = vpop.f32.mrf.mxu0 }
 0x310   : > { %9932 = vst [vmem:[#allocation64_spill] sm:$0xff] %v8966_v25  ;;  %v2637_v7 = vadd.f32 %v9939_v11, %v9938_v4 }
 0x311   : > { %v3606_v9 = vpop.f32.mrf.mxu1  ;;  %v3386_v16 = vpop.f32.mrf.mxu0 }
 0x312   : > { %v8970_v57 = vadd.f32 %v3606_v9, %v3382_v53  ;;  %v3387_v30 = vadd.f32 %v3386_v16, %v2634_v31 }
 0x313   : > { %v3910_v52 = vpop.f32.mrf.mxu1  ;;  %5705 = vmatmul.mubr.bf16.vlgmr.msra.gmra.mxu1 %v9936_v15  ;;  %v3388_v5 = vpop.f32.mrf.mxu0  ;;  %v3722_v15 = vsel %vm2640_vm4, %v9940_v38, %v3721_v29 }
 0x314   : > { %9935 = vst [vmem:[#allocation8_spill] sm:$0xff] %v8970_v57  ;;  %5708 = vmatprep.mubr.bf16.mxu1 %v9937_v63  ;;  %v8976_v20 = vadd.f32 %v5646_v32, %v3387_v30 }
 0x315   : > { %v3912_v26 = vpop.f32.mrf.mxu1  ;;  %v3389_v25 = vpop.f32.mrf.mxu0 }
 0x316   : > { %v3390_v55 = vadd.f32 %v3389_v25, %v2637_v7 }
 0x317   : > { %v3913_v47 = vpop.f32.mrf.mxu1  ;;  %v3391_v9 = vpop.f32.mrf.mxu0 }
 0x318   : > { %v8980_v57 = vadd.f32 %v5647_v17, %v3390_v55  ;;  %v8987_v17 = vld [vmem:[%s9242_s5] ss:$0 sm:$0xff] }
 0x319   : > { %v3915_v53 = vpop.f32.mrf.mxu1  ;;  %v5666_v31 = vpop.f32.mrf.mxu0 }
 0x31b   : > { %v3918_v63 = vpop.f32.mrf.mxu1  ;;  %5709 = vmatmul.mubr.bf16.gmra.mxu1 %v3722_v15  ;;  %v4135_v14 = vpop.f32.mrf.mxu0 }
 0x31c   : > { %v4144_v16 = vadd.f32 %v5666_v31, %v3918_v63  ;;  %v4136_v26 = vadd.f32 %v4135_v14, %v3910_v52 }
 0x31d   : > { %v3920_v39 = vpop.f32.mrf.mxu1  ;;  %v5667_v5 = vpop.f32.mrf.mxu0 }
 0x31e   : > { %v4328_v32 = vadd.f32 %v4144_v16, %v8775_v59  ;;  %v4326_v25 = vadd.f32 %v4136_v26, %v8782_v35 }
 0x31f   : > { %v3921_v30 = vpop.f32.mrf.mxu1  ;;  %v4138_v29 = vpop.f32.mrf.mxu0 }
 0x320   : > { %v4147_v4 = vadd.f32 %v5667_v5, %v3921_v30  ;;  %v4383_v7 = vadd.f32 %v8987_v17, %v4328_v32  ;;  %v4139_v55 = vadd.f32 %v4138_v29, %v3913_v47  ;;  %v4381_v59 = vadd.f32 %v8987_v17, %v4326_v25 }
 0x321   : > { %v3923_v11 = vpop.f32.mrf.mxu1  ;;  %v5670_v9 = vpop.f32.mrf.mxu0 }
 0x322   : > { %v4329_v53 = vadd.f32 %v4147_v4, %v8785_v12  ;;  %v4327_v38 = vadd.f32 %v4139_v55, %v8791_v61  ;;  %v4431_v31 = vmax.f32 %v4383_v7, 0.0  ;;  %v4429_v47 = vmax.f32 %v4381_v59, 0.0 }
 0x323   : > { %v3926_v52 = vpop.f32.mrf.mxu1  ;;  %v4151_v63 = vpop.f32.mrf.mxu0 }
 0x324   : > { %v4384_v35 = vadd.f32 %v8987_v17, %v4329_v53  ;;  %v4382_v16 = vadd.f32 %v8987_v17, %v4327_v38  ;;  %v4152_v14 = vadd.f32 %v4151_v63, %v3926_v52 }
 0x325   : > { %v3928_v15 = vpop.f32.mrf.mxu1  ;;  %v5671_v32 = vpop.f32.mrf.mxu0 }
 0x326   : > { %v4432_v39 = vmax.f32 %v4384_v35, 0.0  ;;  %v4430_v30 = vmax.f32 %v4382_v16, 0.0  ;;  %v4330_v5 = vadd.f32 %v4152_v14, %v8802_v48 }
 0x327   : > { %v3929_v26 = vpop.f32.mrf.mxu1  ;;  %v4154_v25 = vpop.f32.mrf.mxu0 }
 0x328   : > { %v4478_v12 = vpack.c.bf16 %v4432_v39, %v4431_v31  ;;  %v4477_v11 = vpack.c.bf16 %v4430_v30, %v4429_v47  ;;  %v4155_v61 = vadd.f32 %v4154_v25, %v3929_v26  ;;  %v4385_v7 = vadd.f32 %v8987_v17, %v4330_v5 }
 0x329   : > { %v3931_v4 = vpop.f32.mrf.mxu1  ;;  %v5674_v55 = vpop.f32.mrf.mxu0 }
 0x32a   : > { %5728 = vmatprep.mubr.bf16.mxu0 %v4477_v11  ;;  %v4331_v38 = vadd.f32 %v4155_v61, %v8811_v27  ;;  %v4433_v31 = vmax.f32 %v4385_v7, 0.0 }
 0x32b   : > { %v3934_v29 = vpop.f32.mrf.mxu1  ;;  %5729 = vmatmul.mubr.bf16.vlgmr.msra.gmra.mxu0 %v4478_v12  ;;  %v4167_v15 = vpop.f32.mrf.mxu0 }
 0x32c   : > { %v4160_v53 = vadd.f32 %v5670_v9, %v3934_v29  ;;  %v4386_v35 = vadd.f32 %v8987_v17, %v4331_v38 }
 0x32d   : > { %v3936_v52 = vpop.f32.mrf.mxu1  ;;  %v5675_v26 = vpop.f32.mrf.mxu0 }
 0x32e   : > { %v4332_v59 = vadd.f32 %v4160_v53, %v8795_v33  ;;  %v4434_v16 = vmax.f32 %v4386_v35, 0.0 }
 0x32f   : > { %v3937_v48 = vpop.f32.mrf.mxu1 }
 0x330   : > { %v4163_v63 = vadd.f32 %v5671_v32, %v3937_v48  ;;  %v4387_v14 = vadd.f32 %v8987_v17, %v4332_v59  ;;  %v4479_v47 = vpack.c.bf16 %v4434_v16, %v4433_v31  ;;  %v4170_v32 = vpop.f32.mrf.mxu0 }
 0x331   : > { %v3939_v39 = vpop.f32.mrf.mxu1 }
 0x332   : > { %v4333_v9 = vadd.f32 %v4163_v63, %v8805_v46  ;;  %5732 = vmatprep.mubr.bf16.mxu0 %v4479_v47  ;;  %v4435_v5 = vmax.f32 %v4387_v14, 0.0  ;;  %v5678_v38 = vpop.f32.mrf.mxu0 }
 0x333   : > { %v3942_v30 = vpop.f32.mrf.mxu1 }
 0x334   : > { %v4388_v27 = vadd.f32 %v8987_v17, %v4333_v9  ;;  %v4168_v12 = vadd.f32 %v4167_v15, %v3942_v30  ;;  %v4183_v31 = vpop.f32.mrf.mxu0 }
 0x335   : > { %v3944_v33 = vpop.f32.mrf.mxu1 }
 0x336   : > { %v4436_v4 = vmax.f32 %v4388_v27, 0.0  ;;  %v4334_v25 = vadd.f32 %v4168_v12, %v8820_v21  ;;  %v5679_v30 = vpop.f32.mrf.mxu0 }
 0x337   : > { %v3945_v11 = vpop.f32.mrf.mxu1 }
 0x338   : > { %v4480_v61 = vpack.c.bf16 %v4436_v4, %v4435_v5  ;;  %v4171_v29 = vadd.f32 %v4170_v32, %v3945_v11  ;;  %v4389_v7 = vadd.f32 %v8987_v17, %v4334_v25  ;;  %v4186_v25 = vpop.f32.mrf.mxu0 }
 0x339   : > { %v3947_v53 = vpop.f32.mrf.mxu1 }
 0x33a   : > { %v4335_v46 = vadd.f32 %v4171_v29, %v8829_v44  ;;  %5733 = vmatmul.mubr.bf16.gmra.mxu0 %v4480_v61  ;;  %v4437_v48 = vmax.f32 %v4389_v7, 0.0  ;;  %v5682_v53 = vpop.f32.mrf.mxu0 }
 0x33b   : > { %v3950_v52 = vpop.f32.mrf.mxu1 }
 0x33c   : > { %v4390_v59 = vadd.f32 %v8987_v17, %v4335_v46  ;;  %v4176_v35 = vadd.f32 %v5674_v55, %v3950_v52 }
 0x33d   : > { %v3952_v15 = vpop.f32.mrf.mxu1 }
 0x33e   : > { %v4438_v63 = vmax.f32 %v4390_v59, 0.0  ;;  %v4336_v21 = vadd.f32 %v4176_v35, %v8815_v37 }
 0x33f   : > { %v3953_v16 = vpop.f32.mrf.mxu1 }
 0x340   : > { %v4179_v39 = vadd.f32 %v5675_v26, %v3953_v16  ;;  %v4481_v14 = vpack.c.bf16 %v4438_v63, %v4437_v48  ;;  %v4391_v47 = vadd.f32 %v8987_v17, %v4336_v21  ;;  %v4199_v48 = vpop.f32.mrf.mxu0 }
 0x341   : > { %v3955_v9 = vpop.f32.mrf.mxu1 }
 0x342   : > { %v4337_v44 = vadd.f32 %v4179_v39, %v8823_v40  ;;  %5736 = vmatprep.mubr.bf16.mxu0 %v4481_v14  ;;  %v4439_v5 = vmax.f32 %v4391_v47, 0.0  ;;  %v9941_v14 = vld [vmem:[#allocation19_spill] sm:$0xff]  ;;  %v5683_v9 = vpop.f32.mrf.mxu0 }
 0x343   : > { %v3958_v27 = vpop.f32.mrf.mxu1 }
 0x344   : > { %v4392_v12 = vadd.f32 %v8987_v17, %v4337_v44  ;;  %v4184_v55 = vadd.f32 %v4183_v31, %v3958_v27 }
 0x345   : > { %v3960_v33 = vpop.f32.mrf.mxu1 }
 0x346   : > { %v4440_v4 = vmax.f32 %v4392_v12, 0.0  ;;  %v4338_v37 = vadd.f32 %v4184_v55, %v8840_v1  ;;  %v4202_v33 = vpop.f32.mrf.mxu0 }
 0x347   : > { %v3961_v32 = vpop.f32.mrf.mxu1 }
 0x348   : > { %v4482_v26 = vpack.c.bf16 %v4440_v4, %v4439_v5  ;;  %v4187_v11 = vadd.f32 %v4186_v25, %v3961_v32  ;;  %v4393_v29 = vadd.f32 %v8987_v17, %v4338_v37 }
 0x349   : > { %v3963_v61 = vpop.f32.mrf.mxu1 }
 0x34a   : > { %v4339_v40 = vadd.f32 %v4187_v11, %v8849_v42  ;;  %5737 = vmatmul.mubr.bf16.gmra.mxu0 %v4482_v26  ;;  %v4441_v35 = vmax.f32 %v4393_v29, 0.0  ;;  %v5686_v26 = vpop.f32.mrf.mxu0 }
 0x34b   : > { %v3966_v7 = vpop.f32.mrf.mxu1 }
 0x34c   : > { %v4394_v46 = vadd.f32 %v8987_v17, %v4339_v40  ;;  %v4192_v52 = vadd.f32 %v5678_v38, %v3966_v7 }
 0x34d   : > { %v3968_v59 = vpop.f32.mrf.mxu1 }
 0x34e   : > { %v4442_v15 = vmax.f32 %v4394_v46, 0.0  ;;  %v4340_v1 = vadd.f32 %v4192_v52, %v8833_v2  ;;  %v4215_v52 = vpop.f32.mrf.mxu0 }
 0x34f   : > { %v3969_v63 = vpop.f32.mrf.mxu1 }
 0x350   : > { %v4195_v21 = vadd.f32 %v5679_v30, %v3969_v63  ;;  %v4483_v31 = vpack.c.bf16 %v4442_v15, %v4441_v35  ;;  %v4395_v39 = vadd.f32 %v8987_v17, %v4340_v1  ;;  %v5687_v63 = vpop.f32.mrf.mxu0 }
 0x351   : > { %v3971_v16 = vpop.f32.mrf.mxu1 }
 0x352   : > { %v4341_v42 = vadd.f32 %v4195_v21, %v9941_v14  ;;  %5740 = vmatprep.mubr.bf16.mxu0 %v4483_v31  ;;  %v4443_v12 = vmax.f32 %v4395_v39, 0.0 }
 0x353   : > { %v3974_v47 = vpop.f32.mrf.mxu1 }
 0x354   : > { %v4396_v44 = vadd.f32 %v8987_v17, %v4341_v42  ;;  %v4200_v38 = vadd.f32 %v4199_v48, %v3974_v47  ;;  %v4218_v42 = vpop.f32.mrf.mxu0 }
 0x355   : > { %v3976_v27 = vpop.f32.mrf.mxu1 }
 0x356   : > { %v4444_v55 = vmax.f32 %v4396_v44, 0.0  ;;  %v4342_v2 = vadd.f32 %v4200_v38, %v8858_v18 }
 0x357   : > { %v3977_v5 = vpop.f32.mrf.mxu1 }
 0x358   : > { %v4484_v30 = vpack.c.bf16 %v4444_v55, %v4443_v12  ;;  %v4203_v4 = vadd.f32 %v4202_v33, %v3977_v5  ;;  %v4397_v25 = vadd.f32 %v8987_v17, %v4342_v2  ;;  %v5690_v12 = vpop.f32.mrf.mxu0 }
 0x359   : > { %v3979_v37 = vpop.f32.mrf.mxu1 }
 0x35a   : > { %v4343_v32 = vadd.f32 %v4203_v4, %v8865_v0  ;;  %5741 = vmatmul.mubr.bf16.gmra.mxu0 %v4484_v30  ;;  %v4445_v7 = vmax.f32 %v4397_v25, 0.0  ;;  %v4231_v37 = vpop.f32.mrf.mxu0 }
 0x35b   : > { %v3982_v11 = vpop.f32.mrf.mxu1 }
 0x35c   : > { %v4398_v61 = vadd.f32 %v8987_v17, %v4343_v32  ;;  %v4208_v29 = vadd.f32 %v5682_v53, %v3982_v11 }
 0x35d   : > { %v3984_v40 = vpop.f32.mrf.mxu1 }
 0x35e   : > { %v4446_v46 = vmax.f32 %v4398_v61, 0.0  ;;  %v4344_v18 = vadd.f32 %v4208_v29, %v8853_v54  ;;  %v5691_v40 = vpop.f32.mrf.mxu0 }
 0x35f   : > { %v3985_v59 = vpop.f32.mrf.mxu1 }
 0x360   : > { %v4211_v35 = vadd.f32 %v5683_v9, %v3985_v59  ;;  %v4485_v15 = vpack.c.bf16 %v4446_v46, %v4445_v7  ;;  %v4399_v48 = vadd.f32 %v8987_v17, %v4344_v18 }
 0x361   : > { %v3987_v1 = vpop.f32.mrf.mxu1 }
 0x362   : > { %v4345_v0 = vadd.f32 %v4211_v35, %v8861_v22  ;;  %5744 = vmatprep.mubr.bf16.mxu0 %v4485_v15  ;;  %v4447_v39 = vmax.f32 %v4399_v48, 0.0  ;;  %v4234_v35 = vpop.f32.mrf.mxu0 }
 0x363   : > { %v3990_v21 = vpop.f32.mrf.mxu1 }
 0x364   : > { %v4400_v31 = vadd.f32 %v8987_v17, %v4345_v0  ;;  %v4216_v53 = vadd.f32 %v4215_v52, %v3990_v21  ;;  %v5694_v21 = vpop.f32.mrf.mxu0 }
 0x365   : > { %v3992_v16 = vpop.f32.mrf.mxu1 }
 0x366   : > { %v4448_v14 = vmax.f32 %v4400_v31, 0.0  ;;  %v4346_v54 = vadd.f32 %v4216_v53, %v8874_v3 }
 0x367   : > { %v3993_v47 = vpop.f32.mrf.mxu1 }
 0x368   : > { %v4486_v9 = vpack.c.bf16 %v4448_v14, %v4447_v39  ;;  %v4219_v44 = vadd.f32 %v4218_v42, %v3993_v47  ;;  %v4401_v27 = vadd.f32 %v8987_v17, %v4346_v54  ;;  %v4247_v42 = vpop.f32.mrf.mxu0 }
 0x369   : > { %v3995_v38 = vpop.f32.mrf.mxu1 }
 0x36a   : > { %v4347_v22 = vadd.f32 %v4219_v44, %v8881_v50  ;;  %5745 = vmatmul.mubr.bf16.gmra.mxu0 %v4486_v9  ;;  %v4449_v30 = vmax.f32 %v4401_v27, 0.0 }
 0x36b   : > { %v3998_v55 = vpop.f32.mrf.mxu1 }
 0x36c   : > { %v4402_v2 = vadd.f32 %v8987_v17, %v4347_v22  ;;  %v4224_v33 = vadd.f32 %v5686_v26, %v3998_v55  ;;  %v5695_v22 = vpop.f32.mrf.mxu0 }
 0x36d   : > { %v4000_v5 = vpop.f32.mrf.mxu1 }
 0x36e   : > { %v4450_v4 = vmax.f32 %v4402_v2, 0.0  ;;  %v4348_v3 = vadd.f32 %v4224_v33, %v8869_v19 }
 0x36f   : > { %v4001_v25 = vpop.f32.mrf.mxu1 }
 0x370   : > { %v4227_v32 = vadd.f32 %v5687_v63, %v4001_v25  ;;  %v4487_v11 = vpack.c.bf16 %v4450_v4, %v4449_v30  ;;  %v4403_v29 = vadd.f32 %v8987_v17, %v4348_v3  ;;  %v4250_v4 = vpop.f32.mrf.mxu0 }
 0x371   : > { %v4003_v61 = vpop.f32.mrf.mxu1 }
 0x372   : > { %v4349_v50 = vadd.f32 %v4227_v32, %v8877_v58  ;;  %5748 = vmatprep.mubr.bf16.mxu0 %v4487_v11  ;;  %v4451_v52 = vmax.f32 %v4403_v29, 0.0  ;;  %v5698_v61 = vpop.f32.mrf.mxu0 }
 0x373   : > { %v4006_v7 = vpop.f32.mrf.mxu1 }
 0x374   : > { %v4404_v46 = vadd.f32 %v8987_v17, %v4349_v50  ;;  %v4232_v26 = vadd.f32 %v4231_v37, %v4006_v7 }
 0x375   : > { %v4008_v18 = vpop.f32.mrf.mxu1 }
 0x376   : > { %v4452_v59 = vmax.f32 %v4404_v46, 0.0  ;;  %v4350_v19 = vadd.f32 %v4232_v26, %v8889_v34  ;;  %v4263_v18 = vpop.f32.mrf.mxu0 }
 0x377   : > { %v4009_v15 = vpop.f32.mrf.mxu1 }
 0x378   : > { %v4488_v1 = vpack.c.bf16 %v4452_v59, %v4451_v52  ;;  %v4235_v48 = vadd.f32 %v4234_v35, %v4009_v15  ;;  %v4405_v63 = vadd.f32 %v8987_v17, %v4350_v19 }
 0x379   : > { %v4011_v0 = vpop.f32.mrf.mxu1 }
 0x37a   : > { %v4351_v58 = vadd.f32 %v4235_v48, %v8896_v62  ;;  %5749 = vmatmul.mubr.bf16.gmra.mxu0 %v4488_v1  ;;  %v4453_v14 = vmax.f32 %v4405_v63, 0.0  ;;  %v5699_v1 = vpop.f32.mrf.mxu0 }
 0x37b   : > { %v4014_v31 = vpop.f32.mrf.mxu1 }
 0x37c   : > { %v4406_v53 = vadd.f32 %v8987_v17, %v4351_v58  ;;  %v4240_v16 = vadd.f32 %v5690_v12, %v4014_v31 }
 0x37d   : > { %v4016_v39 = vpop.f32.mrf.mxu1 }
 0x37e   : > { %v4454_v54 = vmax.f32 %v4406_v53, 0.0  ;;  %v4352_v34 = vadd.f32 %v4240_v16, %v8884_v24  ;;  %v4266_v53 = vpop.f32.mrf.mxu0 }
 0x37f   : > { %v4017_v47 = vpop.f32.mrf.mxu1 }
 0x380   : > { %v4243_v9 = vadd.f32 %v5691_v40, %v4017_v47  ;;  %v4489_v44 = vpack.c.bf16 %v4454_v54, %v4453_v14  ;;  %v4407_v27 = vadd.f32 %v8987_v17, %v4352_v34 }
 0x381   : > { %v4019_v38 = vpop.f32.mrf.mxu1 }
 0x382   : > { %v4353_v62 = vadd.f32 %v4243_v9, %v8892_v13  ;;  %5752 = vmatprep.mubr.bf16.mxu0 %v4489_v44  ;;  %v4455_v5 = vmax.f32 %v4407_v27, 0.0 }
 0x383   : > { %v4022_v55 = vpop.f32.mrf.mxu1 }
 0x384   : > { %v4408_v2 = vadd.f32 %v8987_v17, %v4353_v62  ;;  %v4248_v12 = vadd.f32 %v4247_v42, %v4022_v55  ;;  %v5702_v42 = vpop.f32.mrf.mxu0 }
 0x385   : > { %v4024_v33 = vpop.f32.mrf.mxu1 }
 0x386   : > { %v4456_v30 = vmax.f32 %v4408_v2, 0.0  ;;  %v4354_v24 = vadd.f32 %v4248_v12, %v8904_v23 }
 0x387   : > { %v4025_v3 = vpop.f32.mrf.mxu1 }
 0x388   : > { %v4490_v37 = vpack.c.bf16 %v4456_v30, %v4455_v5  ;;  %v4251_v25 = vadd.f32 %v4250_v4, %v4025_v3  ;;  %v4409_v11 = vadd.f32 %v8987_v17, %v4354_v24 }
 0x389   : > { %v4027_v32 = vpop.f32.mrf.mxu1 }
 0x38a   : > { %v4355_v13 = vadd.f32 %v4251_v25, %v8910_v60  ;;  %5753 = vmatmul.mubr.bf16.gmra.mxu0 %v4490_v37  ;;  %v4457_v46 = vmax.f32 %v4409_v11, 0.0 }
 0x38b   : > { %v4030_v29 = vpop.f32.mrf.mxu1 }
 0x38c   : > { %v4410_v50 = vadd.f32 %v8987_v17, %v4355_v13  ;;  %v4256_v40 = vadd.f32 %v5694_v21, %v4030_v29 }
 0x38d   : > { %v4032_v7 = vpop.f32.mrf.mxu1 }
 0x38e   : > { %v4458_v26 = vmax.f32 %v4410_v50, 0.0  ;;  %v4356_v23 = vadd.f32 %v4256_v40, %v8899_v51 }
 0x38f   : > { %v4033_v52 = vpop.f32.mrf.mxu1 }
 0x390   : > { %v4259_v59 = vadd.f32 %v5695_v22, %v4033_v52  ;;  %v4491_v19 = vpack.c.bf16 %v4458_v26, %v4457_v46  ;;  %v4411_v15 = vadd.f32 %v8987_v17, %v4356_v23  ;;  %v4279_v22 = vpop.f32.mrf.mxu0 }
 0x391   : > { %v4035_v35 = vpop.f32.mrf.mxu1 }
 0x392   : > { %v4357_v60 = vadd.f32 %v4259_v59, %v8906_v8  ;;  %5756 = vmatprep.mubr.bf16.mxu0 %v4491_v19  ;;  %v4459_v21 = vmax.f32 %v4411_v15, 0.0  ;;  %v5703_v30 = vpop.f32.mrf.mxu0 }
 0x393   : > { %v4038_v48 = vpop.f32.mrf.mxu1 }
 0x394   : > { %v4412_v0 = vadd.f32 %v8987_v17, %v4357_v60  ;;  %v4264_v63 = vadd.f32 %v4263_v18, %v4038_v48  ;;  %v4282_v11 = vpop.f32.mrf.mxu0 }
 0x395   : > { %v4040_v58 = vpop.f32.mrf.mxu1 }
 0x396   : > { %v4460_v31 = vmax.f32 %v4412_v0, 0.0  ;;  %v4358_v51 = vadd.f32 %v4264_v63, %v8920_v10 }
 0x397   : > { %v4041_v16 = vpop.f32.mrf.mxu1 }
 0x398   : > { %v4492_v39 = vpack.c.bf16 %v4460_v31, %v4459_v21  ;;  %v4267_v14 = vadd.f32 %v4266_v53, %v4041_v16  ;;  %v4413_v34 = vadd.f32 %v8987_v17, %v4358_v51 }
 0x399   : > { %v4043_v54 = vpop.f32.mrf.mxu1 }
 0x39a   : > { %v4359_v8 = vadd.f32 %v4267_v14, %v8926_v6  ;;  %5757 = vmatmul.mubr.bf16.gmra.mxu0 %v4492_v39  ;;  %v4461_v27 = vmax.f32 %v4413_v34, 0.0 }
 0x39b   : > { %v4046_v47 = vpop.f32.mrf.mxu1 }
 0x39c   : > { %v4414_v9 = vadd.f32 %v8987_v17, %v4359_v8  ;;  %v4272_v44 = vadd.f32 %v5698_v61, %v4046_v47 }
 0x39d   : > { %v4048_v38 = vpop.f32.mrf.mxu1 }
 0x39e   : > { %v4462_v62 = vmax.f32 %v4414_v9, 0.0  ;;  %v4360_v10 = vadd.f32 %v4272_v44, %v8915_v49 }
 0x39f   : > { %v4049_v55 = vpop.f32.mrf.mxu1 }
 0x3a0   : > { %v4275_v2 = vadd.f32 %v5699_v1, %v4049_v55  ;;  %v4493_v12 = vpack.c.bf16 %v4462_v62, %v4461_v27  ;;  %v4415_v5 = vadd.f32 %v8987_v17, %v4360_v10  ;;  %v9942_v55 = vld [vmem:[#allocation23_spill] sm:$0xff] }
 0x3a1   : > { %v4051_v33 = vpop.f32.mrf.mxu1 }
 0x3a2   : > { %v4361_v6 = vadd.f32 %v4275_v2, %v8924_v56  ;;  %5760 = vmatprep.mubr.bf16.mxu0 %v4493_v12  ;;  %v4463_v25 = vmax.f32 %v4415_v5, 0.0 }
 0x3a3   : > { %v4054_v24 = vpop.f32.mrf.mxu1 }
 0x3a4   : > { %v4416_v4 = vadd.f32 %v8987_v17, %v4361_v6  ;;  %v4280_v3 = vadd.f32 %v4279_v22, %v4054_v24  ;;  %v9943_v6 = vld [vmem:[#allocation6_spill] sm:$0xff] }
 0x3a5   : > { %v4056_v37 = vpop.f32.mrf.mxu1 }
 0x3a6   : > { %v4464_v32 = vmax.f32 %v4416_v4, 0.0  ;;  %v4362_v49 = vadd.f32 %v4280_v3, %v8935_v43 }
 0x3a7   : > { %v4057_v13 = vpop.f32.mrf.mxu1 }
 0x3a8   : > { %v4494_v61 = vpack.c.bf16 %v4464_v32, %v4463_v25  ;;  %v4283_v29 = vadd.f32 %v4282_v11, %v4057_v13  ;;  %v4417_v40 = vadd.f32 %v8987_v17, %v4362_v49  ;;  %v9944_v25 = vld [vmem:[#allocation24_spill] sm:$0xff] }
 0x3a9   : > { %v4059_v50 = vpop.f32.mrf.mxu1 }
 0x3aa   : > { %v4363_v56 = vadd.f32 %v4283_v29, %v8941_v28  ;;  %5761 = vmatmul.mubr.bf16.gmra.mxu0 %v4494_v61  ;;  %v4465_v18 = vmax.f32 %v4417_v40, 0.0 }
 0x3ab   : > { %v4062_v7 = vpop.f32.mrf.mxu1 }
 0x3ac   : > { %v4418_v46 = vadd.f32 %v8987_v17, %v4363_v56  ;;  %v4288_v26 = vadd.f32 %v5702_v42, %v4062_v7 }
 0x3ad   : > { %v4064_v23 = vpop.f32.mrf.mxu1 }
 0x3ae   : > { %v4466_v52 = vmax.f32 %v4418_v46, 0.0  ;;  %v4364_v59 = vadd.f32 %v4288_v26, %v8932_v41  ;;  %v9945_v26 = vld [vmem:[#allocation64_spill] sm:$0xff] }
 0x3af   : > { %v4065_v43 = vpop.f32.mrf.mxu1 }
 0x3b0   : > { %v4291_v19 = vadd.f32 %v5703_v30, %v4065_v43  ;;  %v4495_v35 = vpack.c.bf16 %v4466_v52, %v4465_v18  ;;  %v4419_v60 = vadd.f32 %v8987_v17, %v4364_v59 }
 0x3b1   : > { %v4067_v15 = vpop.f32.mrf.mxu1 }
 0x3b2   : > { %v4365_v1 = vadd.f32 %v4291_v19, %v8939_v45  ;;  %5764 = vmatprep.mubr.bf16.mxu0 %v4495_v35  ;;  %v4467_v63 = vmax.f32 %v4419_v60, 0.0  ;;  %v9946_v60 = vld [vmem:[#allocation8_spill] sm:$0xff] }
 0x3b3   : > { %v4070_v28 = vpop.f32.mrf.mxu1 }
 0x3b4   : > { %v4420_v48 = vadd.f32 %v8987_v17, %v4365_v1 }
 0x3b5   : > { %v4072_v0 = vpop.f32.mrf.mxu1 }
 0x3b6   : > { %v4468_v58 = vmax.f32 %v4420_v48, 0.0 }
 0x3b7   : > { %v4073_v21 = vpop.f32.mrf.mxu1 }
 0x3b8   : > { %v4496_v31 = vpack.c.bf16 %v4468_v58, %v4467_v63 }
 0x3b9   : > { %v4075_v51 = vpop.f32.mrf.mxu1 }
 0x3ba   : > { %5765 = vmatmul.mubr.bf16.gmra.mxu0 %v4496_v31  ;;  %v9087_v51 = vld [vmem:[%s9244_s7] ss:$0 sm:$0xff] }
 0x3bb   : > { %v4078_v41 = vpop.f32.mrf.mxu1 }
 0x3bd   : > { %v4080_v53 = vpop.f32.mrf.mxu1 }
 0x3bf   : > { %v4081_v16 = vpop.f32.mrf.mxu1 }
 0x3c1   : > { %v4083_v39 = vpop.f32.mrf.mxu1 }
 0x3c2   : > { %v6003_v39 = vld [vmem:[%s6232_s20 + $0x8] sm:$0xff]  }
 0x3c3   : > { %v4086_v14 = vpop.f32.mrf.mxu1 }
 0x3c5   : > { %v4088_v54 = vpop.f32.mrf.mxu1 }
 0x3c7   : > { %v4089_v34 = vpop.f32.mrf.mxu1 }
 0x3c9   : > { %v4091_v8 = vpop.f32.mrf.mxu1 }
 0x3cb   : > { %v4094_v45 = vpop.f32.mrf.mxu1 }
 0x3cd   : > { %v4096_v42 = vpop.f32.mrf.mxu1 }
 0x3cf   : > { %v4097_v47 = vpop.f32.mrf.mxu1 }
 0x3d1   : > { %v4099_v9 = vpop.f32.mrf.mxu1 }
 0x3d3   : > { %v5706_v44 = vpop.f32.mrf.mxu1 }
 0x3d4   : > { %v4304_v38 = vadd.f32 %v5706_v44, %v4078_v41  ;;  %v6002_v41 = vld [vmem:[%s6232_s20] sm:$0xff]  }
 0x3d5   : > { %v4295_v27 = vpop.f32.mrf.mxu1  ;;  %v4781_v53 = vunpack.c.l.bf16 %v6002_v41 }
 0x3d6   : > { %v4368_v62 = vadd.f32 %v4304_v38, %v8952_v36  ;;  %v4296_v10 = vadd.f32 %v4295_v27, %v4070_v28 }
 0x3d7   : > { %v5707_v22 = vpop.f32.mrf.mxu1 }
 0x3d8   : > { %v4366_v2 = vadd.f32 %v4296_v10, %v9942_v55  ;;  %v4307_v12 = vadd.f32 %v5707_v22, %v4081_v16  ;;  %v4423_v5 = vadd.f32 %v8987_v17, %v4368_v62  ;;  %v6004_v10 = vld [vmem:[%s6232_s20 + $0x18] sm:$0xff]  }
 0x3d9   : > { %v4298_v33 = vpop.f32.mrf.mxu1  ;;  %v4785_v22 = vunpack.c.l.bf16 %v6004_v10 }
 0x3da   : > { %v4369_v30 = vadd.f32 %v4307_v12, %v9943_v6  ;;  %v4299_v24 = vadd.f32 %v4298_v33, %v4073_v21  ;;  %v4421_v3 = vadd.f32 %v8987_v17, %v4366_v2  ;;  %v4471_v11 = vmax.f32 %v4423_v5, 0.0  ;;  %v6005_v12 = vld [vmem:[%s6232_s20 + $0x10] sm:$0xff]  }
 0x3db   : > { %v5710_v4 = vpop.f32.mrf.mxu1  ;;  %v4784_v33 = vunpack.c.l.bf16 %v6005_v12 }
 0x3dc   : > { %v4424_v37 = vadd.f32 %v8987_v17, %v4369_v30  ;;  %v4367_v32 = vadd.f32 %v4299_v24, %v9944_v25  ;;  %v4320_v49 = vadd.f32 %v5710_v4, %v4094_v45  ;;  %v4469_v56 = vmax.f32 %v4421_v3, 0.0 }
 0x3dd   : > { %v4311_v36 = vpop.f32.mrf.mxu1  ;;  %v4786_v24 = vunpack.c.h.bf16 %v6004_v10 }
 0x3de   : > { %v4472_v13 = vmax.f32 %v4424_v37, 0.0  ;;  %v4422_v61 = vadd.f32 %v8987_v17, %v4367_v32  ;;  %v4312_v29 = vadd.f32 %v4311_v36, %v4086_v14  ;;  %v4372_v50 = vadd.f32 %v4320_v49, %v8976_v20 }
 0x3df   : > { %v5711_v40 = vpop.f32.mrf.mxu1  ;;  %v4783_v14 = vunpack.c.h.bf16 %v6003_v39  ;;  %v6010_v39 = vld [vmem:[%s6232_s20 + $0x48] sm:$0xff]  }
 0x3e0   : > { %v4498_v7 = vpack.c.bf16 %v4472_v13, %v4471_v11  ;;  %v4470_v46 = vmax.f32 %v4422_v61, 0.0  ;;  %v4370_v23 = vadd.f32 %v4312_v29, %v9945_v26  ;;  %v4323_v18 = vadd.f32 %v5711_v40, %v4097_v47  ;;  %v6006_v13 = vld [vmem:[%s6232_s20 + $0x28] sm:$0xff]   ;;  %v6007_v26 = vld [vmem:[%s6232_s20 + $0x20] sm:$0xff]  }
 0x3e1   : > { %v4314_v52 = vpop.f32.mrf.mxu1  ;;  %v4427_v19 = vadd.f32 %v8987_v17, %v4372_v50  ;;  %v4788_v61 = vunpack.c.l.bf16 %v6006_v13 }
 0x3e2   : > { %v4315_v59 = vadd.f32 %v4314_v52, %v4089_v34  ;;  %v4497_v43 = vpack.c.bf16 %v4470_v46, %v4469_v56  ;;  %v4373_v35 = vadd.f32 %v4323_v18, %v8980_v57  ;;  %v4425_v15 = vadd.f32 %v8987_v17, %v4370_v23 }
 0x3e3   : > { %v4475_v48 = vmax.f32 %v4427_v19, 0.0  ;;  %v4782_v34 = vunpack.c.h.bf16 %v6002_v41  ;;  %v4787_v23 = vunpack.c.h.bf16 %v6007_v26 }
 0x3e4   : > { %v4371_v1 = vadd.f32 %v4315_v59, %v9946_v60  ;;  %5768 = vmatprep.mubr.bf16.mxu0 %v4497_v43  ;;  %v4428_v20 = vadd.f32 %v8987_v17, %v4373_v35  ;;  %v4473_v63 = vmax.f32 %v4425_v15, 0.0  ;;  %v6008_v35 = vld [vmem:[%s6232_s20 + $0x30] sm:$0xff]  }
 0x3e5   : > { %5769 = vmatmul.mubr.bf16.gmra.mxu0 %v4498_v7  ;;  %v4789_v15 = vunpack.c.l.bf16 %v6008_v35 }
 0x3e6   : > { %v4426_v28 = vadd.f32 %v8987_v17, %v4371_v1  ;;  %v4476_v0 = vmax.f32 %v4428_v20, 0.0  ;;  %v6009_v20 = vld [vmem:[%s6232_s20 + $0x38] sm:$0xff]  }
 0x3e8   : > { %v4474_v58 = vmax.f32 %v4426_v28, 0.0  ;;  %v4500_v21 = vpack.c.bf16 %v4476_v0, %v4475_v48  ;;  %v4791_v28 = vunpack.c.h.bf16 %v6009_v20  ;;  %v6016_v20 = vld [vmem:[%s6232_s20 + $0x78] sm:$0xff]  }
 0x3ea   : > { %v4499_v57 = vpack.c.bf16 %v4474_v58, %v4473_v63  ;;  %v4790_v58 = vunpack.c.h.bf16 %v6008_v35 }
 0x3eb   : > { %v5730_v31 = vpop.f32.mrf.mxu0 }
 0x3ec   : > { %5772 = vmatprep.mubr.bf16.mxu0 %v4499_v57 }
 0x3ed   : > { %5773 = vmatmul.mubr.bf16.gmra.mxu0 %v4500_v21  ;;  %v4606_v16 = vpop.f32.mrf.mxu0 }
 0x3ee   : > { %v4607_v17 = vadd.f32 %v9087_v51, %v4606_v16 }
 0x3ef   : > { %v5731_v54 = vpop.f32.mrf.mxu0 }
 0x3f0   : > { %v4813_v8 = vadd.f32 %v4781_v53, %v4607_v17  ;;  %v4617_v45 = vadd.f32 %v5731_v54, %v9087_v51 }
 0x3f1   : > { %v4609_v42 = vpop.f32.mrf.mxu0 }
 0x3f2   : > { %v4845_v47 = vmax.f32 %v4813_v8, 0.0  ;;  %v4815_v9 = vadd.f32 %v4783_v14, %v4617_v45  ;;  %v4610_v44 = vadd.f32 %v9087_v51, %v4609_v42  ;;  %v4793_v14 = vunpack.c.l.bf16 %v6010_v39  ;;  %v6011_v8 = vld [vmem:[%s6232_s20 + $0x40] sm:$0xff]  }
 0x3f3   : > { %v4792_v45 = vunpack.c.l.bf16 %v6011_v8 }
 0x3f4   : > { %4877 = vst [vmem:[%s9096_s21] sm:$0xff] %v4845_v47  ;;  %v4847_v38 = vmax.f32 %v4815_v9, 0.0  ;;  %v4814_v27 = vadd.f32 %v4782_v34, %v4610_v44  ;;  %v4794_v44 = vunpack.c.h.bf16 %v6010_v39 }
 0x3f6   : > { %4879 = vst [vmem:[%s9096_s21 + $0x10] sm:$0xff] %v4847_v38  ;;  %v4846_v62 = vmax.f32 %v4814_v27, 0.0 }
 0x3f8   : > { %4878 = vst [vmem:[%s9096_s21 + $0x8] sm:$0xff] %v4846_v62 }
 0x3fa   : > { %v5734_v55 = vpop.f32.mrf.mxu0 }
 0x3fb   : > { %v4629_v2 = vadd.f32 %v5734_v55, %v9087_v51 }
 0x3fc   : > { %v4621_v5 = vpop.f32.mrf.mxu0 }
 0x3fd   : > { %v4817_v6 = vadd.f32 %v4785_v22, %v4629_v2  ;;  %v4622_v30 = vadd.f32 %v9087_v51, %v4621_v5 }
 0x3fe   : > { %v5735_v4 = vpop.f32.mrf.mxu0 }
 0x3ff   : > { %v4849_v3 = vmax.f32 %v4817_v6, 0.0  ;;  %v4816_v37 = vadd.f32 %v4784_v33, %v4622_v30  ;;  %v4632_v25 = vadd.f32 %v5735_v4, %v9087_v51  ;;  %v6012_v33 = vld [vmem:[%s6232_s20 + $0x58] sm:$0xff]  }
 0x400   : > { %v4624_v32 = vpop.f32.mrf.mxu0  ;;  %v4796_v5 = vunpack.c.l.bf16 %v6012_v33 }
 0x401   : > { %4881 = vst [vmem:[%s9096_s21 + $0x20] sm:$0xff] %v4849_v3  ;;  %v4848_v49 = vmax.f32 %v4816_v37, 0.0  ;;  %v4818_v36 = vadd.f32 %v4786_v24, %v4632_v25  ;;  %v6013_v25 = vld [vmem:[%s6232_s20 + $0x50] sm:$0xff]  }
 0x402   : > { %v4795_v32 = vunpack.c.h.bf16 %v6013_v25 }
 0x403   : > { %4880 = vst [vmem:[%s9096_s21 + $0x18] sm:$0xff] %v4848_v49  ;;  %v4850_v11 = vmax.f32 %v4818_v36, 0.0 }
 0x405   : > { %4882 = vst [vmem:[%s9096_s21 + $0x28] sm:$0xff] %v4850_v11 }
 0x40a   : > { %v5738_v29 = vpop.f32.mrf.mxu0 }
 0x40b   : > { %v4644_v50 = vadd.f32 %v5738_v29, %v9087_v51  ;;  %v6014_v29 = vld [vmem:[%s6232_s20 + $0x60] sm:$0xff]  }
 0x40c   : > { %v4636_v40 = vpop.f32.mrf.mxu0 }
 0x40d   : > { %v4820_v56 = vadd.f32 %v4788_v61, %v4644_v50  ;;  %v4797_v50 = vunpack.c.l.bf16 %v6014_v29 }
 0x40e   : > { %v5739_v7 = vpop.f32.mrf.mxu0 }
 0x40f   : > { %v4852_v46 = vmax.f32 %v4820_v56, 0.0  ;;  %v6015_v7 = vld [vmem:[%s6232_s20 + $0x68] sm:$0xff]  }
 0x410   : > { %v4638_v18 = vpop.f32.mrf.mxu0 }
 0x411   : > { %4884 = vst [vmem:[%s9096_s21 + $0x38] sm:$0xff] %v4852_v46  ;;  %v4639_v52 = vadd.f32 %v9087_v51, %v4638_v18  ;;  %v4799_v46 = vunpack.c.h.bf16 %v6015_v7  ;;  %v6022_v7 = vld [vmem:[%s6232_s20 + $0xa8] sm:$0xff]  }
 0x413   : > { %v4819_v59 = vadd.f32 %v4787_v23, %v4639_v52  ;;  %v4798_v52 = vunpack.c.h.bf16 %v6014_v29 }
 0x415   : > { %v4851_v43 = vmax.f32 %v4819_v59, 0.0 }
 0x417   : > { %4883 = vst [vmem:[%s9096_s21 + $0x30] sm:$0xff] %v4851_v43 }
 0x41a   : > { %v5742_v19 = vpop.f32.mrf.mxu0 }
 0x41c   : > { %v4650_v60 = vpop.f32.mrf.mxu0 }
 0x41d   : > { %v4651_v1 = vadd.f32 %v9087_v51, %v4650_v60 }
 0x41e   : > { %v5743_v48 = vpop.f32.mrf.mxu0 }
 0x41f   : > { %v4821_v0 = vadd.f32 %v4789_v15, %v4651_v1  ;;  %v4661_v63 = vadd.f32 %v5743_v48, %v9087_v51 }
 0x420   : > { %v4653_v21 = vpop.f32.mrf.mxu0 }
 0x421   : > { %v4853_v57 = vmax.f32 %v4821_v0, 0.0  ;;  %v4823_v31 = vadd.f32 %v4791_v28, %v4661_v63  ;;  %v4654_v41 = vadd.f32 %v9087_v51, %v4653_v21  ;;  %v4801_v28 = vunpack.c.l.bf16 %v6016_v20  ;;  %v6017_v63 = vld [vmem:[%s6232_s20 + $0x70] sm:$0xff]  }
 0x423   : > { %4885 = vst [vmem:[%s9096_s21 + $0x40] sm:$0xff] %v4853_v57  ;;  %v4855_v53 = vmax.f32 %v4823_v31, 0.0  ;;  %v4822_v16 = vadd.f32 %v4790_v58, %v4654_v41  ;;  %v4800_v58 = vunpack.c.l.bf16 %v6017_v63  ;;  %v4802_v41 = vunpack.c.h.bf16 %v6016_v20  ;;  %v6024_v63 = vld [vmem:[%s6232_s20 + $0xb8] sm:$0xff]  }
 0x425   : > { %4887 = vst [vmem:[%s9096_s21 + $0x50] sm:$0xff] %v4855_v53  ;;  %v4854_v17 = vmax.f32 %v4822_v16, 0.0 }
 0x427   : > { %4886 = vst [vmem:[%s9096_s21 + $0x48] sm:$0xff] %v4854_v17 }
 0x42a   : > { %v5746_v54 = vpop.f32.mrf.mxu0 }
 0x42b   : > { %v4673_v34 = vadd.f32 %v5746_v54, %v9087_v51 }
 0x42c   : > { %v4665_v42 = vpop.f32.mrf.mxu0 }
 0x42d   : > { %v4825_v47 = vadd.f32 %v4793_v14, %v4673_v34  ;;  %v4666_v9 = vadd.f32 %v9087_v51, %v4665_v42 }
 0x42e   : > { %v5747_v38 = vpop.f32.mrf.mxu0 }
 0x42f   : > { %v4857_v27 = vmax.f32 %v4825_v47, 0.0  ;;  %v4824_v62 = vadd.f32 %v4792_v45, %v4666_v9  ;;  %v4676_v10 = vadd.f32 %v5747_v38, %v9087_v51  ;;  %v6018_v45 = vld [vmem:[%s6232_s20 + $0x88] sm:$0xff]  }
 0x430   : > { %v4668_v22 = vpop.f32.mrf.mxu0  ;;  %v4804_v42 = vunpack.c.l.bf16 %v6018_v45 }
 0x431   : > { %4889 = vst [vmem:[%s9096_s21 + $0x60] sm:$0xff] %v4857_v27  ;;  %v4856_v55 = vmax.f32 %v4824_v62, 0.0  ;;  %v4826_v2 = vadd.f32 %v4794_v44, %v4676_v10  ;;  %v6019_v10 = vld [vmem:[%s6232_s20 + $0x80] sm:$0xff]  }
 0x432   : > { %v4803_v22 = vunpack.c.h.bf16 %v6019_v10 }
 0x433   : > { %4888 = vst [vmem:[%s9096_s21 + $0x58] sm:$0xff] %v4856_v55  ;;  %v4858_v12 = vmax.f32 %v4826_v2, 0.0 }
 0x435   : > { %4890 = vst [vmem:[%s9096_s21 + $0x68] sm:$0xff] %v4858_v12 }
 0x43a   : > { %v5750_v6 = vpop.f32.mrf.mxu0 }
 0x43b   : > { %v4688_v30 = vadd.f32 %v5750_v6, %v9087_v51  ;;  %v6020_v6 = vld [vmem:[%s6232_s20 + $0x90] sm:$0xff]  }
 0x43c   : > { %v4680_v24 = vpop.f32.mrf.mxu0 }
 0x43d   : > { %v4828_v4 = vadd.f32 %v4796_v5, %v4688_v30  ;;  %v4805_v30 = vunpack.c.l.bf16 %v6020_v6 }
 0x43e   : > { %v5751_v3 = vpop.f32.mrf.mxu0 }
 0x43f   : > { %v4860_v37 = vmax.f32 %v4828_v4, 0.0  ;;  %v6021_v3 = vld [vmem:[%s6232_s20 + $0x98] sm:$0xff]  }
 0x440   : > { %v4682_v49 = vpop.f32.mrf.mxu0 }
 0x441   : > { %4892 = vst [vmem:[%s9096_s21 + $0x78] sm:$0xff] %v4860_v37  ;;  %v4683_v36 = vadd.f32 %v9087_v51, %v4682_v49  ;;  %v4807_v37 = vunpack.c.h.bf16 %v6021_v3 }
 0x443   : > { %v4827_v11 = vadd.f32 %v4795_v32, %v4683_v36  ;;  %v4806_v36 = vunpack.c.h.bf16 %v6020_v6 }
 0x445   : > { %v4859_v13 = vmax.f32 %v4827_v11, 0.0 }
 0x447   : > { %4891 = vst [vmem:[%s9096_s21 + $0x70] sm:$0xff] %v4859_v13 }
 0x44a   : > { %v5754_v61 = vpop.f32.mrf.mxu0 }
 0x44c   : > { %v4694_v40 = vpop.f32.mrf.mxu0 }
 0x44d   : > { %v4695_v56 = vadd.f32 %v9087_v51, %v4694_v40 }
 0x44e   : > { %v5755_v26 = vpop.f32.mrf.mxu0 }
 0x44f   : > { %v4829_v23 = vadd.f32 %v4797_v50, %v4695_v56  ;;  %v4705_v18 = vadd.f32 %v5755_v26, %v9087_v51 }
 0x450   : > { %v4697_v59 = vpop.f32.mrf.mxu0 }
 0x451   : > { %v4861_v43 = vmax.f32 %v4829_v23, 0.0  ;;  %v4831_v19 = vadd.f32 %v4799_v46, %v4705_v18  ;;  %v4698_v35 = vadd.f32 %v9087_v51, %v4697_v59  ;;  %v4809_v46 = vunpack.c.l.bf16 %v6022_v7  ;;  %v6023_v18 = vld [vmem:[%s6232_s20 + $0xa0] sm:$0xff]  }
 0x453   : > { %4893 = vst [vmem:[%s9096_s21 + $0x80] sm:$0xff] %v4861_v43  ;;  %v4863_v15 = vmax.f32 %v4831_v19, 0.0  ;;  %v4830_v60 = vadd.f32 %v4798_v52, %v4698_v35  ;;  %v4808_v52 = vunpack.c.l.bf16 %v6023_v18  ;;  %v4810_v35 = vunpack.c.h.bf16 %v6022_v7 }
 0x455   : > { %4895 = vst [vmem:[%s9096_s21 + $0x90] sm:$0xff] %v4863_v15  ;;  %v4862_v1 = vmax.f32 %v4830_v60, 0.0 }
 0x457   : > { %4894 = vst [vmem:[%s9096_s21 + $0x88] sm:$0xff] %v4862_v1 }
 0x45a   : > { %v5758_v48 = vpop.f32.mrf.mxu0 }
 0x45b   : > { %v4717_v0 = vadd.f32 %v5758_v48, %v9087_v51 }
 0x45c   : > { %v4709_v21 = vpop.f32.mrf.mxu0 }
 0x45d   : > { %v4833_v57 = vadd.f32 %v4801_v28, %v4717_v0  ;;  %v4710_v31 = vadd.f32 %v9087_v51, %v4709_v21 }
 0x45e   : > { %v5759_v53 = vpop.f32.mrf.mxu0 }
 0x45f   : > { %v4865_v16 = vmax.f32 %v4833_v57, 0.0  ;;  %v4832_v17 = vadd.f32 %v4800_v58, %v4710_v31  ;;  %v4720_v39 = vadd.f32 %v5759_v53, %v9087_v51  ;;  %v4812_v58 = vunpack.c.l.bf16 %v6024_v63 }
 0x460   : > { %v4712_v14 = vpop.f32.mrf.mxu0 }
 0x461   : > { %4897 = vst [vmem:[%s9096_s21 + $0xa0] sm:$0xff] %v4865_v16  ;;  %v4864_v54 = vmax.f32 %v4832_v17, 0.0  ;;  %v4834_v34 = vadd.f32 %v4802_v41, %v4720_v39  ;;  %v6025_v39 = vld [vmem:[%s6232_s20 + $0xb0] sm:$0xff]   ;;  %s9192_s20 = scalar_lea.sflag [#allocation3], %s348_s12 }
 0x462   : > { %v4811_v14 = vunpack.c.h.bf16 %v6025_v39 }
 0x463   : > { %4896 = vst [vmem:[%s9096_s21 + $0x98] sm:$0xff] %v4864_v54  ;;  %v4866_v8 = vmax.f32 %v4834_v34, 0.0 }
 0x465   : > { %4898 = vst [vmem:[%s9096_s21 + $0xa8] sm:$0xff] %v4866_v8 }
 0x46a   : > { %v5762_v47 = vpop.f32.mrf.mxu0 }
 0x46b   : > { %v4732_v9 = vadd.f32 %v5762_v47, %v9087_v51 }
 0x46c   : > { %v4724_v44 = vpop.f32.mrf.mxu0 }
 0x46d   : > { %v4836_v38 = vadd.f32 %v4804_v42, %v4732_v9 }
 0x46e   : > { %v5763_v27 = vpop.f32.mrf.mxu0 }
 0x46f   : > { %v4868_v62 = vmax.f32 %v4836_v38, 0.0 }
 0x470   : > { %v4726_v55 = vpop.f32.mrf.mxu0 }
 0x471   : > { %4900 = vst [vmem:[%s9096_s21 + $0xb8] sm:$0xff] %v4868_v62  ;;  %v4727_v2 = vadd.f32 %v9087_v51, %v4726_v55 }
 0x473   : > { %v4835_v12 = vadd.f32 %v4803_v22, %v4727_v2 }
 0x475   : > { %v4867_v33 = vmax.f32 %v4835_v12, 0.0 }
 0x477   : > { %4899 = vst [vmem:[%s9096_s21 + $0xb0] sm:$0xff] %v4867_v33 }
 0x47a   : > { %v5766_v5 = vpop.f32.mrf.mxu0 }
 0x47c   : > { %v4738_v24 = vpop.f32.mrf.mxu0 }
 0x47d   : > { %v4739_v4 = vadd.f32 %v9087_v51, %v4738_v24 }
 0x47e   : > { %v5767_v25 = vpop.f32.mrf.mxu0 }
 0x47f   : > { %v4837_v32 = vadd.f32 %v4805_v30, %v4739_v4  ;;  %v4749_v49 = vadd.f32 %v5767_v25, %v9087_v51 }
 0x480   : > { %v4741_v11 = vpop.f32.mrf.mxu0 }
 0x481   : > { %v4869_v13 = vmax.f32 %v4837_v32, 0.0  ;;  %v4839_v61 = vadd.f32 %v4807_v37, %v4749_v49  ;;  %v4742_v29 = vadd.f32 %v9087_v51, %v4741_v11 }
 0x483   : > { %4901 = vst [vmem:[%s9096_s21 + $0xc0] sm:$0xff] %v4869_v13  ;;  %v4871_v50 = vmax.f32 %v4839_v61, 0.0  ;;  %v4838_v40 = vadd.f32 %v4806_v36, %v4742_v29 }
 0x485   : > { %4903 = vst [vmem:[%s9096_s21 + $0xd0] sm:$0xff] %v4871_v50  ;;  %v4870_v56 = vmax.f32 %v4838_v40, 0.0 }
 0x487   : > { %4902 = vst [vmem:[%s9096_s21 + $0xc8] sm:$0xff] %v4870_v56 }
 0x4a5   : > { %v5770_v26 = vpop.f32.mrf.mxu0 }
 0x4a6   : > { %v4761_v23 = vadd.f32 %v5770_v26, %v9087_v51 }
 0x4a7   : > { %v4753_v59 = vpop.f32.mrf.mxu0 }
 0x4a8   : > { %v4841_v43 = vadd.f32 %v4809_v46, %v4761_v23  ;;  %v4754_v19 = vadd.f32 %v9087_v51, %v4753_v59 }
 0x4a9   : > { %v5771_v15 = vpop.f32.mrf.mxu0 }
 0x4aa   : > { %v4873_v60 = vmax.f32 %v4841_v43, 0.0  ;;  %v4840_v1 = vadd.f32 %v4808_v52, %v4754_v19  ;;  %v4764_v20 = vadd.f32 %v5771_v15, %v9087_v51 }
 0x4ab   : > { %v4756_v28 = vpop.f32.mrf.mxu0 }
 0x4ac   : > { %4905 = vst [vmem:[%s9096_s21 + $0xe0] sm:$0xff] %v4873_v60  ;;  %v4872_v48 = vmax.f32 %v4840_v1, 0.0  ;;  %v4842_v0 = vadd.f32 %v4810_v35, %v4764_v20 }
 0x4ad   : > { %v5774_v21 = vpop.f32.mrf.mxu0 }
 0x4ae   : > { %4904 = vst [vmem:[%s9096_s21 + $0xd8] sm:$0xff] %v4872_v48  ;;  %v4874_v57 = vmax.f32 %v4842_v0, 0.0  ;;  %v4776_v31 = vadd.f32 %v5774_v21, %v9087_v51 }
 0x4af   : > { %v4768_v41 = vpop.f32.mrf.mxu0 }
 0x4b0   : > { %4906 = vst [vmem:[%s9096_s21 + $0xe8] sm:$0xff] %v4874_v57  ;;  %v4844_v53 = vadd.f32 %v4812_v58, %v4776_v31 }
 0x4b1   : > { %v5775_v16 = vpop.f32.mrf.mxu0 }
 0x4b2   : > { %v4876_v17 = vmax.f32 %v4844_v53, 0.0 }
 0x4b3   : > { %v4770_v54 = vpop.f32.mrf.mxu0 }
 0x4b4   : > { %4908 = vst [vmem:[%s9096_s21 + $0xf8] sm:$0xff] %v4876_v17  ;;  %v4771_v34 = vadd.f32 %v9087_v51, %v4770_v54 }
 0x4b6   : > { %v4843_v8 = vadd.f32 %v4811_v14, %v4771_v34 }
 0x4b8   : > { %v4875_v45 = vmax.f32 %v4843_v8, 0.0 }
 0x4ba   : > { %4907 = vst [vmem:[%s9096_s21 + $0xf0] sm:$0xff] %v4875_v45 }
 0x4bb   : > { %6039 = shalt.err (!%p6036_p5)
}
 0x4bc   : > { %s6040_s12 = scalar_lea.hbm %s9185_s26, 4096  ;;  %s6044_s22 = scalar_lea.hbm %s9245_s8, 8192 }
 0x4bd   : > { %p6041_p6 = scmp.ne.s32.totalorder %s9185_s26, %s6040_s12  ;;  %p6045_p10 = scmp.lt.s32.totalorder %s9185_s26, %s9245_s8 }
 0x4be   : > { %p6046_p11 = scmp.lt.s32.totalorder %s6044_s22, %s6040_s12 }
 0x4bf   : > { %p6042_p7 = pnand %p6041_p6, %p6195_p4 }
 0x4c0   : > { %p6047_p12 = por %p6046_p11, %p6045_p10 }
 0x4c1   : > { %p6043_p9 = pneg %p6042_p7 }
 0x4c3   : > { %p6048_p13 = pnand %p6047_p12, %p6043_p9 }
 0x4c5   : > { %6051 = shalt.err (!%p6048_p13)
}
 0x4c6   : > { %s6108_s11 = smov 128   ;;  %s6109_s30 = smov 8  }
 0x4c7   : > { %5794 = dma.vmem_to_hbm [thread:$0]  (%p6195_p4), %s9187_s23, 4096, %s9185_s26, %s9192_s20, %s6108_s11, %s6108_s11, %s6109_s30  }
 0x4c8 PF: > { %p5800_p0 = scmp.ge.s32.totalorder %s6102_s10, 2  ;;  %s4941_s14 = sand.u32 1, %s6082_s27  }
 0x4c9   : > { %s4942_s16 = scalar_lea.sflag [#allocation3], %s4941_s14 }
 0x4ca   : > { %p5797_p1 = pnand %p5800_p0, %p6202_p8 }
 0x4cc   : > { %p5798_p2 = pneg %p5797_p1 }
 0x4ce   : > { %6077 = dma.done.wait (%p5798_p2), %s4942_s16, 4096  }
 0x4cf   : > { %6079 = vsyncadd (%p5798_p2), %s4942_s16, 4294963200  ;;  %s21_s10 = sadd.s32 1, %s6102_s10   ;;  %s9947_s27 = smov %s6086_s28 }
 0x4d0   : > { %p18_p3 = scmp.ge.s32.totalorder %s21_s10, 4   ;;  %s9948_s28 = smov %s6090_s29 }
 0x4d1   : > { %s9949_s29 = smov %s6208_s18  ;;  %s9950_s30 = smov %s6098_s9 }
 0x4d2   : > { %s9951_s9 = smov %s9953_s13  ;;  %20 = sbr.rel (!%p18_p3) target bundleno = 4 (0x4), region = 92 }
 0x4d7   :  { %4947 = vsyncpa [#allocation3], 1 }
 0x4d8   :  { %4949 = vsyncpa [#allocation3 + $0x1], 1 }

</bundles_post_ra>
